<compile_context>
chip_gen: v6e
topology: v6e:2x2x1
jax: 0.10.0
libtpu: 0.0.40
codegen_flags: <defaults>
</compile_context>

<pallas_src>
import functools

import jax
import jax.numpy as jnp
from jax.experimental import pallas as pl
from jax.experimental.pallas import tpu as pltpu

BN_EPS = 1e-5


# ---------------------------------------------------------------------------
# Kernel: B_TILE (n, w) slabs per grid step, both conv blocks fused.
# Padded layout "P": D padded by (2, 2), H padded by (1, 1), spatial flattened
# row-major to Sp = (D+4) * (H+2) rows with channels on the lane dim.
# ---------------------------------------------------------------------------
def unet_conv3_kernel(x_ref, w1_ref, s1_ref, w2_ref, s2_ref, o_ref, h_ref,
                      *, hp, lz, h_valid, fold, b_tile, squeeze):
    # x_ref : (b_tile, Sp, C_in)   bf16, zero-padded layout P   (2D if squeeze)
    # wK_ref: (9, Cin, Cout) bf16 (BN scale folded in), sK_ref: (1, Cout) f32
    # h_ref : (Sp, C1)       bf16 VMEM scratch (conv1 output in layout P)
    # o_ref : (b_tile, lz//fold, fold*C2) f32 (lane-packed)      (2D if squeeze)
    c1 = h_ref.shape[-1]
    lzf = lz // fold

    # Constant zero D-padding bands of the scratch; rewritten every grid step
    # (a few vreg rows) so correctness never depends on scratch state or on
    # how a "parallel" grid axis is split across TensorCores.
    zero_band = jnp.zeros((2 * hp, c1), h_ref.dtype)
    h_ref[pl.ds(0, 2 * hp), :] = zero_band                       # D padding (top)
    h_ref[pl.ds(2 * hp + lz, 2 * hp), :] = zero_band             # D padding (bottom)

    # Valid-H mask: zeroes the H-padding columns of conv1's output so the
    # scratch is a correctly zero-padded conv2 input.  Hoisted out of the
    # slab loop (broadcasts are not CSE'd by JAX).
    h_pos = jax.lax.broadcasted_iota(jnp.int32, (lz, c1), 0) % hp
    h_mask = (h_pos >= 1) & (h_pos <= h_valid)

    def conv3x3(load, w_ref, s_ref):
        c_out = w_ref.shape[-1]
        acc = jnp.zeros((lz, c_out), jnp.float32)
        # Output row r covers padded position q = 2*hp + r; tap (kd, kh) reads
        # padded row q + (kd-1)*hp + (kh-1) = r + (kd+1)*hp + kh - 1.
        for t in range(9):
            kd, kh = divmod(t, 3)
            start = (kd + 1) * hp + (kh - 1)
            acc = acc + jnp.dot(load(start), w_ref[t],
                                preferred_element_type=jnp.float32)
        return jnp.maximum(acc + s_ref[...], 0.0)                # BN shift + ReLU

    load_h = lambda s: h_ref[pl.ds(s, lz), :]

    for b in range(b_tile):
        if squeeze:
            load_x = lambda s: x_ref[pl.ds(s, lz), :]
        else:
            load_x = lambda s, b=b: x_ref[b, pl.ds(s, lz), :]

        # ---- conv1 + BN + ReLU -> VMEM scratch in padded layout P ----------
        y1 = conv3x3(load_x, w1_ref, s1_ref)
        h_ref[pl.ds(2 * hp, lz), :] = jnp.where(h_mask, y1, 0.0).astype(h_ref.dtype)

        # ---- conv2 + BN + ReLU -> lane-dense store --------------------------
        y2 = conv3x3(load_h, w2_ref, s2_ref)
        if fold > 1:
            # Pack `fold` consecutive spatial rows into one 128-lane output row
            # (row-major, so the wrapper undoes it with a plain reshape).
            y2 = y2.reshape(lzf, fold * y2.shape[-1])
        y2 = y2.astype(o_ref.dtype)
        if squeeze:
            o_ref[...] = y2
        else:
            o_ref[b, :, :] = y2


# ---------------------------------------------------------------------------
# Parameter preparation (shared by the kernel wrapper and the reference).
# ---------------------------------------------------------------------------
def _fold_bn(p):
    scale = p["gamma"] * jax.lax.rsqrt(p["var"] + BN_EPS)
    shift = ((p["b"] - p["mean"]) * scale + p["beta"]).astype(jnp.float32)
    w_folded = (p["w"] * scale[:, None, None, None, None]).astype(jnp.bfloat16)
    return w_folded, shift


def _prep_block(p):
    w_folded, shift = _fold_bn(p)
    c_out, c_in = w_folded.shape[0], w_folded.shape[1]
    # (C_out, C_in, 3, 3, 1) -> (kd, kh, C_in, C_out) -> (9, C_in, C_out)
    w_mat = jnp.transpose(w_folded[..., 0], (2, 3, 1, 0)).reshape(9, c_in, c_out)
    return w_mat, shift.reshape(1, c_out)


def _pick_b_tile(b, slab_bytes, *, max_tile=8, vmem_budget=8 << 20):
    """Largest divisor of b (<= max_tile) keeping >=2 grid steps and a small
    double-buffered block footprint."""
    best = 1
    for t in range(1, min(b, max_tile) + 1):
        if b % t:
            continue
        if 2 * t * slab_bytes > vmem_budget:
            continue
        if b >= 2 and b // t < 2:
            continue
        best = t
    return best


# ---------------------------------------------------------------------------
# Wrapper / pallas_call builder.
# ---------------------------------------------------------------------------
def build_unet_conv3(in_size, out_size, x_shape, *, lane_fold=True, b_tile=None,
                     max_b_tile=8):
    N, C_in, D, H, W = x_shape
    assert C_in == in_size
    C1 = C2 = out_size
    Hp, Dp = H + 2, D + 4
    Sp, Lz = Dp * Hp, D * Hp
    B = N * W

    fold = 1
    if lane_fold and C2 < 128 and 128 % C2 == 0 and Lz % (128 // C2) == 0:
        fold = 128 // C2
    Lzf, Cof = Lz // fold, fold * C2

    if b_tile is None:
        slab_bytes = Sp * C_in * 2 + Lzf * Cof * 4
        b_tile = _pick_b_tile(B, slab_bytes, max_tile=max_b_tile)
    assert B % b_tile == 0
    squeeze = (b_tile == 1)
    grid = (B // b_tile,)

    kern = functools.partial(unet_conv3_kernel, hp=Hp, lz=Lz, h_valid=H,
                             fold=fold, b_tile=b_tile, squeeze=squeeze)

    lead = (None,) if squeeze else (b_tile,)
    x_spec = pl.BlockSpec(lead + (Sp, C_in), lambda g: (g, 0, 0))
    out_spec = pl.BlockSpec(lead + (Lzf, Cof), lambda g: (g, 0, 0))
    out_struct = jax.ShapeDtypeStruct((B, Lzf, Cof), jnp.float32)

    conv_call = pl.pallas_call(
        kern,
        out_shape=out_struct,
        grid_spec=pltpu.PrefetchScalarGridSpec(
            num_scalar_prefetch=0,
            grid=grid,
            in_specs=[
                x_spec,
                # Grid-invariant operands: constant index_maps -> the pipeline
                # only DMAs them once (block index never changes).
                pl.BlockSpec((9, C_in, C1), lambda g: (0, 0, 0)),
                pl.BlockSpec((1, C1), lambda g: (0, 0)),
                pl.BlockSpec((9, C1, C2), lambda g: (0, 0, 0)),
                pl.BlockSpec((1, C2), lambda g: (0, 0)),
            ],
            out_specs=out_spec,
            scratch_shapes=[pltpu.VMEM((Sp, C1), jnp.bfloat16)],
        ),
        compiler_params=pltpu.CompilerParams(
            dimension_semantics=("parallel",),
        ),
    )

    @jax.jit
    def forward(x, params):
        w1, s1 = _prep_block(params["block1"])
        w2, s2 = _prep_block(params["block2"])
        # NCDHW -> (N, W, D, H, C): the (3,3,1) kernel only convolves (D, H),
        # so W is batch-like and is folded into the grid axis together with N.
        xt = jnp.transpose(x, (0, 4, 2, 3, 1)).astype(jnp.bfloat16)
        xt = jnp.pad(xt, ((0, 0), (0, 0), (2, 2), (1, 1), (0, 0)))
        xt = xt.reshape(B, Sp, C_in)
        out = conv_call(xt, w1, s1, w2, s2)            # lane-packed, layout P rows
        out = out.reshape(B, D, Hp, C2)[:, :, 1:1 + H, :]
        out = out.reshape(N, W, D, H, C2)
        return jnp.transpose(out, (0, 4, 2, 3, 1))     # back to NCDHW

    return forward


# ---------------------------------------------------------------------------
# Pure-JAX reference (same bf16 operand / f32 accumulation factorization).
# ---------------------------------------------------------------------------
def _ref_block(x, p):
    w_folded, shift = _fold_bn(p)
    y = jax.lax.conv_general_dilated(
        x.astype(jnp.bfloat16), w_folded,
        window_strides=(1, 1, 1),
        padding=((1, 1), (1, 1), (0, 0)),
        dimension_numbers=("NCDHW", "OIDHW", "NCDHW"),
        preferred_element_type=jnp.float32)
    return jnp.maximum(y + shift.reshape(1, -1, 1, 1, 1), 0.0)


def ref_forward(x, params):
    return _ref_block(_ref_block(x, params["block1"]), params["block2"])


def init_params(key, in_size, out_size):
    ks = jax.random.split(key, 12)

    def block(keys, cin, cout):
        return dict(
            w=0.1 * jax.random.normal(keys[0], (cout, cin, 3, 3, 1), jnp.float32),
            b=0.1 * jax.random.normal(keys[1], (cout,), jnp.float32),
            gamma=1.0 + 0.1 * jax.random.normal(keys[2], (cout,), jnp.float32),
            beta=0.1 * jax.random.normal(keys[3], (cout,), jnp.float32),
            mean=0.1 * jax.random.normal(keys[4], (cout,), jnp.float32),
            var=0.5 + jnp.abs(jax.random.normal(keys[5], (cout,), jnp.float32)),
        )

    return dict(block1=block(ks[:6], in_size, out_size),
                block2=block(ks[6:], out_size, out_size))


if __name__ == "__main__":
    key = jax.random.PRNGKey(0)
    k_x, k_p = jax.random.split(key)

    # Small shapes: N=2, C_in=8, D=8, H=8, W=4 ; out_size=16.
    N, in_size, out_size, D, H, W = 2, 8, 16, 8, 8, 4
    x = jax.random.normal(k_x, (N, in_size, D, H, W), jnp.float32)
    params = init_params(k_p, in_size, out_size)

    ref = jax.block_until_ready(ref_forward(x, params))

    def run(fwd):
        out = jax.block_until_ready(fwd(x, params))
        assert out.shape == ref.shape == (N, out_size, D, H, W)
        err = float(jnp.max(jnp.abs(out - ref)))
        assert jnp.allclose(out, ref, atol=1e-2, rtol=1e-2), err
        return out

    # Primary: batched slabs + lane-dense stores.  Fallbacks keep the exact
    # same math with progressively more conservative (previously validated)
    # layouts, in case a toolchain rejects a purely layout-level lowering.
    configs = [
        dict(lane_fold=True, b_tile=None),   # batched + lane-packed (preferred)
        dict(lane_fold=True, b_tile=1),      # one slab / step, lane-packed
        dict(lane_fold=False, b_tile=1),     # one slab / step, plain store
    ]
    out, last_err = None, None
    for cfg in configs:
        try:
            out = run(build_unet_conv3(in_size, out_size, x.shape, **cfg))
            break
        except Exception as e:   # noqa: BLE001 - try next (more conservative) config
            last_err = e
    if out is None:
        raise last_err

    print("KERNEL_OK")
</pallas_src>

<mosaic_0001>
module attributes {stable_mosaic.version = 11 : i64} {
  func.func @unet_conv3_kernel(%arg0: i32, %arg1: memref<4x120x8xbf16, #tpu.memory_space<vmem>>, %arg2: memref<9x8x16xbf16, #tpu.memory_space<vmem>>, %arg3: memref<1x16xf32, #tpu.memory_space<vmem>>, %arg4: memref<9x16x16xbf16, #tpu.memory_space<vmem>>, %arg5: memref<1x16xf32, #tpu.memory_space<vmem>>, %arg6: memref<4x10x128xf32, #tpu.memory_space<vmem>>, %arg7: memref<120x16xbf16, #tpu.memory_space<vmem>>) attributes {dimension_semantics = [#tpu.dimension_semantics<parallel>], iteration_bounds = array<i64: 2>, scalar_prefetch = 0 : i64, scratch_operands = 1 : i64, tpu.core_type = #tpu.core_type<tc>, window_params = [{transform_indices = @transform_0, window_bounds = array<i64: 4, 120, 8>}, {pipeline_mode = #tpu.pipeline_mode<synchronous>, transform_indices = @transform_1, window_bounds = array<i64: 9, 8, 16>}, {pipeline_mode = #tpu.pipeline_mode<synchronous>, transform_indices = @transform_2, window_bounds = array<i64: 1, 16>}, {pipeline_mode = #tpu.pipeline_mode<synchronous>, transform_indices = @transform_3, window_bounds = array<i64: 9, 16, 16>}, {pipeline_mode = #tpu.pipeline_mode<synchronous>, transform_indices = @transform_4, window_bounds = array<i64: 1, 16>}, {transform_indices = @transform_5, window_bounds = array<i64: 4, 10, 128>}]} {
    %cst = arith.constant 0.000000e+00 : bf16
    %0 = vector.broadcast %cst : bf16 to vector<20x16xbf16>
    %c0 = arith.constant 0 : index
    %c0_0 = arith.constant 0 : index
    %1 = vector.load %arg7[%c0, %c0_0] : memref<120x16xbf16, #tpu.memory_space<vmem>>, vector<20x16xbf16>
    tpu.vector_store %arg7[%c0, %c0_0], %0 {strides = array<i32>} : memref<120x16xbf16, #tpu.memory_space<vmem>>, vector<20x16xbf16>,
    %c100 = arith.constant 100 : index
    %c0_1 = arith.constant 0 : index
    %2 = vector.load %arg7[%c100, %c0_1] : memref<120x16xbf16, #tpu.memory_space<vmem>>, vector<20x16xbf16>
    tpu.vector_store %arg7[%c100, %c0_1], %0 {strides = array<i32>} : memref<120x16xbf16, #tpu.memory_space<vmem>>, vector<20x16xbf16>,
    %3 = tpu.iota {dimensions = array<i32: 0>} : vector<80x16xi32>
    %c10_i32 = arith.constant 10 : i32
    %c0_i32 = arith.constant 0 : i32
    %4 = arith.cmpi eq, %c10_i32, %c0_i32 : i32
    %c1_i32 = arith.constant 1 : i32
    %5 = arith.select %4, %c1_i32, %c10_i32 : i32
    %6 = vector.broadcast %5 : i32 to vector<80x16xi32>
    %7 = arith.remsi %3, %6 : vector<80x16xi32>
    %c0_i32_2 = arith.constant 0 : i32
    %8 = vector.broadcast %c0_i32_2 : i32 to vector<80x16xi32>
    %9 = arith.cmpi ne, %7, %8 : vector<80x16xi32>
    %c0_i32_3 = arith.constant 0 : i32
    %10 = vector.broadcast %c0_i32_3 : i32 to vector<80x16xi32>
    %11 = arith.cmpi slt, %7, %10 : vector<80x16xi32>
    %c0_i32_4 = arith.constant 0 : i32
    %12 = arith.cmpi slt, %5, %c0_i32_4 : i32
    %13 = vector.broadcast %12 : i1 to vector<80x16xi1>
    %14 = vector.broadcast %13 : vector<80x16xi1> to vector<80x16xi1>
    %15 = arith.xori %11, %14 : vector<80x16xi1>
    %16 = arith.andi %15, %9 : vector<80x16xi1>
    %17 = vector.broadcast %5 : i32 to vector<80x16xi32>
    %18 = arith.addi %7, %17 : vector<80x16xi32>
    %19 = arith.select %16, %18, %7 : vector<80x16xi1>, vector<80x16xi32>
    %c1_i32_5 = arith.constant 1 : i32
    %20 = vector.broadcast %c1_i32_5 : i32 to vector<80x16xi32>
    %21 = arith.cmpi sge, %19, %20 : vector<80x16xi32>
    %c8_i32 = arith.constant 8 : i32
    %22 = vector.broadcast %c8_i32 : i32 to vector<80x16xi32>
    %23 = arith.cmpi sle, %19, %22 : vector<80x16xi32>
    %24 = arith.andi %21, %23 : vector<80x16xi1>
    %cst_6 = arith.constant 0.000000e+00 : f32
    %25 = vector.broadcast %cst_6 : f32 to vector<80x16xf32>
    %c0_7 = arith.constant 0 : index
    %c9 = arith.constant 9 : index
    %c0_8 = arith.constant 0 : index
    %26 = vector.load %arg1[%c0_7, %c9, %c0_8] : memref<4x120x8xbf16, #tpu.memory_space<vmem>>, vector<1x80x8xbf16>
    %27 = vector.shape_cast %26 : vector<1x80x8xbf16> to vector<80x8xbf16>
    %c0_9 = arith.constant 0 : index
    %c0_10 = arith.constant 0 : index
    %c0_11 = arith.constant 0 : index
    %28 = vector.load %arg2[%c0_9, %c0_10, %c0_11] : memref<9x8x16xbf16, #tpu.memory_space<vmem>>, vector<1x8x16xbf16>
    %29 = vector.shape_cast %28 : vector<1x8x16xbf16> to vector<8x16xbf16>
    %cst_12 = arith.constant dense<0.000000e+00> : vector<80x16xf32>
    %30 = tpu.matmul %27, %29, %cst_12 {dimension_numbers = #tpu.dot_dimension_numbers<[1], [0], [0], [1], [0, 0, 1, 1], [], []>} : vector<80x8xbf16>, vector<8x16xbf16>, vector<80x16xf32> -> vector<80x16xf32>
    %31 = arith.addf %25, %30 : vector<80x16xf32>
    %c0_13 = arith.constant 0 : index
    %c10 = arith.constant 10 : index
    %c0_14 = arith.constant 0 : index
    %32 = vector.load %arg1[%c0_13, %c10, %c0_14] : memref<4x120x8xbf16, #tpu.memory_space<vmem>>, vector<1x80x8xbf16>
    %33 = vector.shape_cast %32 : vector<1x80x8xbf16> to vector<80x8xbf16>
    %c1 = arith.constant 1 : index
    %c0_15 = arith.constant 0 : index
    %c0_16 = arith.constant 0 : index
    %34 = vector.load %arg2[%c1, %c0_15, %c0_16] : memref<9x8x16xbf16, #tpu.memory_space<vmem>>, vector<1x8x16xbf16>
    %35 = vector.shape_cast %34 : vector<1x8x16xbf16> to vector<8x16xbf16>
    %cst_17 = arith.constant dense<0.000000e+00> : vector<80x16xf32>
    %36 = tpu.matmul %33, %35, %cst_17 {dimension_numbers = #tpu.dot_dimension_numbers<[1], [0], [0], [1], [0, 0, 1, 1], [], []>} : vector<80x8xbf16>, vector<8x16xbf16>, vector<80x16xf32> -> vector<80x16xf32>
    %37 = arith.addf %31, %36 : vector<80x16xf32>
    %c0_18 = arith.constant 0 : index
    %c11 = arith.constant 11 : index
    %c0_19 = arith.constant 0 : index
    %38 = vector.load %arg1[%c0_18, %c11, %c0_19] : memref<4x120x8xbf16, #tpu.memory_space<vmem>>, vector<1x80x8xbf16>
    %39 = vector.shape_cast %38 : vector<1x80x8xbf16> to vector<80x8xbf16>
    %c2 = arith.constant 2 : index
    %c0_20 = arith.constant 0 : index
    %c0_21 = arith.constant 0 : index
    %40 = vector.load %arg2[%c2, %c0_20, %c0_21] : memref<9x8x16xbf16, #tpu.memory_space<vmem>>, vector<1x8x16xbf16>
    %41 = vector.shape_cast %40 : vector<1x8x16xbf16> to vector<8x16xbf16>
    %cst_22 = arith.constant dense<0.000000e+00> : vector<80x16xf32>
    %42 = tpu.matmul %39, %41, %cst_22 {dimension_numbers = #tpu.dot_dimension_numbers<[1], [0], [0], [1], [0, 0, 1, 1], [], []>} : vector<80x8xbf16>, vector<8x16xbf16>, vector<80x16xf32> -> vector<80x16xf32>
    %43 = arith.addf %37, %42 : vector<80x16xf32>
    %c0_23 = arith.constant 0 : index
    %c19 = arith.constant 19 : index
    %c0_24 = arith.constant 0 : index
    %44 = vector.load %arg1[%c0_23, %c19, %c0_24] : memref<4x120x8xbf16, #tpu.memory_space<vmem>>, vector<1x80x8xbf16>
    %45 = vector.shape_cast %44 : vector<1x80x8xbf16> to vector<80x8xbf16>
    %c3 = arith.constant 3 : index
    %c0_25 = arith.constant 0 : index
    %c0_26 = arith.constant 0 : index
    %46 = vector.load %arg2[%c3, %c0_25, %c0_26] : memref<9x8x16xbf16, #tpu.memory_space<vmem>>, vector<1x8x16xbf16>
    %47 = vector.shape_cast %46 : vector<1x8x16xbf16> to vector<8x16xbf16>
    %cst_27 = arith.constant dense<0.000000e+00> : vector<80x16xf32>
    %48 = tpu.matmul %45, %47, %cst_27 {dimension_numbers = #tpu.dot_dimension_numbers<[1], [0], [0], [1], [0, 0, 1, 1], [], []>} : vector<80x8xbf16>, vector<8x16xbf16>, vector<80x16xf32> -> vector<80x16xf32>
    %49 = arith.addf %43, %48 : vector<80x16xf32>
    %c0_28 = arith.constant 0 : index
    %c20 = arith.constant 20 : index
    %c0_29 = arith.constant 0 : index
    %50 = vector.load %arg1[%c0_28, %c20, %c0_29] : memref<4x120x8xbf16, #tpu.memory_space<vmem>>, vector<1x80x8xbf16>
    %51 = vector.shape_cast %50 : vector<1x80x8xbf16> to vector<80x8xbf16>
    %c4 = arith.constant 4 : index
    %c0_30 = arith.constant 0 : index
    %c0_31 = arith.constant 0 : index
    %52 = vector.load %arg2[%c4, %c0_30, %c0_31] : memref<9x8x16xbf16, #tpu.memory_space<vmem>>, vector<1x8x16xbf16>
    %53 = vector.shape_cast %52 : vector<1x8x16xbf16> to vector<8x16xbf16>
    %cst_32 = arith.constant dense<0.000000e+00> : vector<80x16xf32>
    %54 = tpu.matmul %51, %53, %cst_32 {dimension_numbers = #tpu.dot_dimension_numbers<[1], [0], [0], [1], [0, 0, 1, 1], [], []>} : vector<80x8xbf16>, vector<8x16xbf16>, vector<80x16xf32> -> vector<80x16xf32>
    %55 = arith.addf %49, %54 : vector<80x16xf32>
    %c0_33 = arith.constant 0 : index
    %c21 = arith.constant 21 : index
    %c0_34 = arith.constant 0 : index
    %56 = vector.load %arg1[%c0_33, %c21, %c0_34] : memref<4x120x8xbf16, #tpu.memory_space<vmem>>, vector<1x80x8xbf16>
    %57 = vector.shape_cast %56 : vector<1x80x8xbf16> to vector<80x8xbf16>
    %c5 = arith.constant 5 : index
    %c0_35 = arith.constant 0 : index
    %c0_36 = arith.constant 0 : index
    %58 = vector.load %arg2[%c5, %c0_35, %c0_36] : memref<9x8x16xbf16, #tpu.memory_space<vmem>>, vector<1x8x16xbf16>
    %59 = vector.shape_cast %58 : vector<1x8x16xbf16> to vector<8x16xbf16>
    %cst_37 = arith.constant dense<0.000000e+00> : vector<80x16xf32>
    %60 = tpu.matmul %57, %59, %cst_37 {dimension_numbers = #tpu.dot_dimension_numbers<[1], [0], [0], [1], [0, 0, 1, 1], [], []>} : vector<80x8xbf16>, vector<8x16xbf16>, vector<80x16xf32> -> vector<80x16xf32>
    %61 = arith.addf %55, %60 : vector<80x16xf32>
    %c0_38 = arith.constant 0 : index
    %c29 = arith.constant 29 : index
    %c0_39 = arith.constant 0 : index
    %62 = vector.load %arg1[%c0_38, %c29, %c0_39] : memref<4x120x8xbf16, #tpu.memory_space<vmem>>, vector<1x80x8xbf16>
    %63 = vector.shape_cast %62 : vector<1x80x8xbf16> to vector<80x8xbf16>
    %c6 = arith.constant 6 : index
    %c0_40 = arith.constant 0 : index
    %c0_41 = arith.constant 0 : index
    %64 = vector.load %arg2[%c6, %c0_40, %c0_41] : memref<9x8x16xbf16, #tpu.memory_space<vmem>>, vector<1x8x16xbf16>
    %65 = vector.shape_cast %64 : vector<1x8x16xbf16> to vector<8x16xbf16>
    %cst_42 = arith.constant dense<0.000000e+00> : vector<80x16xf32>
    %66 = tpu.matmul %63, %65, %cst_42 {dimension_numbers = #tpu.dot_dimension_numbers<[1], [0], [0], [1], [0, 0, 1, 1], [], []>} : vector<80x8xbf16>, vector<8x16xbf16>, vector<80x16xf32> -> vector<80x16xf32>
    %67 = arith.addf %61, %66 : vector<80x16xf32>
    %c0_43 = arith.constant 0 : index
    %c30 = arith.constant 30 : index
    %c0_44 = arith.constant 0 : index
    %68 = vector.load %arg1[%c0_43, %c30, %c0_44] : memref<4x120x8xbf16, #tpu.memory_space<vmem>>, vector<1x80x8xbf16>
    %69 = vector.shape_cast %68 : vector<1x80x8xbf16> to vector<80x8xbf16>
    %c7 = arith.constant 7 : index
    %c0_45 = arith.constant 0 : index
    %c0_46 = arith.constant 0 : index
    %70 = vector.load %arg2[%c7, %c0_45, %c0_46] : memref<9x8x16xbf16, #tpu.memory_space<vmem>>, vector<1x8x16xbf16>
    %71 = vector.shape_cast %70 : vector<1x8x16xbf16> to vector<8x16xbf16>
    %cst_47 = arith.constant dense<0.000000e+00> : vector<80x16xf32>
    %72 = tpu.matmul %69, %71, %cst_47 {dimension_numbers = #tpu.dot_dimension_numbers<[1], [0], [0], [1], [0, 0, 1, 1], [], []>} : vector<80x8xbf16>, vector<8x16xbf16>, vector<80x16xf32> -> vector<80x16xf32>
    %73 = arith.addf %67, %72 : vector<80x16xf32>
    %c0_48 = arith.constant 0 : index
    %c31 = arith.constant 31 : index
    %c0_49 = arith.constant 0 : index
    %74 = vector.load %arg1[%c0_48, %c31, %c0_49] : memref<4x120x8xbf16, #tpu.memory_space<vmem>>, vector<1x80x8xbf16>
    %75 = vector.shape_cast %74 : vector<1x80x8xbf16> to vector<80x8xbf16>
    %c8 = arith.constant 8 : index
    %c0_50 = arith.constant 0 : index
    %c0_51 = arith.constant 0 : index
    %76 = vector.load %arg2[%c8, %c0_50, %c0_51] : memref<9x8x16xbf16, #tpu.memory_space<vmem>>, vector<1x8x16xbf16>
    %77 = vector.shape_cast %76 : vector<1x8x16xbf16> to vector<8x16xbf16>
    %cst_52 = arith.constant dense<0.000000e+00> : vector<80x16xf32>
    %78 = tpu.matmul %75, %77, %cst_52 {dimension_numbers = #tpu.dot_dimension_numbers<[1], [0], [0], [1], [0, 0, 1, 1], [], []>} : vector<80x8xbf16>, vector<8x16xbf16>, vector<80x16xf32> -> vector<80x16xf32>
    %79 = arith.addf %73, %78 : vector<80x16xf32>
    %c0_53 = arith.constant 0 : index
    %c0_54 = arith.constant 0 : index
    %80 = vector.load %arg3[%c0_53, %c0_54] : memref<1x16xf32, #tpu.memory_space<vmem>>, vector<1x16xf32>
    %81 = vector.broadcast %80 : vector<1x16xf32> to vector<80x16xf32>
    %82 = arith.addf %79, %81 : vector<80x16xf32>
    %cst_55 = arith.constant 0.000000e+00 : f32
    %83 = vector.broadcast %cst_55 : f32 to vector<80x16xf32>
    %84 = arith.maximumf %82, %83 : vector<80x16xf32>
    %cst_56 = arith.constant 0.000000e+00 : f32
    %85 = vector.broadcast %cst_56 : f32 to vector<80x16xf32>
    %86 = arith.select %24, %84, %85 : vector<80x16xi1>, vector<80x16xf32>
    %87 = arith.truncf %86 : vector<80x16xf32> to vector<80x16xbf16>
    %c20_57 = arith.constant 20 : index
    %c0_58 = arith.constant 0 : index
    %88 = vector.load %arg7[%c20_57, %c0_58] : memref<120x16xbf16, #tpu.memory_space<vmem>>, vector<80x16xbf16>
    tpu.vector_store %arg7[%c20_57, %c0_58], %87 {strides = array<i32>} : memref<120x16xbf16, #tpu.memory_space<vmem>>, vector<80x16xbf16>,
    %cst_59 = arith.constant 0.000000e+00 : f32
    %89 = vector.broadcast %cst_59 : f32 to vector<80x16xf32>
    %c9_60 = arith.constant 9 : index
    %c0_61 = arith.constant 0 : index
    %90 = vector.load %arg7[%c9_60, %c0_61] : memref<120x16xbf16, #tpu.memory_space<vmem>>, vector<80x16xbf16>
    %c0_62 = arith.constant 0 : index
    %c0_63 = arith.constant 0 : index
    %c0_64 = arith.constant 0 : index
    %91 = vector.load %arg4[%c0_62, %c0_63, %c0_64] : memref<9x16x16xbf16, #tpu.memory_space<vmem>>, vector<1x16x16xbf16>
    %92 = vector.shape_cast %91 : vector<1x16x16xbf16> to vector<16x16xbf16>
    %cst_65 = arith.constant dense<0.000000e+00> : vector<80x16xf32>
    %93 = tpu.matmul %90, %92, %cst_65 {dimension_numbers = #tpu.dot_dimension_numbers<[1], [0], [0], [1], [0, 0, 1, 1], [], []>} : vector<80x16xbf16>, vector<16x16xbf16>, vector<80x16xf32> -> vector<80x16xf32>
    %94 = arith.addf %89, %93 : vector<80x16xf32>
    %c10_66 = arith.constant 10 : index
    %c0_67 = arith.constant 0 : index
    %95 = vector.load %arg7[%c10_66, %c0_67] : memref<120x16xbf16, #tpu.memory_space<vmem>>, vector<80x16xbf16>
    %c1_68 = arith.constant 1 : index
    %c0_69 = arith.constant 0 : index
    %c0_70 = arith.constant 0 : index
    %96 = vector.load %arg4[%c1_68, %c0_69, %c0_70] : memref<9x16x16xbf16, #tpu.memory_space<vmem>>, vector<1x16x16xbf16>
    %97 = vector.shape_cast %96 : vector<1x16x16xbf16> to vector<16x16xbf16>
    %cst_71 = arith.constant dense<0.000000e+00> : vector<80x16xf32>
    %98 = tpu.matmul %95, %97, %cst_71 {dimension_numbers = #tpu.dot_dimension_numbers<[1], [0], [0], [1], [0, 0, 1, 1], [], []>} : vector<80x16xbf16>, vector<16x16xbf16>, vector<80x16xf32> -> vector<80x16xf32>
    %99 = arith.addf %94, %98 : vector<80x16xf32>
    %c11_72 = arith.constant 11 : index
    %c0_73 = arith.constant 0 : index
    %100 = vector.load %arg7[%c11_72, %c0_73] : memref<120x16xbf16, #tpu.memory_space<vmem>>, vector<80x16xbf16>
    %c2_74 = arith.constant 2 : index
    %c0_75 = arith.constant 0 : index
    %c0_76 = arith.constant 0 : index
    %101 = vector.load %arg4[%c2_74, %c0_75, %c0_76] : memref<9x16x16xbf16, #tpu.memory_space<vmem>>, vector<1x16x16xbf16>
    %102 = vector.shape_cast %101 : vector<1x16x16xbf16> to vector<16x16xbf16>
    %cst_77 = arith.constant dense<0.000000e+00> : vector<80x16xf32>
    %103 = tpu.matmul %100, %102, %cst_77 {dimension_numbers = #tpu.dot_dimension_numbers<[1], [0], [0], [1], [0, 0, 1, 1], [], []>} : vector<80x16xbf16>, vector<16x16xbf16>, vector<80x16xf32> -> vector<80x16xf32>
    %104 = arith.addf %99, %103 : vector<80x16xf32>
    %c19_78 = arith.constant 19 : index
    %c0_79 = arith.constant 0 : index
    %105 = vector.load %arg7[%c19_78, %c0_79] : memref<120x16xbf16, #tpu.memory_space<vmem>>, vector<80x16xbf16>
    %c3_80 = arith.constant 3 : index
    %c0_81 = arith.constant 0 : index
    %c0_82 = arith.constant 0 : index
    %106 = vector.load %arg4[%c3_80, %c0_81, %c0_82] : memref<9x16x16xbf16, #tpu.memory_space<vmem>>, vector<1x16x16xbf16>
    %107 = vector.shape_cast %106 : vector<1x16x16xbf16> to vector<16x16xbf16>
    %cst_83 = arith.constant dense<0.000000e+00> : vector<80x16xf32>
    %108 = tpu.matmul %105, %107, %cst_83 {dimension_numbers = #tpu.dot_dimension_numbers<[1], [0], [0], [1], [0, 0, 1, 1], [], []>} : vector<80x16xbf16>, vector<16x16xbf16>, vector<80x16xf32> -> vector<80x16xf32>
    %109 = arith.addf %104, %108 : vector<80x16xf32>
    %c20_84 = arith.constant 20 : index
    %c0_85 = arith.constant 0 : index
    %110 = vector.load %arg7[%c20_84, %c0_85] : memref<120x16xbf16, #tpu.memory_space<vmem>>, vector<80x16xbf16>
    %c4_86 = arith.constant 4 : index
    %c0_87 = arith.constant 0 : index
    %c0_88 = arith.constant 0 : index
    %111 = vector.load %arg4[%c4_86, %c0_87, %c0_88] : memref<9x16x16xbf16, #tpu.memory_space<vmem>>, vector<1x16x16xbf16>
    %112 = vector.shape_cast %111 : vector<1x16x16xbf16> to vector<16x16xbf16>
    %cst_89 = arith.constant dense<0.000000e+00> : vector<80x16xf32>
    %113 = tpu.matmul %110, %112, %cst_89 {dimension_numbers = #tpu.dot_dimension_numbers<[1], [0], [0], [1], [0, 0, 1, 1], [], []>} : vector<80x16xbf16>, vector<16x16xbf16>, vector<80x16xf32> -> vector<80x16xf32>
    %114 = arith.addf %109, %113 : vector<80x16xf32>
    %c21_90 = arith.constant 21 : index
    %c0_91 = arith.constant 0 : index
    %115 = vector.load %arg7[%c21_90, %c0_91] : memref<120x16xbf16, #tpu.memory_space<vmem>>, vector<80x16xbf16>
    %c5_92 = arith.constant 5 : index
    %c0_93 = arith.constant 0 : index
    %c0_94 = arith.constant 0 : index
    %116 = vector.load %arg4[%c5_92, %c0_93, %c0_94] : memref<9x16x16xbf16, #tpu.memory_space<vmem>>, vector<1x16x16xbf16>
    %117 = vector.shape_cast %116 : vector<1x16x16xbf16> to vector<16x16xbf16>
    %cst_95 = arith.constant dense<0.000000e+00> : vector<80x16xf32>
    %118 = tpu.matmul %115, %117, %cst_95 {dimension_numbers = #tpu.dot_dimension_numbers<[1], [0], [0], [1], [0, 0, 1, 1], [], []>} : vector<80x16xbf16>, vector<16x16xbf16>, vector<80x16xf32> -> vector<80x16xf32>
    %119 = arith.addf %114, %118 : vector<80x16xf32>
    %c29_96 = arith.constant 29 : index
    %c0_97 = arith.constant 0 : index
    %120 = vector.load %arg7[%c29_96, %c0_97] : memref<120x16xbf16, #tpu.memory_space<vmem>>, vector<80x16xbf16>
    %c6_98 = arith.constant 6 : index
    %c0_99 = arith.constant 0 : index
    %c0_100 = arith.constant 0 : index
    %121 = vector.load %arg4[%c6_98, %c0_99, %c0_100] : memref<9x16x16xbf16, #tpu.memory_space<vmem>>, vector<1x16x16xbf16>
    %122 = vector.shape_cast %121 : vector<1x16x16xbf16> to vector<16x16xbf16>
    %cst_101 = arith.constant dense<0.000000e+00> : vector<80x16xf32>
    %123 = tpu.matmul %120, %122, %cst_101 {dimension_numbers = #tpu.dot_dimension_numbers<[1], [0], [0], [1], [0, 0, 1, 1], [], []>} : vector<80x16xbf16>, vector<16x16xbf16>, vector<80x16xf32> -> vector<80x16xf32>
    %124 = arith.addf %119, %123 : vector<80x16xf32>
    %c30_102 = arith.constant 30 : index
    %c0_103 = arith.constant 0 : index
    %125 = vector.load %arg7[%c30_102, %c0_103] : memref<120x16xbf16, #tpu.memory_space<vmem>>, vector<80x16xbf16>
    %c7_104 = arith.constant 7 : index
    %c0_105 = arith.constant 0 : index
    %c0_106 = arith.constant 0 : index
    %126 = vector.load %arg4[%c7_104, %c0_105, %c0_106] : memref<9x16x16xbf16, #tpu.memory_space<vmem>>, vector<1x16x16xbf16>
    %127 = vector.shape_cast %126 : vector<1x16x16xbf16> to vector<16x16xbf16>
    %cst_107 = arith.constant dense<0.000000e+00> : vector<80x16xf32>
    %128 = tpu.matmul %125, %127, %cst_107 {dimension_numbers = #tpu.dot_dimension_numbers<[1], [0], [0], [1], [0, 0, 1, 1], [], []>} : vector<80x16xbf16>, vector<16x16xbf16>, vector<80x16xf32> -> vector<80x16xf32>
    %129 = arith.addf %124, %128 : vector<80x16xf32>
    %c31_108 = arith.constant 31 : index
    %c0_109 = arith.constant 0 : index
    %130 = vector.load %arg7[%c31_108, %c0_109] : memref<120x16xbf16, #tpu.memory_space<vmem>>, vector<80x16xbf16>
    %c8_110 = arith.constant 8 : index
    %c0_111 = arith.constant 0 : index
    %c0_112 = arith.constant 0 : index
    %131 = vector.load %arg4[%c8_110, %c0_111, %c0_112] : memref<9x16x16xbf16, #tpu.memory_space<vmem>>, vector<1x16x16xbf16>
    %132 = vector.shape_cast %131 : vector<1x16x16xbf16> to vector<16x16xbf16>
    %cst_113 = arith.constant dense<0.000000e+00> : vector<80x16xf32>
    %133 = tpu.matmul %130, %132, %cst_113 {dimension_numbers = #tpu.dot_dimension_numbers<[1], [0], [0], [1], [0, 0, 1, 1], [], []>} : vector<80x16xbf16>, vector<16x16xbf16>, vector<80x16xf32> -> vector<80x16xf32>
    %134 = arith.addf %129, %133 : vector<80x16xf32>
    %c0_114 = arith.constant 0 : index
    %c0_115 = arith.constant 0 : index
    %135 = vector.load %arg5[%c0_114, %c0_115] : memref<1x16xf32, #tpu.memory_space<vmem>>, vector<1x16xf32>
    %136 = vector.broadcast %135 : vector<1x16xf32> to vector<80x16xf32>
    %137 = arith.addf %134, %136 : vector<80x16xf32>
    %cst_116 = arith.constant 0.000000e+00 : f32
    %138 = vector.broadcast %cst_116 : f32 to vector<80x16xf32>
    %139 = arith.maximumf %137, %138 : vector<80x16xf32>
    %140 = vector.shape_cast %139 : vector<80x16xf32> to vector<10x128xf32>
    %c0_117 = arith.constant 0 : index
    %c0_118 = arith.constant 0 : index
    %c0_119 = arith.constant 0 : index
    %141 = vector.load %arg6[%c0_117, %c0_118, %c0_119] : memref<4x10x128xf32, #tpu.memory_space<vmem>>, vector<1x10x128xf32>
    %142 = vector.shape_cast %141 : vector<1x10x128xf32> to vector<10x128xf32>
    %143 = vector.shape_cast %140 : vector<10x128xf32> to vector<1x10x128xf32>
    tpu.vector_store %arg6[%c0_117, %c0_118, %c0_119], %143 {strides = array<i32>} : memref<4x10x128xf32, #tpu.memory_space<vmem>>, vector<1x10x128xf32>,
    %cst_120 = arith.constant 0.000000e+00 : f32
    %144 = vector.broadcast %cst_120 : f32 to vector<80x16xf32>
    %c1_121 = arith.constant 1 : index
    %c9_122 = arith.constant 9 : index
    %c0_123 = arith.constant 0 : index
    %145 = vector.load %arg1[%c1_121, %c9_122, %c0_123] : memref<4x120x8xbf16, #tpu.memory_space<vmem>>, vector<1x80x8xbf16>
    %146 = vector.shape_cast %145 : vector<1x80x8xbf16> to vector<80x8xbf16>
    %c0_124 = arith.constant 0 : index
    %c0_125 = arith.constant 0 : index
    %c0_126 = arith.constant 0 : index
    %147 = vector.load %arg2[%c0_124, %c0_125, %c0_126] : memref<9x8x16xbf16, #tpu.memory_space<vmem>>, vector<1x8x16xbf16>
    %148 = vector.shape_cast %147 : vector<1x8x16xbf16> to vector<8x16xbf16>
    %cst_127 = arith.constant dense<0.000000e+00> : vector<80x16xf32>
    %149 = tpu.matmul %146, %148, %cst_127 {dimension_numbers = #tpu.dot_dimension_numbers<[1], [0], [0], [1], [0, 0, 1, 1], [], []>} : vector<80x8xbf16>, vector<8x16xbf16>, vector<80x16xf32> -> vector<80x16xf32>
    %150 = arith.addf %144, %149 : vector<80x16xf32>
    %c1_128 = arith.constant 1 : index
    %c10_129 = arith.constant 10 : index
    %c0_130 = arith.constant 0 : index
    %151 = vector.load %arg1[%c1_128, %c10_129, %c0_130] : memref<4x120x8xbf16, #tpu.memory_space<vmem>>, vector<1x80x8xbf16>
    %152 = vector.shape_cast %151 : vector<1x80x8xbf16> to vector<80x8xbf16>
    %c1_131 = arith.constant 1 : index
    %c0_132 = arith.constant 0 : index
    %c0_133 = arith.constant 0 : index
    %153 = vector.load %arg2[%c1_131, %c0_132, %c0_133] : memref<9x8x16xbf16, #tpu.memory_space<vmem>>, vector<1x8x16xbf16>
    %154 = vector.shape_cast %153 : vector<1x8x16xbf16> to vector<8x16xbf16>
    %cst_134 = arith.constant dense<0.000000e+00> : vector<80x16xf32>
    %155 = tpu.matmul %152, %154, %cst_134 {dimension_numbers = #tpu.dot_dimension_numbers<[1], [0], [0], [1], [0, 0, 1, 1], [], []>} : vector<80x8xbf16>, vector<8x16xbf16>, vector<80x16xf32> -> vector<80x16xf32>
    %156 = arith.addf %150, %155 : vector<80x16xf32>
    %c1_135 = arith.constant 1 : index
    %c11_136 = arith.constant 11 : index
    %c0_137 = arith.constant 0 : index
    %157 = vector.load %arg1[%c1_135, %c11_136, %c0_137] : memref<4x120x8xbf16, #tpu.memory_space<vmem>>, vector<1x80x8xbf16>
    %158 = vector.shape_cast %157 : vector<1x80x8xbf16> to vector<80x8xbf16>
    %c2_138 = arith.constant 2 : index
    %c0_139 = arith.constant 0 : index
    %c0_140 = arith.constant 0 : index
    %159 = vector.load %arg2[%c2_138, %c0_139, %c0_140] : memref<9x8x16xbf16, #tpu.memory_space<vmem>>, vector<1x8x16xbf16>
    %160 = vector.shape_cast %159 : vector<1x8x16xbf16> to vector<8x16xbf16>
    %cst_141 = arith.constant dense<0.000000e+00> : vector<80x16xf32>
    %161 = tpu.matmul %158, %160, %cst_141 {dimension_numbers = #tpu.dot_dimension_numbers<[1], [0], [0], [1], [0, 0, 1, 1], [], []>} : vector<80x8xbf16>, vector<8x16xbf16>, vector<80x16xf32> -> vector<80x16xf32>
    %162 = arith.addf %156, %161 : vector<80x16xf32>
    %c1_142 = arith.constant 1 : index
    %c19_143 = arith.constant 19 : index
    %c0_144 = arith.constant 0 : index
    %163 = vector.load %arg1[%c1_142, %c19_143, %c0_144] : memref<4x120x8xbf16, #tpu.memory_space<vmem>>, vector<1x80x8xbf16>
    %164 = vector.shape_cast %163 : vector<1x80x8xbf16> to vector<80x8xbf16>
    %c3_145 = arith.constant 3 : index
    %c0_146 = arith.constant 0 : index
    %c0_147 = arith.constant 0 : index
    %165 = vector.load %arg2[%c3_145, %c0_146, %c0_147] : memref<9x8x16xbf16, #tpu.memory_space<vmem>>, vector<1x8x16xbf16>
    %166 = vector.shape_cast %165 : vector<1x8x16xbf16> to vector<8x16xbf16>
    %cst_148 = arith.constant dense<0.000000e+00> : vector<80x16xf32>
    %167 = tpu.matmul %164, %166, %cst_148 {dimension_numbers = #tpu.dot_dimension_numbers<[1], [0], [0], [1], [0, 0, 1, 1], [], []>} : vector<80x8xbf16>, vector<8x16xbf16>, vector<80x16xf32> -> vector<80x16xf32>
    %168 = arith.addf %162, %167 : vector<80x16xf32>
    %c1_149 = arith.constant 1 : index
    %c20_150 = arith.constant 20 : index
    %c0_151 = arith.constant 0 : index
    %169 = vector.load %arg1[%c1_149, %c20_150, %c0_151] : memref<4x120x8xbf16, #tpu.memory_space<vmem>>, vector<1x80x8xbf16>
    %170 = vector.shape_cast %169 : vector<1x80x8xbf16> to vector<80x8xbf16>
    %c4_152 = arith.constant 4 : index
    %c0_153 = arith.constant 0 : index
    %c0_154 = arith.constant 0 : index
    %171 = vector.load %arg2[%c4_152, %c0_153, %c0_154] : memref<9x8x16xbf16, #tpu.memory_space<vmem>>, vector<1x8x16xbf16>
    %172 = vector.shape_cast %171 : vector<1x8x16xbf16> to vector<8x16xbf16>
    %cst_155 = arith.constant dense<0.000000e+00> : vector<80x16xf32>
    %173 = tpu.matmul %170, %172, %cst_155 {dimension_numbers = #tpu.dot_dimension_numbers<[1], [0], [0], [1], [0, 0, 1, 1], [], []>} : vector<80x8xbf16>, vector<8x16xbf16>, vector<80x16xf32> -> vector<80x16xf32>
    %174 = arith.addf %168, %173 : vector<80x16xf32>
    %c1_156 = arith.constant 1 : index
    %c21_157 = arith.constant 21 : index
    %c0_158 = arith.constant 0 : index
    %175 = vector.load %arg1[%c1_156, %c21_157, %c0_158] : memref<4x120x8xbf16, #tpu.memory_space<vmem>>, vector<1x80x8xbf16>
    %176 = vector.shape_cast %175 : vector<1x80x8xbf16> to vector<80x8xbf16>
    %c5_159 = arith.constant 5 : index
    %c0_160 = arith.constant 0 : index
    %c0_161 = arith.constant 0 : index
    %177 = vector.load %arg2[%c5_159, %c0_160, %c0_161] : memref<9x8x16xbf16, #tpu.memory_space<vmem>>, vector<1x8x16xbf16>
    %178 = vector.shape_cast %177 : vector<1x8x16xbf16> to vector<8x16xbf16>
    %cst_162 = arith.constant dense<0.000000e+00> : vector<80x16xf32>
    %179 = tpu.matmul %176, %178, %cst_162 {dimension_numbers = #tpu.dot_dimension_numbers<[1], [0], [0], [1], [0, 0, 1, 1], [], []>} : vector<80x8xbf16>, vector<8x16xbf16>, vector<80x16xf32> -> vector<80x16xf32>
    %180 = arith.addf %174, %179 : vector<80x16xf32>
    %c1_163 = arith.constant 1 : index
    %c29_164 = arith.constant 29 : index
    %c0_165 = arith.constant 0 : index
    %181 = vector.load %arg1[%c1_163, %c29_164, %c0_165] : memref<4x120x8xbf16, #tpu.memory_space<vmem>>, vector<1x80x8xbf16>
    %182 = vector.shape_cast %181 : vector<1x80x8xbf16> to vector<80x8xbf16>
    %c6_166 = arith.constant 6 : index
    %c0_167 = arith.constant 0 : index
    %c0_168 = arith.constant 0 : index
    %183 = vector.load %arg2[%c6_166, %c0_167, %c0_168] : memref<9x8x16xbf16, #tpu.memory_space<vmem>>, vector<1x8x16xbf16>
    %184 = vector.shape_cast %183 : vector<1x8x16xbf16> to vector<8x16xbf16>
    %cst_169 = arith.constant dense<0.000000e+00> : vector<80x16xf32>
    %185 = tpu.matmul %182, %184, %cst_169 {dimension_numbers = #tpu.dot_dimension_numbers<[1], [0], [0], [1], [0, 0, 1, 1], [], []>} : vector<80x8xbf16>, vector<8x16xbf16>, vector<80x16xf32> -> vector<80x16xf32>
    %186 = arith.addf %180, %185 : vector<80x16xf32>
    %c1_170 = arith.constant 1 : index
    %c30_171 = arith.constant 30 : index
    %c0_172 = arith.constant 0 : index
    %187 = vector.load %arg1[%c1_170, %c30_171, %c0_172] : memref<4x120x8xbf16, #tpu.memory_space<vmem>>, vector<1x80x8xbf16>
    %188 = vector.shape_cast %187 : vector<1x80x8xbf16> to vector<80x8xbf16>
    %c7_173 = arith.constant 7 : index
    %c0_174 = arith.constant 0 : index
    %c0_175 = arith.constant 0 : index
    %189 = vector.load %arg2[%c7_173, %c0_174, %c0_175] : memref<9x8x16xbf16, #tpu.memory_space<vmem>>, vector<1x8x16xbf16>
    %190 = vector.shape_cast %189 : vector<1x8x16xbf16> to vector<8x16xbf16>
    %cst_176 = arith.constant dense<0.000000e+00> : vector<80x16xf32>
    %191 = tpu.matmul %188, %190, %cst_176 {dimension_numbers = #tpu.dot_dimension_numbers<[1], [0], [0], [1], [0, 0, 1, 1], [], []>} : vector<80x8xbf16>, vector<8x16xbf16>, vector<80x16xf32> -> vector<80x16xf32>
    %192 = arith.addf %186, %191 : vector<80x16xf32>
    %c1_177 = arith.constant 1 : index
    %c31_178 = arith.constant 31 : index
    %c0_179 = arith.constant 0 : index
    %193 = vector.load %arg1[%c1_177, %c31_178, %c0_179] : memref<4x120x8xbf16, #tpu.memory_space<vmem>>, vector<1x80x8xbf16>
    %194 = vector.shape_cast %193 : vector<1x80x8xbf16> to vector<80x8xbf16>
    %c8_180 = arith.constant 8 : index
    %c0_181 = arith.constant 0 : index
    %c0_182 = arith.constant 0 : index
    %195 = vector.load %arg2[%c8_180, %c0_181, %c0_182] : memref<9x8x16xbf16, #tpu.memory_space<vmem>>, vector<1x8x16xbf16>
    %196 = vector.shape_cast %195 : vector<1x8x16xbf16> to vector<8x16xbf16>
    %cst_183 = arith.constant dense<0.000000e+00> : vector<80x16xf32>
    %197 = tpu.matmul %194, %196, %cst_183 {dimension_numbers = #tpu.dot_dimension_numbers<[1], [0], [0], [1], [0, 0, 1, 1], [], []>} : vector<80x8xbf16>, vector<8x16xbf16>, vector<80x16xf32> -> vector<80x16xf32>
    %198 = arith.addf %192, %197 : vector<80x16xf32>
    %c0_184 = arith.constant 0 : index
    %c0_185 = arith.constant 0 : index
    %199 = vector.load %arg3[%c0_184, %c0_185] : memref<1x16xf32, #tpu.memory_space<vmem>>, vector<1x16xf32>
    %200 = vector.broadcast %199 : vector<1x16xf32> to vector<80x16xf32>
    %201 = arith.addf %198, %200 : vector<80x16xf32>
    %cst_186 = arith.constant 0.000000e+00 : f32
    %202 = vector.broadcast %cst_186 : f32 to vector<80x16xf32>
    %203 = arith.maximumf %201, %202 : vector<80x16xf32>
    %cst_187 = arith.constant 0.000000e+00 : f32
    %204 = vector.broadcast %cst_187 : f32 to vector<80x16xf32>
    %205 = arith.select %24, %203, %204 : vector<80x16xi1>, vector<80x16xf32>
    %206 = arith.truncf %205 : vector<80x16xf32> to vector<80x16xbf16>
    %c20_188 = arith.constant 20 : index
    %c0_189 = arith.constant 0 : index
    %207 = vector.load %arg7[%c20_188, %c0_189] : memref<120x16xbf16, #tpu.memory_space<vmem>>, vector<80x16xbf16>
    tpu.vector_store %arg7[%c20_188, %c0_189], %206 {strides = array<i32>} : memref<120x16xbf16, #tpu.memory_space<vmem>>, vector<80x16xbf16>,
    %cst_190 = arith.constant 0.000000e+00 : f32
    %208 = vector.broadcast %cst_190 : f32 to vector<80x16xf32>
    %c9_191 = arith.constant 9 : index
    %c0_192 = arith.constant 0 : index
    %209 = vector.load %arg7[%c9_191, %c0_192] : memref<120x16xbf16, #tpu.memory_space<vmem>>, vector<80x16xbf16>
    %c0_193 = arith.constant 0 : index
    %c0_194 = arith.constant 0 : index
    %c0_195 = arith.constant 0 : index
    %210 = vector.load %arg4[%c0_193, %c0_194, %c0_195] : memref<9x16x16xbf16, #tpu.memory_space<vmem>>, vector<1x16x16xbf16>
    %211 = vector.shape_cast %210 : vector<1x16x16xbf16> to vector<16x16xbf16>
    %cst_196 = arith.constant dense<0.000000e+00> : vector<80x16xf32>
    %212 = tpu.matmul %209, %211, %cst_196 {dimension_numbers = #tpu.dot_dimension_numbers<[1], [0], [0], [1], [0, 0, 1, 1], [], []>} : vector<80x16xbf16>, vector<16x16xbf16>, vector<80x16xf32> -> vector<80x16xf32>
    %213 = arith.addf %208, %212 : vector<80x16xf32>
    %c10_197 = arith.constant 10 : index
    %c0_198 = arith.constant 0 : index
    %214 = vector.load %arg7[%c10_197, %c0_198] : memref<120x16xbf16, #tpu.memory_space<vmem>>, vector<80x16xbf16>
    %c1_199 = arith.constant 1 : index
    %c0_200 = arith.constant 0 : index
    %c0_201 = arith.constant 0 : index
    %215 = vector.load %arg4[%c1_199, %c0_200, %c0_201] : memref<9x16x16xbf16, #tpu.memory_space<vmem>>, vector<1x16x16xbf16>
    %216 = vector.shape_cast %215 : vector<1x16x16xbf16> to vector<16x16xbf16>
    %cst_202 = arith.constant dense<0.000000e+00> : vector<80x16xf32>
    %217 = tpu.matmul %214, %216, %cst_202 {dimension_numbers = #tpu.dot_dimension_numbers<[1], [0], [0], [1], [0, 0, 1, 1], [], []>} : vector<80x16xbf16>, vector<16x16xbf16>, vector<80x16xf32> -> vector<80x16xf32>
    %218 = arith.addf %213, %217 : vector<80x16xf32>
    %c11_203 = arith.constant 11 : index
    %c0_204 = arith.constant 0 : index
    %219 = vector.load %arg7[%c11_203, %c0_204] : memref<120x16xbf16, #tpu.memory_space<vmem>>, vector<80x16xbf16>
    %c2_205 = arith.constant 2 : index
    %c0_206 = arith.constant 0 : index
    %c0_207 = arith.constant 0 : index
    %220 = vector.load %arg4[%c2_205, %c0_206, %c0_207] : memref<9x16x16xbf16, #tpu.memory_space<vmem>>, vector<1x16x16xbf16>
    %221 = vector.shape_cast %220 : vector<1x16x16xbf16> to vector<16x16xbf16>
    %cst_208 = arith.constant dense<0.000000e+00> : vector<80x16xf32>
    %222 = tpu.matmul %219, %221, %cst_208 {dimension_numbers = #tpu.dot_dimension_numbers<[1], [0], [0], [1], [0, 0, 1, 1], [], []>} : vector<80x16xbf16>, vector<16x16xbf16>, vector<80x16xf32> -> vector<80x16xf32>
    %223 = arith.addf %218, %222 : vector<80x16xf32>
    %c19_209 = arith.constant 19 : index
    %c0_210 = arith.constant 0 : index
    %224 = vector.load %arg7[%c19_209, %c0_210] : memref<120x16xbf16, #tpu.memory_space<vmem>>, vector<80x16xbf16>
    %c3_211 = arith.constant 3 : index
    %c0_212 = arith.constant 0 : index
    %c0_213 = arith.constant 0 : index
    %225 = vector.load %arg4[%c3_211, %c0_212, %c0_213] : memref<9x16x16xbf16, #tpu.memory_space<vmem>>, vector<1x16x16xbf16>
    %226 = vector.shape_cast %225 : vector<1x16x16xbf16> to vector<16x16xbf16>
    %cst_214 = arith.constant dense<0.000000e+00> : vector<80x16xf32>
    %227 = tpu.matmul %224, %226, %cst_214 {dimension_numbers = #tpu.dot_dimension_numbers<[1], [0], [0], [1], [0, 0, 1, 1], [], []>} : vector<80x16xbf16>, vector<16x16xbf16>, vector<80x16xf32> -> vector<80x16xf32>
    %228 = arith.addf %223, %227 : vector<80x16xf32>
    %c20_215 = arith.constant 20 : index
    %c0_216 = arith.constant 0 : index
    %229 = vector.load %arg7[%c20_215, %c0_216] : memref<120x16xbf16, #tpu.memory_space<vmem>>, vector<80x16xbf16>
    %c4_217 = arith.constant 4 : index
    %c0_218 = arith.constant 0 : index
    %c0_219 = arith.constant 0 : index
    %230 = vector.load %arg4[%c4_217, %c0_218, %c0_219] : memref<9x16x16xbf16, #tpu.memory_space<vmem>>, vector<1x16x16xbf16>
    %231 = vector.shape_cast %230 : vector<1x16x16xbf16> to vector<16x16xbf16>
    %cst_220 = arith.constant dense<0.000000e+00> : vector<80x16xf32>
    %232 = tpu.matmul %229, %231, %cst_220 {dimension_numbers = #tpu.dot_dimension_numbers<[1], [0], [0], [1], [0, 0, 1, 1], [], []>} : vector<80x16xbf16>, vector<16x16xbf16>, vector<80x16xf32> -> vector<80x16xf32>
    %233 = arith.addf %228, %232 : vector<80x16xf32>
    %c21_221 = arith.constant 21 : index
    %c0_222 = arith.constant 0 : index
    %234 = vector.load %arg7[%c21_221, %c0_222] : memref<120x16xbf16, #tpu.memory_space<vmem>>, vector<80x16xbf16>
    %c5_223 = arith.constant 5 : index
    %c0_224 = arith.constant 0 : index
    %c0_225 = arith.constant 0 : index
    %235 = vector.load %arg4[%c5_223, %c0_224, %c0_225] : memref<9x16x16xbf16, #tpu.memory_space<vmem>>, vector<1x16x16xbf16>
    %236 = vector.shape_cast %235 : vector<1x16x16xbf16> to vector<16x16xbf16>
    %cst_226 = arith.constant dense<0.000000e+00> : vector<80x16xf32>
    %237 = tpu.matmul %234, %236, %cst_226 {dimension_numbers = #tpu.dot_dimension_numbers<[1], [0], [0], [1], [0, 0, 1, 1], [], []>} : vector<80x16xbf16>, vector<16x16xbf16>, vector<80x16xf32> -> vector<80x16xf32>
    %238 = arith.addf %233, %237 : vector<80x16xf32>
    %c29_227 = arith.constant 29 : index
    %c0_228 = arith.constant 0 : index
    %239 = vector.load %arg7[%c29_227, %c0_228] : memref<120x16xbf16, #tpu.memory_space<vmem>>, vector<80x16xbf16>
    %c6_229 = arith.constant 6 : index
    %c0_230 = arith.constant 0 : index
    %c0_231 = arith.constant 0 : index
    %240 = vector.load %arg4[%c6_229, %c0_230, %c0_231] : memref<9x16x16xbf16, #tpu.memory_space<vmem>>, vector<1x16x16xbf16>
    %241 = vector.shape_cast %240 : vector<1x16x16xbf16> to vector<16x16xbf16>
    %cst_232 = arith.constant dense<0.000000e+00> : vector<80x16xf32>
    %242 = tpu.matmul %239, %241, %cst_232 {dimension_numbers = #tpu.dot_dimension_numbers<[1], [0], [0], [1], [0, 0, 1, 1], [], []>} : vector<80x16xbf16>, vector<16x16xbf16>, vector<80x16xf32> -> vector<80x16xf32>
    %243 = arith.addf %238, %242 : vector<80x16xf32>
    %c30_233 = arith.constant 30 : index
    %c0_234 = arith.constant 0 : index
    %244 = vector.load %arg7[%c30_233, %c0_234] : memref<120x16xbf16, #tpu.memory_space<vmem>>, vector<80x16xbf16>
    %c7_235 = arith.constant 7 : index
    %c0_236 = arith.constant 0 : index
    %c0_237 = arith.constant 0 : index
    %245 = vector.load %arg4[%c7_235, %c0_236, %c0_237] : memref<9x16x16xbf16, #tpu.memory_space<vmem>>, vector<1x16x16xbf16>
    %246 = vector.shape_cast %245 : vector<1x16x16xbf16> to vector<16x16xbf16>
    %cst_238 = arith.constant dense<0.000000e+00> : vector<80x16xf32>
    %247 = tpu.matmul %244, %246, %cst_238 {dimension_numbers = #tpu.dot_dimension_numbers<[1], [0], [0], [1], [0, 0, 1, 1], [], []>} : vector<80x16xbf16>, vector<16x16xbf16>, vector<80x16xf32> -> vector<80x16xf32>
    %248 = arith.addf %243, %247 : vector<80x16xf32>
    %c31_239 = arith.constant 31 : index
    %c0_240 = arith.constant 0 : index
    %249 = vector.load %arg7[%c31_239, %c0_240] : memref<120x16xbf16, #tpu.memory_space<vmem>>, vector<80x16xbf16>
    %c8_241 = arith.constant 8 : index
    %c0_242 = arith.constant 0 : index
    %c0_243 = arith.constant 0 : index
    %250 = vector.load %arg4[%c8_241, %c0_242, %c0_243] : memref<9x16x16xbf16, #tpu.memory_space<vmem>>, vector<1x16x16xbf16>
    %251 = vector.shape_cast %250 : vector<1x16x16xbf16> to vector<16x16xbf16>
    %cst_244 = arith.constant dense<0.000000e+00> : vector<80x16xf32>
    %252 = tpu.matmul %249, %251, %cst_244 {dimension_numbers = #tpu.dot_dimension_numbers<[1], [0], [0], [1], [0, 0, 1, 1], [], []>} : vector<80x16xbf16>, vector<16x16xbf16>, vector<80x16xf32> -> vector<80x16xf32>
    %253 = arith.addf %248, %252 : vector<80x16xf32>
    %c0_245 = arith.constant 0 : index
    %c0_246 = arith.constant 0 : index
    %254 = vector.load %arg5[%c0_245, %c0_246] : memref<1x16xf32, #tpu.memory_space<vmem>>, vector<1x16xf32>
    %255 = vector.broadcast %254 : vector<1x16xf32> to vector<80x16xf32>
    %256 = arith.addf %253, %255 : vector<80x16xf32>
    %cst_247 = arith.constant 0.000000e+00 : f32
    %257 = vector.broadcast %cst_247 : f32 to vector<80x16xf32>
    %258 = arith.maximumf %256, %257 : vector<80x16xf32>
    %259 = vector.shape_cast %258 : vector<80x16xf32> to vector<10x128xf32>
    %c1_248 = arith.constant 1 : index
    %c0_249 = arith.constant 0 : index
    %c0_250 = arith.constant 0 : index
    %260 = vector.load %arg6[%c1_248, %c0_249, %c0_250] : memref<4x10x128xf32, #tpu.memory_space<vmem>>, vector<1x10x128xf32>
    %261 = vector.shape_cast %260 : vector<1x10x128xf32> to vector<10x128xf32>
    %262 = vector.shape_cast %259 : vector<10x128xf32> to vector<1x10x128xf32>
    tpu.vector_store %arg6[%c1_248, %c0_249, %c0_250], %262 {strides = array<i32>} : memref<4x10x128xf32, #tpu.memory_space<vmem>>, vector<1x10x128xf32>,
    %cst_251 = arith.constant 0.000000e+00 : f32
    %263 = vector.broadcast %cst_251 : f32 to vector<80x16xf32>
    %c2_252 = arith.constant 2 : index
    %c9_253 = arith.constant 9 : index
    %c0_254 = arith.constant 0 : index
    %264 = vector.load %arg1[%c2_252, %c9_253, %c0_254] : memref<4x120x8xbf16, #tpu.memory_space<vmem>>, vector<1x80x8xbf16>
    %265 = vector.shape_cast %264 : vector<1x80x8xbf16> to vector<80x8xbf16>
    %c0_255 = arith.constant 0 : index
    %c0_256 = arith.constant 0 : index
    %c0_257 = arith.constant 0 : index
    %266 = vector.load %arg2[%c0_255, %c0_256, %c0_257] : memref<9x8x16xbf16, #tpu.memory_space<vmem>>, vector<1x8x16xbf16>
    %267 = vector.shape_cast %266 : vector<1x8x16xbf16> to vector<8x16xbf16>
    %cst_258 = arith.constant dense<0.000000e+00> : vector<80x16xf32>
    %268 = tpu.matmul %265, %267, %cst_258 {dimension_numbers = #tpu.dot_dimension_numbers<[1], [0], [0], [1], [0, 0, 1, 1], [], []>} : vector<80x8xbf16>, vector<8x16xbf16>, vector<80x16xf32> -> vector<80x16xf32>
    %269 = arith.addf %263, %268 : vector<80x16xf32>
    %c2_259 = arith.constant 2 : index
    %c10_260 = arith.constant 10 : index
    %c0_261 = arith.constant 0 : index
    %270 = vector.load %arg1[%c2_259, %c10_260, %c0_261] : memref<4x120x8xbf16, #tpu.memory_space<vmem>>, vector<1x80x8xbf16>
    %271 = vector.shape_cast %270 : vector<1x80x8xbf16> to vector<80x8xbf16>
    %c1_262 = arith.constant 1 : index
    %c0_263 = arith.constant 0 : index
    %c0_264 = arith.constant 0 : index
    %272 = vector.load %arg2[%c1_262, %c0_263, %c0_264] : memref<9x8x16xbf16, #tpu.memory_space<vmem>>, vector<1x8x16xbf16>
    %273 = vector.shape_cast %272 : vector<1x8x16xbf16> to vector<8x16xbf16>
    %cst_265 = arith.constant dense<0.000000e+00> : vector<80x16xf32>
    %274 = tpu.matmul %271, %273, %cst_265 {dimension_numbers = #tpu.dot_dimension_numbers<[1], [0], [0], [1], [0, 0, 1, 1], [], []>} : vector<80x8xbf16>, vector<8x16xbf16>, vector<80x16xf32> -> vector<80x16xf32>
    %275 = arith.addf %269, %274 : vector<80x16xf32>
    %c2_266 = arith.constant 2 : index
    %c11_267 = arith.constant 11 : index
    %c0_268 = arith.constant 0 : index
    %276 = vector.load %arg1[%c2_266, %c11_267, %c0_268] : memref<4x120x8xbf16, #tpu.memory_space<vmem>>, vector<1x80x8xbf16>
    %277 = vector.shape_cast %276 : vector<1x80x8xbf16> to vector<80x8xbf16>
    %c2_269 = arith.constant 2 : index
    %c0_270 = arith.constant 0 : index
    %c0_271 = arith.constant 0 : index
    %278 = vector.load %arg2[%c2_269, %c0_270, %c0_271] : memref<9x8x16xbf16, #tpu.memory_space<vmem>>, vector<1x8x16xbf16>
    %279 = vector.shape_cast %278 : vector<1x8x16xbf16> to vector<8x16xbf16>
    %cst_272 = arith.constant dense<0.000000e+00> : vector<80x16xf32>
    %280 = tpu.matmul %277, %279, %cst_272 {dimension_numbers = #tpu.dot_dimension_numbers<[1], [0], [0], [1], [0, 0, 1, 1], [], []>} : vector<80x8xbf16>, vector<8x16xbf16>, vector<80x16xf32> -> vector<80x16xf32>
    %281 = arith.addf %275, %280 : vector<80x16xf32>
    %c2_273 = arith.constant 2 : index
    %c19_274 = arith.constant 19 : index
    %c0_275 = arith.constant 0 : index
    %282 = vector.load %arg1[%c2_273, %c19_274, %c0_275] : memref<4x120x8xbf16, #tpu.memory_space<vmem>>, vector<1x80x8xbf16>
    %283 = vector.shape_cast %282 : vector<1x80x8xbf16> to vector<80x8xbf16>
    %c3_276 = arith.constant 3 : index
    %c0_277 = arith.constant 0 : index
    %c0_278 = arith.constant 0 : index
    %284 = vector.load %arg2[%c3_276, %c0_277, %c0_278] : memref<9x8x16xbf16, #tpu.memory_space<vmem>>, vector<1x8x16xbf16>
    %285 = vector.shape_cast %284 : vector<1x8x16xbf16> to vector<8x16xbf16>
    %cst_279 = arith.constant dense<0.000000e+00> : vector<80x16xf32>
    %286 = tpu.matmul %283, %285, %cst_279 {dimension_numbers = #tpu.dot_dimension_numbers<[1], [0], [0], [1], [0, 0, 1, 1], [], []>} : vector<80x8xbf16>, vector<8x16xbf16>, vector<80x16xf32> -> vector<80x16xf32>
    %287 = arith.addf %281, %286 : vector<80x16xf32>
    %c2_280 = arith.constant 2 : index
    %c20_281 = arith.constant 20 : index
    %c0_282 = arith.constant 0 : index
    %288 = vector.load %arg1[%c2_280, %c20_281, %c0_282] : memref<4x120x8xbf16, #tpu.memory_space<vmem>>, vector<1x80x8xbf16>
    %289 = vector.shape_cast %288 : vector<1x80x8xbf16> to vector<80x8xbf16>
    %c4_283 = arith.constant 4 : index
    %c0_284 = arith.constant 0 : index
    %c0_285 = arith.constant 0 : index
    %290 = vector.load %arg2[%c4_283, %c0_284, %c0_285] : memref<9x8x16xbf16, #tpu.memory_space<vmem>>, vector<1x8x16xbf16>
    %291 = vector.shape_cast %290 : vector<1x8x16xbf16> to vector<8x16xbf16>
    %cst_286 = arith.constant dense<0.000000e+00> : vector<80x16xf32>
    %292 = tpu.matmul %289, %291, %cst_286 {dimension_numbers = #tpu.dot_dimension_numbers<[1], [0], [0], [1], [0, 0, 1, 1], [], []>} : vector<80x8xbf16>, vector<8x16xbf16>, vector<80x16xf32> -> vector<80x16xf32>
    %293 = arith.addf %287, %292 : vector<80x16xf32>
    %c2_287 = arith.constant 2 : index
    %c21_288 = arith.constant 21 : index
    %c0_289 = arith.constant 0 : index
    %294 = vector.load %arg1[%c2_287, %c21_288, %c0_289] : memref<4x120x8xbf16, #tpu.memory_space<vmem>>, vector<1x80x8xbf16>
    %295 = vector.shape_cast %294 : vector<1x80x8xbf16> to vector<80x8xbf16>
    %c5_290 = arith.constant 5 : index
    %c0_291 = arith.constant 0 : index
    %c0_292 = arith.constant 0 : index
    %296 = vector.load %arg2[%c5_290, %c0_291, %c0_292] : memref<9x8x16xbf16, #tpu.memory_space<vmem>>, vector<1x8x16xbf16>
    %297 = vector.shape_cast %296 : vector<1x8x16xbf16> to vector<8x16xbf16>
    %cst_293 = arith.constant dense<0.000000e+00> : vector<80x16xf32>
    %298 = tpu.matmul %295, %297, %cst_293 {dimension_numbers = #tpu.dot_dimension_numbers<[1], [0], [0], [1], [0, 0, 1, 1], [], []>} : vector<80x8xbf16>, vector<8x16xbf16>, vector<80x16xf32> -> vector<80x16xf32>
    %299 = arith.addf %293, %298 : vector<80x16xf32>
    %c2_294 = arith.constant 2 : index
    %c29_295 = arith.constant 29 : index
    %c0_296 = arith.constant 0 : index
    %300 = vector.load %arg1[%c2_294, %c29_295, %c0_296] : memref<4x120x8xbf16, #tpu.memory_space<vmem>>, vector<1x80x8xbf16>
    %301 = vector.shape_cast %300 : vector<1x80x8xbf16> to vector<80x8xbf16>
    %c6_297 = arith.constant 6 : index
    %c0_298 = arith.constant 0 : index
    %c0_299 = arith.constant 0 : index
    %302 = vector.load %arg2[%c6_297, %c0_298, %c0_299] : memref<9x8x16xbf16, #tpu.memory_space<vmem>>, vector<1x8x16xbf16>
    %303 = vector.shape_cast %302 : vector<1x8x16xbf16> to vector<8x16xbf16>
    %cst_300 = arith.constant dense<0.000000e+00> : vector<80x16xf32>
    %304 = tpu.matmul %301, %303, %cst_300 {dimension_numbers = #tpu.dot_dimension_numbers<[1], [0], [0], [1], [0, 0, 1, 1], [], []>} : vector<80x8xbf16>, vector<8x16xbf16>, vector<80x16xf32> -> vector<80x16xf32>
    %305 = arith.addf %299, %304 : vector<80x16xf32>
    %c2_301 = arith.constant 2 : index
    %c30_302 = arith.constant 30 : index
    %c0_303 = arith.constant 0 : index
    %306 = vector.load %arg1[%c2_301, %c30_302, %c0_303] : memref<4x120x8xbf16, #tpu.memory_space<vmem>>, vector<1x80x8xbf16>
    %307 = vector.shape_cast %306 : vector<1x80x8xbf16> to vector<80x8xbf16>
    %c7_304 = arith.constant 7 : index
    %c0_305 = arith.constant 0 : index
    %c0_306 = arith.constant 0 : index
    %308 = vector.load %arg2[%c7_304, %c0_305, %c0_306] : memref<9x8x16xbf16, #tpu.memory_space<vmem>>, vector<1x8x16xbf16>
    %309 = vector.shape_cast %308 : vector<1x8x16xbf16> to vector<8x16xbf16>
    %cst_307 = arith.constant dense<0.000000e+00> : vector<80x16xf32>
    %310 = tpu.matmul %307, %309, %cst_307 {dimension_numbers = #tpu.dot_dimension_numbers<[1], [0], [0], [1], [0, 0, 1, 1], [], []>} : vector<80x8xbf16>, vector<8x16xbf16>, vector<80x16xf32> -> vector<80x16xf32>
    %311 = arith.addf %305, %310 : vector<80x16xf32>
    %c2_308 = arith.constant 2 : index
    %c31_309 = arith.constant 31 : index
    %c0_310 = arith.constant 0 : index
    %312 = vector.load %arg1[%c2_308, %c31_309, %c0_310] : memref<4x120x8xbf16, #tpu.memory_space<vmem>>, vector<1x80x8xbf16>
    %313 = vector.shape_cast %312 : vector<1x80x8xbf16> to vector<80x8xbf16>
    %c8_311 = arith.constant 8 : index
    %c0_312 = arith.constant 0 : index
    %c0_313 = arith.constant 0 : index
    %314 = vector.load %arg2[%c8_311, %c0_312, %c0_313] : memref<9x8x16xbf16, #tpu.memory_space<vmem>>, vector<1x8x16xbf16>
    %315 = vector.shape_cast %314 : vector<1x8x16xbf16> to vector<8x16xbf16>
    %cst_314 = arith.constant dense<0.000000e+00> : vector<80x16xf32>
    %316 = tpu.matmul %313, %315, %cst_314 {dimension_numbers = #tpu.dot_dimension_numbers<[1], [0], [0], [1], [0, 0, 1, 1], [], []>} : vector<80x8xbf16>, vector<8x16xbf16>, vector<80x16xf32> -> vector<80x16xf32>
    %317 = arith.addf %311, %316 : vector<80x16xf32>
    %c0_315 = arith.constant 0 : index
    %c0_316 = arith.constant 0 : index
    %318 = vector.load %arg3[%c0_315, %c0_316] : memref<1x16xf32, #tpu.memory_space<vmem>>, vector<1x16xf32>
    %319 = vector.broadcast %318 : vector<1x16xf32> to vector<80x16xf32>
    %320 = arith.addf %317, %319 : vector<80x16xf32>
    %cst_317 = arith.constant 0.000000e+00 : f32
    %321 = vector.broadcast %cst_317 : f32 to vector<80x16xf32>
    %322 = arith.maximumf %320, %321 : vector<80x16xf32>
    %cst_318 = arith.constant 0.000000e+00 : f32
    %323 = vector.broadcast %cst_318 : f32 to vector<80x16xf32>
    %324 = arith.select %24, %322, %323 : vector<80x16xi1>, vector<80x16xf32>
    %325 = arith.truncf %324 : vector<80x16xf32> to vector<80x16xbf16>
    %c20_319 = arith.constant 20 : index
    %c0_320 = arith.constant 0 : index
    %326 = vector.load %arg7[%c20_319, %c0_320] : memref<120x16xbf16, #tpu.memory_space<vmem>>, vector<80x16xbf16>
    tpu.vector_store %arg7[%c20_319, %c0_320], %325 {strides = array<i32>} : memref<120x16xbf16, #tpu.memory_space<vmem>>, vector<80x16xbf16>,
    %cst_321 = arith.constant 0.000000e+00 : f32
    %327 = vector.broadcast %cst_321 : f32 to vector<80x16xf32>
    %c9_322 = arith.constant 9 : index
    %c0_323 = arith.constant 0 : index
    %328 = vector.load %arg7[%c9_322, %c0_323] : memref<120x16xbf16, #tpu.memory_space<vmem>>, vector<80x16xbf16>
    %c0_324 = arith.constant 0 : index
    %c0_325 = arith.constant 0 : index
    %c0_326 = arith.constant 0 : index
    %329 = vector.load %arg4[%c0_324, %c0_325, %c0_326] : memref<9x16x16xbf16, #tpu.memory_space<vmem>>, vector<1x16x16xbf16>
    %330 = vector.shape_cast %329 : vector<1x16x16xbf16> to vector<16x16xbf16>
    %cst_327 = arith.constant dense<0.000000e+00> : vector<80x16xf32>
    %331 = tpu.matmul %328, %330, %cst_327 {dimension_numbers = #tpu.dot_dimension_numbers<[1], [0], [0], [1], [0, 0, 1, 1], [], []>} : vector<80x16xbf16>, vector<16x16xbf16>, vector<80x16xf32> -> vector<80x16xf32>
    %332 = arith.addf %327, %331 : vector<80x16xf32>
    %c10_328 = arith.constant 10 : index
    %c0_329 = arith.constant 0 : index
    %333 = vector.load %arg7[%c10_328, %c0_329] : memref<120x16xbf16, #tpu.memory_space<vmem>>, vector<80x16xbf16>
    %c1_330 = arith.constant 1 : index
    %c0_331 = arith.constant 0 : index
    %c0_332 = arith.constant 0 : index
    %334 = vector.load %arg4[%c1_330, %c0_331, %c0_332] : memref<9x16x16xbf16, #tpu.memory_space<vmem>>, vector<1x16x16xbf16>
    %335 = vector.shape_cast %334 : vector<1x16x16xbf16> to vector<16x16xbf16>
    %cst_333 = arith.constant dense<0.000000e+00> : vector<80x16xf32>
    %336 = tpu.matmul %333, %335, %cst_333 {dimension_numbers = #tpu.dot_dimension_numbers<[1], [0], [0], [1], [0, 0, 1, 1], [], []>} : vector<80x16xbf16>, vector<16x16xbf16>, vector<80x16xf32> -> vector<80x16xf32>
    %337 = arith.addf %332, %336 : vector<80x16xf32>
    %c11_334 = arith.constant 11 : index
    %c0_335 = arith.constant 0 : index
    %338 = vector.load %arg7[%c11_334, %c0_335] : memref<120x16xbf16, #tpu.memory_space<vmem>>, vector<80x16xbf16>
    %c2_336 = arith.constant 2 : index
    %c0_337 = arith.constant 0 : index
    %c0_338 = arith.constant 0 : index
    %339 = vector.load %arg4[%c2_336, %c0_337, %c0_338] : memref<9x16x16xbf16, #tpu.memory_space<vmem>>, vector<1x16x16xbf16>
    %340 = vector.shape_cast %339 : vector<1x16x16xbf16> to vector<16x16xbf16>
    %cst_339 = arith.constant dense<0.000000e+00> : vector<80x16xf32>
    %341 = tpu.matmul %338, %340, %cst_339 {dimension_numbers = #tpu.dot_dimension_numbers<[1], [0], [0], [1], [0, 0, 1, 1], [], []>} : vector<80x16xbf16>, vector<16x16xbf16>, vector<80x16xf32> -> vector<80x16xf32>
    %342 = arith.addf %337, %341 : vector<80x16xf32>
    %c19_340 = arith.constant 19 : index
    %c0_341 = arith.constant 0 : index
    %343 = vector.load %arg7[%c19_340, %c0_341] : memref<120x16xbf16, #tpu.memory_space<vmem>>, vector<80x16xbf16>
    %c3_342 = arith.constant 3 : index
    %c0_343 = arith.constant 0 : index
    %c0_344 = arith.constant 0 : index
    %344 = vector.load %arg4[%c3_342, %c0_343, %c0_344] : memref<9x16x16xbf16, #tpu.memory_space<vmem>>, vector<1x16x16xbf16>
    %345 = vector.shape_cast %344 : vector<1x16x16xbf16> to vector<16x16xbf16>
    %cst_345 = arith.constant dense<0.000000e+00> : vector<80x16xf32>
    %346 = tpu.matmul %343, %345, %cst_345 {dimension_numbers = #tpu.dot_dimension_numbers<[1], [0], [0], [1], [0, 0, 1, 1], [], []>} : vector<80x16xbf16>, vector<16x16xbf16>, vector<80x16xf32> -> vector<80x16xf32>
    %347 = arith.addf %342, %346 : vector<80x16xf32>
    %c20_346 = arith.constant 20 : index
    %c0_347 = arith.constant 0 : index
    %348 = vector.load %arg7[%c20_346, %c0_347] : memref<120x16xbf16, #tpu.memory_space<vmem>>, vector<80x16xbf16>
    %c4_348 = arith.constant 4 : index
    %c0_349 = arith.constant 0 : index
    %c0_350 = arith.constant 0 : index
    %349 = vector.load %arg4[%c4_348, %c0_349, %c0_350] : memref<9x16x16xbf16, #tpu.memory_space<vmem>>, vector<1x16x16xbf16>
    %350 = vector.shape_cast %349 : vector<1x16x16xbf16> to vector<16x16xbf16>
    %cst_351 = arith.constant dense<0.000000e+00> : vector<80x16xf32>
    %351 = tpu.matmul %348, %350, %cst_351 {dimension_numbers = #tpu.dot_dimension_numbers<[1], [0], [0], [1], [0, 0, 1, 1], [], []>} : vector<80x16xbf16>, vector<16x16xbf16>, vector<80x16xf32> -> vector<80x16xf32>
    %352 = arith.addf %347, %351 : vector<80x16xf32>
    %c21_352 = arith.constant 21 : index
    %c0_353 = arith.constant 0 : index
    %353 = vector.load %arg7[%c21_352, %c0_353] : memref<120x16xbf16, #tpu.memory_space<vmem>>, vector<80x16xbf16>
    %c5_354 = arith.constant 5 : index
    %c0_355 = arith.constant 0 : index
    %c0_356 = arith.constant 0 : index
    %354 = vector.load %arg4[%c5_354, %c0_355, %c0_356] : memref<9x16x16xbf16, #tpu.memory_space<vmem>>, vector<1x16x16xbf16>
    %355 = vector.shape_cast %354 : vector<1x16x16xbf16> to vector<16x16xbf16>
    %cst_357 = arith.constant dense<0.000000e+00> : vector<80x16xf32>
    %356 = tpu.matmul %353, %355, %cst_357 {dimension_numbers = #tpu.dot_dimension_numbers<[1], [0], [0], [1], [0, 0, 1, 1], [], []>} : vector<80x16xbf16>, vector<16x16xbf16>, vector<80x16xf32> -> vector<80x16xf32>
    %357 = arith.addf %352, %356 : vector<80x16xf32>
    %c29_358 = arith.constant 29 : index
    %c0_359 = arith.constant 0 : index
    %358 = vector.load %arg7[%c29_358, %c0_359] : memref<120x16xbf16, #tpu.memory_space<vmem>>, vector<80x16xbf16>
    %c6_360 = arith.constant 6 : index
    %c0_361 = arith.constant 0 : index
    %c0_362 = arith.constant 0 : index
    %359 = vector.load %arg4[%c6_360, %c0_361, %c0_362] : memref<9x16x16xbf16, #tpu.memory_space<vmem>>, vector<1x16x16xbf16>
    %360 = vector.shape_cast %359 : vector<1x16x16xbf16> to vector<16x16xbf16>
    %cst_363 = arith.constant dense<0.000000e+00> : vector<80x16xf32>
    %361 = tpu.matmul %358, %360, %cst_363 {dimension_numbers = #tpu.dot_dimension_numbers<[1], [0], [0], [1], [0, 0, 1, 1], [], []>} : vector<80x16xbf16>, vector<16x16xbf16>, vector<80x16xf32> -> vector<80x16xf32>
    %362 = arith.addf %357, %361 : vector<80x16xf32>
    %c30_364 = arith.constant 30 : index
    %c0_365 = arith.constant 0 : index
    %363 = vector.load %arg7[%c30_364, %c0_365] : memref<120x16xbf16, #tpu.memory_space<vmem>>, vector<80x16xbf16>
    %c7_366 = arith.constant 7 : index
    %c0_367 = arith.constant 0 : index
    %c0_368 = arith.constant 0 : index
    %364 = vector.load %arg4[%c7_366, %c0_367, %c0_368] : memref<9x16x16xbf16, #tpu.memory_space<vmem>>, vector<1x16x16xbf16>
    %365 = vector.shape_cast %364 : vector<1x16x16xbf16> to vector<16x16xbf16>
    %cst_369 = arith.constant dense<0.000000e+00> : vector<80x16xf32>
    %366 = tpu.matmul %363, %365, %cst_369 {dimension_numbers = #tpu.dot_dimension_numbers<[1], [0], [0], [1], [0, 0, 1, 1], [], []>} : vector<80x16xbf16>, vector<16x16xbf16>, vector<80x16xf32> -> vector<80x16xf32>
    %367 = arith.addf %362, %366 : vector<80x16xf32>
    %c31_370 = arith.constant 31 : index
    %c0_371 = arith.constant 0 : index
    %368 = vector.load %arg7[%c31_370, %c0_371] : memref<120x16xbf16, #tpu.memory_space<vmem>>, vector<80x16xbf16>
    %c8_372 = arith.constant 8 : index
    %c0_373 = arith.constant 0 : index
    %c0_374 = arith.constant 0 : index
    %369 = vector.load %arg4[%c8_372, %c0_373, %c0_374] : memref<9x16x16xbf16, #tpu.memory_space<vmem>>, vector<1x16x16xbf16>
    %370 = vector.shape_cast %369 : vector<1x16x16xbf16> to vector<16x16xbf16>
    %cst_375 = arith.constant dense<0.000000e+00> : vector<80x16xf32>
    %371 = tpu.matmul %368, %370, %cst_375 {dimension_numbers = #tpu.dot_dimension_numbers<[1], [0], [0], [1], [0, 0, 1, 1], [], []>} : vector<80x16xbf16>, vector<16x16xbf16>, vector<80x16xf32> -> vector<80x16xf32>
    %372 = arith.addf %367, %371 : vector<80x16xf32>
    %c0_376 = arith.constant 0 : index
    %c0_377 = arith.constant 0 : index
    %373 = vector.load %arg5[%c0_376, %c0_377] : memref<1x16xf32, #tpu.memory_space<vmem>>, vector<1x16xf32>
    %374 = vector.broadcast %373 : vector<1x16xf32> to vector<80x16xf32>
    %375 = arith.addf %372, %374 : vector<80x16xf32>
    %cst_378 = arith.constant 0.000000e+00 : f32
    %376 = vector.broadcast %cst_378 : f32 to vector<80x16xf32>
    %377 = arith.maximumf %375, %376 : vector<80x16xf32>
    %378 = vector.shape_cast %377 : vector<80x16xf32> to vector<10x128xf32>
    %c2_379 = arith.constant 2 : index
    %c0_380 = arith.constant 0 : index
    %c0_381 = arith.constant 0 : index
    %379 = vector.load %arg6[%c2_379, %c0_380, %c0_381] : memref<4x10x128xf32, #tpu.memory_space<vmem>>, vector<1x10x128xf32>
    %380 = vector.shape_cast %379 : vector<1x10x128xf32> to vector<10x128xf32>
    %381 = vector.shape_cast %378 : vector<10x128xf32> to vector<1x10x128xf32>
    tpu.vector_store %arg6[%c2_379, %c0_380, %c0_381], %381 {strides = array<i32>} : memref<4x10x128xf32, #tpu.memory_space<vmem>>, vector<1x10x128xf32>,
    %cst_382 = arith.constant 0.000000e+00 : f32
    %382 = vector.broadcast %cst_382 : f32 to vector<80x16xf32>
    %c3_383 = arith.constant 3 : index
    %c9_384 = arith.constant 9 : index
    %c0_385 = arith.constant 0 : index
    %383 = vector.load %arg1[%c3_383, %c9_384, %c0_385] : memref<4x120x8xbf16, #tpu.memory_space<vmem>>, vector<1x80x8xbf16>
    %384 = vector.shape_cast %383 : vector<1x80x8xbf16> to vector<80x8xbf16>
    %c0_386 = arith.constant 0 : index
    %c0_387 = arith.constant 0 : index
    %c0_388 = arith.constant 0 : index
    %385 = vector.load %arg2[%c0_386, %c0_387, %c0_388] : memref<9x8x16xbf16, #tpu.memory_space<vmem>>, vector<1x8x16xbf16>
    %386 = vector.shape_cast %385 : vector<1x8x16xbf16> to vector<8x16xbf16>
    %cst_389 = arith.constant dense<0.000000e+00> : vector<80x16xf32>
    %387 = tpu.matmul %384, %386, %cst_389 {dimension_numbers = #tpu.dot_dimension_numbers<[1], [0], [0], [1], [0, 0, 1, 1], [], []>} : vector<80x8xbf16>, vector<8x16xbf16>, vector<80x16xf32> -> vector<80x16xf32>
    %388 = arith.addf %382, %387 : vector<80x16xf32>
    %c3_390 = arith.constant 3 : index
    %c10_391 = arith.constant 10 : index
    %c0_392 = arith.constant 0 : index
    %389 = vector.load %arg1[%c3_390, %c10_391, %c0_392] : memref<4x120x8xbf16, #tpu.memory_space<vmem>>, vector<1x80x8xbf16>
    %390 = vector.shape_cast %389 : vector<1x80x8xbf16> to vector<80x8xbf16>
    %c1_393 = arith.constant 1 : index
    %c0_394 = arith.constant 0 : index
    %c0_395 = arith.constant 0 : index
    %391 = vector.load %arg2[%c1_393, %c0_394, %c0_395] : memref<9x8x16xbf16, #tpu.memory_space<vmem>>, vector<1x8x16xbf16>
    %392 = vector.shape_cast %391 : vector<1x8x16xbf16> to vector<8x16xbf16>
    %cst_396 = arith.constant dense<0.000000e+00> : vector<80x16xf32>
    %393 = tpu.matmul %390, %392, %cst_396 {dimension_numbers = #tpu.dot_dimension_numbers<[1], [0], [0], [1], [0, 0, 1, 1], [], []>} : vector<80x8xbf16>, vector<8x16xbf16>, vector<80x16xf32> -> vector<80x16xf32>
    %394 = arith.addf %388, %393 : vector<80x16xf32>
    %c3_397 = arith.constant 3 : index
    %c11_398 = arith.constant 11 : index
    %c0_399 = arith.constant 0 : index
    %395 = vector.load %arg1[%c3_397, %c11_398, %c0_399] : memref<4x120x8xbf16, #tpu.memory_space<vmem>>, vector<1x80x8xbf16>
    %396 = vector.shape_cast %395 : vector<1x80x8xbf16> to vector<80x8xbf16>
    %c2_400 = arith.constant 2 : index
    %c0_401 = arith.constant 0 : index
    %c0_402 = arith.constant 0 : index
    %397 = vector.load %arg2[%c2_400, %c0_401, %c0_402] : memref<9x8x16xbf16, #tpu.memory_space<vmem>>, vector<1x8x16xbf16>
    %398 = vector.shape_cast %397 : vector<1x8x16xbf16> to vector<8x16xbf16>
    %cst_403 = arith.constant dense<0.000000e+00> : vector<80x16xf32>
    %399 = tpu.matmul %396, %398, %cst_403 {dimension_numbers = #tpu.dot_dimension_numbers<[1], [0], [0], [1], [0, 0, 1, 1], [], []>} : vector<80x8xbf16>, vector<8x16xbf16>, vector<80x16xf32> -> vector<80x16xf32>
    %400 = arith.addf %394, %399 : vector<80x16xf32>
    %c3_404 = arith.constant 3 : index
    %c19_405 = arith.constant 19 : index
    %c0_406 = arith.constant 0 : index
    %401 = vector.load %arg1[%c3_404, %c19_405, %c0_406] : memref<4x120x8xbf16, #tpu.memory_space<vmem>>, vector<1x80x8xbf16>
    %402 = vector.shape_cast %401 : vector<1x80x8xbf16> to vector<80x8xbf16>
    %c3_407 = arith.constant 3 : index
    %c0_408 = arith.constant 0 : index
    %c0_409 = arith.constant 0 : index
    %403 = vector.load %arg2[%c3_407, %c0_408, %c0_409] : memref<9x8x16xbf16, #tpu.memory_space<vmem>>, vector<1x8x16xbf16>
    %404 = vector.shape_cast %403 : vector<1x8x16xbf16> to vector<8x16xbf16>
    %cst_410 = arith.constant dense<0.000000e+00> : vector<80x16xf32>
    %405 = tpu.matmul %402, %404, %cst_410 {dimension_numbers = #tpu.dot_dimension_numbers<[1], [0], [0], [1], [0, 0, 1, 1], [], []>} : vector<80x8xbf16>, vector<8x16xbf16>, vector<80x16xf32> -> vector<80x16xf32>
    %406 = arith.addf %400, %405 : vector<80x16xf32>
    %c3_411 = arith.constant 3 : index
    %c20_412 = arith.constant 20 : index
    %c0_413 = arith.constant 0 : index
    %407 = vector.load %arg1[%c3_411, %c20_412, %c0_413] : memref<4x120x8xbf16, #tpu.memory_space<vmem>>, vector<1x80x8xbf16>
    %408 = vector.shape_cast %407 : vector<1x80x8xbf16> to vector<80x8xbf16>
    %c4_414 = arith.constant 4 : index
    %c0_415 = arith.constant 0 : index
    %c0_416 = arith.constant 0 : index
    %409 = vector.load %arg2[%c4_414, %c0_415, %c0_416] : memref<9x8x16xbf16, #tpu.memory_space<vmem>>, vector<1x8x16xbf16>
    %410 = vector.shape_cast %409 : vector<1x8x16xbf16> to vector<8x16xbf16>
    %cst_417 = arith.constant dense<0.000000e+00> : vector<80x16xf32>
    %411 = tpu.matmul %408, %410, %cst_417 {dimension_numbers = #tpu.dot_dimension_numbers<[1], [0], [0], [1], [0, 0, 1, 1], [], []>} : vector<80x8xbf16>, vector<8x16xbf16>, vector<80x16xf32> -> vector<80x16xf32>
    %412 = arith.addf %406, %411 : vector<80x16xf32>
    %c3_418 = arith.constant 3 : index
    %c21_419 = arith.constant 21 : index
    %c0_420 = arith.constant 0 : index
    %413 = vector.load %arg1[%c3_418, %c21_419, %c0_420] : memref<4x120x8xbf16, #tpu.memory_space<vmem>>, vector<1x80x8xbf16>
    %414 = vector.shape_cast %413 : vector<1x80x8xbf16> to vector<80x8xbf16>
    %c5_421 = arith.constant 5 : index
    %c0_422 = arith.constant 0 : index
    %c0_423 = arith.constant 0 : index
    %415 = vector.load %arg2[%c5_421, %c0_422, %c0_423] : memref<9x8x16xbf16, #tpu.memory_space<vmem>>, vector<1x8x16xbf16>
    %416 = vector.shape_cast %415 : vector<1x8x16xbf16> to vector<8x16xbf16>
    %cst_424 = arith.constant dense<0.000000e+00> : vector<80x16xf32>
    %417 = tpu.matmul %414, %416, %cst_424 {dimension_numbers = #tpu.dot_dimension_numbers<[1], [0], [0], [1], [0, 0, 1, 1], [], []>} : vector<80x8xbf16>, vector<8x16xbf16>, vector<80x16xf32> -> vector<80x16xf32>
    %418 = arith.addf %412, %417 : vector<80x16xf32>
    %c3_425 = arith.constant 3 : index
    %c29_426 = arith.constant 29 : index
    %c0_427 = arith.constant 0 : index
    %419 = vector.load %arg1[%c3_425, %c29_426, %c0_427] : memref<4x120x8xbf16, #tpu.memory_space<vmem>>, vector<1x80x8xbf16>
    %420 = vector.shape_cast %419 : vector<1x80x8xbf16> to vector<80x8xbf16>
    %c6_428 = arith.constant 6 : index
    %c0_429 = arith.constant 0 : index
    %c0_430 = arith.constant 0 : index
    %421 = vector.load %arg2[%c6_428, %c0_429, %c0_430] : memref<9x8x16xbf16, #tpu.memory_space<vmem>>, vector<1x8x16xbf16>
    %422 = vector.shape_cast %421 : vector<1x8x16xbf16> to vector<8x16xbf16>
    %cst_431 = arith.constant dense<0.000000e+00> : vector<80x16xf32>
    %423 = tpu.matmul %420, %422, %cst_431 {dimension_numbers = #tpu.dot_dimension_numbers<[1], [0], [0], [1], [0, 0, 1, 1], [], []>} : vector<80x8xbf16>, vector<8x16xbf16>, vector<80x16xf32> -> vector<80x16xf32>
    %424 = arith.addf %418, %423 : vector<80x16xf32>
    %c3_432 = arith.constant 3 : index
    %c30_433 = arith.constant 30 : index
    %c0_434 = arith.constant 0 : index
    %425 = vector.load %arg1[%c3_432, %c30_433, %c0_434] : memref<4x120x8xbf16, #tpu.memory_space<vmem>>, vector<1x80x8xbf16>
    %426 = vector.shape_cast %425 : vector<1x80x8xbf16> to vector<80x8xbf16>
    %c7_435 = arith.constant 7 : index
    %c0_436 = arith.constant 0 : index
    %c0_437 = arith.constant 0 : index
    %427 = vector.load %arg2[%c7_435, %c0_436, %c0_437] : memref<9x8x16xbf16, #tpu.memory_space<vmem>>, vector<1x8x16xbf16>
    %428 = vector.shape_cast %427 : vector<1x8x16xbf16> to vector<8x16xbf16>
    %cst_438 = arith.constant dense<0.000000e+00> : vector<80x16xf32>
    %429 = tpu.matmul %426, %428, %cst_438 {dimension_numbers = #tpu.dot_dimension_numbers<[1], [0], [0], [1], [0, 0, 1, 1], [], []>} : vector<80x8xbf16>, vector<8x16xbf16>, vector<80x16xf32> -> vector<80x16xf32>
    %430 = arith.addf %424, %429 : vector<80x16xf32>
    %c3_439 = arith.constant 3 : index
    %c31_440 = arith.constant 31 : index
    %c0_441 = arith.constant 0 : index
    %431 = vector.load %arg1[%c3_439, %c31_440, %c0_441] : memref<4x120x8xbf16, #tpu.memory_space<vmem>>, vector<1x80x8xbf16>
    %432 = vector.shape_cast %431 : vector<1x80x8xbf16> to vector<80x8xbf16>
    %c8_442 = arith.constant 8 : index
    %c0_443 = arith.constant 0 : index
    %c0_444 = arith.constant 0 : index
    %433 = vector.load %arg2[%c8_442, %c0_443, %c0_444] : memref<9x8x16xbf16, #tpu.memory_space<vmem>>, vector<1x8x16xbf16>
    %434 = vector.shape_cast %433 : vector<1x8x16xbf16> to vector<8x16xbf16>
    %cst_445 = arith.constant dense<0.000000e+00> : vector<80x16xf32>
    %435 = tpu.matmul %432, %434, %cst_445 {dimension_numbers = #tpu.dot_dimension_numbers<[1], [0], [0], [1], [0, 0, 1, 1], [], []>} : vector<80x8xbf16>, vector<8x16xbf16>, vector<80x16xf32> -> vector<80x16xf32>
    %436 = arith.addf %430, %435 : vector<80x16xf32>
    %c0_446 = arith.constant 0 : index
    %c0_447 = arith.constant 0 : index
    %437 = vector.load %arg3[%c0_446, %c0_447] : memref<1x16xf32, #tpu.memory_space<vmem>>, vector<1x16xf32>
    %438 = vector.broadcast %437 : vector<1x16xf32> to vector<80x16xf32>
    %439 = arith.addf %436, %438 : vector<80x16xf32>
    %cst_448 = arith.constant 0.000000e+00 : f32
    %440 = vector.broadcast %cst_448 : f32 to vector<80x16xf32>
    %441 = arith.maximumf %439, %440 : vector<80x16xf32>
    %cst_449 = arith.constant 0.000000e+00 : f32
    %442 = vector.broadcast %cst_449 : f32 to vector<80x16xf32>
    %443 = arith.select %24, %441, %442 : vector<80x16xi1>, vector<80x16xf32>
    %444 = arith.truncf %443 : vector<80x16xf32> to vector<80x16xbf16>
    %c20_450 = arith.constant 20 : index
    %c0_451 = arith.constant 0 : index
    %445 = vector.load %arg7[%c20_450, %c0_451] : memref<120x16xbf16, #tpu.memory_space<vmem>>, vector<80x16xbf16>
    tpu.vector_store %arg7[%c20_450, %c0_451], %444 {strides = array<i32>} : memref<120x16xbf16, #tpu.memory_space<vmem>>, vector<80x16xbf16>,
    %cst_452 = arith.constant 0.000000e+00 : f32
    %446 = vector.broadcast %cst_452 : f32 to vector<80x16xf32>
    %c9_453 = arith.constant 9 : index
    %c0_454 = arith.constant 0 : index
    %447 = vector.load %arg7[%c9_453, %c0_454] : memref<120x16xbf16, #tpu.memory_space<vmem>>, vector<80x16xbf16>
    %c0_455 = arith.constant 0 : index
    %c0_456 = arith.constant 0 : index
    %c0_457 = arith.constant 0 : index
    %448 = vector.load %arg4[%c0_455, %c0_456, %c0_457] : memref<9x16x16xbf16, #tpu.memory_space<vmem>>, vector<1x16x16xbf16>
    %449 = vector.shape_cast %448 : vector<1x16x16xbf16> to vector<16x16xbf16>
    %cst_458 = arith.constant dense<0.000000e+00> : vector<80x16xf32>
    %450 = tpu.matmul %447, %449, %cst_458 {dimension_numbers = #tpu.dot_dimension_numbers<[1], [0], [0], [1], [0, 0, 1, 1], [], []>} : vector<80x16xbf16>, vector<16x16xbf16>, vector<80x16xf32> -> vector<80x16xf32>
    %451 = arith.addf %446, %450 : vector<80x16xf32>
    %c10_459 = arith.constant 10 : index
    %c0_460 = arith.constant 0 : index
    %452 = vector.load %arg7[%c10_459, %c0_460] : memref<120x16xbf16, #tpu.memory_space<vmem>>, vector<80x16xbf16>
    %c1_461 = arith.constant 1 : index
    %c0_462 = arith.constant 0 : index
    %c0_463 = arith.constant 0 : index
    %453 = vector.load %arg4[%c1_461, %c0_462, %c0_463] : memref<9x16x16xbf16, #tpu.memory_space<vmem>>, vector<1x16x16xbf16>
    %454 = vector.shape_cast %453 : vector<1x16x16xbf16> to vector<16x16xbf16>
    %cst_464 = arith.constant dense<0.000000e+00> : vector<80x16xf32>
    %455 = tpu.matmul %452, %454, %cst_464 {dimension_numbers = #tpu.dot_dimension_numbers<[1], [0], [0], [1], [0, 0, 1, 1], [], []>} : vector<80x16xbf16>, vector<16x16xbf16>, vector<80x16xf32> -> vector<80x16xf32>
    %456 = arith.addf %451, %455 : vector<80x16xf32>
    %c11_465 = arith.constant 11 : index
    %c0_466 = arith.constant 0 : index
    %457 = vector.load %arg7[%c11_465, %c0_466] : memref<120x16xbf16, #tpu.memory_space<vmem>>, vector<80x16xbf16>
    %c2_467 = arith.constant 2 : index
    %c0_468 = arith.constant 0 : index
    %c0_469 = arith.constant 0 : index
    %458 = vector.load %arg4[%c2_467, %c0_468, %c0_469] : memref<9x16x16xbf16, #tpu.memory_space<vmem>>, vector<1x16x16xbf16>
    %459 = vector.shape_cast %458 : vector<1x16x16xbf16> to vector<16x16xbf16>
    %cst_470 = arith.constant dense<0.000000e+00> : vector<80x16xf32>
    %460 = tpu.matmul %457, %459, %cst_470 {dimension_numbers = #tpu.dot_dimension_numbers<[1], [0], [0], [1], [0, 0, 1, 1], [], []>} : vector<80x16xbf16>, vector<16x16xbf16>, vector<80x16xf32> -> vector<80x16xf32>
    %461 = arith.addf %456, %460 : vector<80x16xf32>
    %c19_471 = arith.constant 19 : index
    %c0_472 = arith.constant 0 : index
    %462 = vector.load %arg7[%c19_471, %c0_472] : memref<120x16xbf16, #tpu.memory_space<vmem>>, vector<80x16xbf16>
    %c3_473 = arith.constant 3 : index
    %c0_474 = arith.constant 0 : index
    %c0_475 = arith.constant 0 : index
    %463 = vector.load %arg4[%c3_473, %c0_474, %c0_475] : memref<9x16x16xbf16, #tpu.memory_space<vmem>>, vector<1x16x16xbf16>
    %464 = vector.shape_cast %463 : vector<1x16x16xbf16> to vector<16x16xbf16>
    %cst_476 = arith.constant dense<0.000000e+00> : vector<80x16xf32>
    %465 = tpu.matmul %462, %464, %cst_476 {dimension_numbers = #tpu.dot_dimension_numbers<[1], [0], [0], [1], [0, 0, 1, 1], [], []>} : vector<80x16xbf16>, vector<16x16xbf16>, vector<80x16xf32> -> vector<80x16xf32>
    %466 = arith.addf %461, %465 : vector<80x16xf32>
    %c20_477 = arith.constant 20 : index
    %c0_478 = arith.constant 0 : index
    %467 = vector.load %arg7[%c20_477, %c0_478] : memref<120x16xbf16, #tpu.memory_space<vmem>>, vector<80x16xbf16>
    %c4_479 = arith.constant 4 : index
    %c0_480 = arith.constant 0 : index
    %c0_481 = arith.constant 0 : index
    %468 = vector.load %arg4[%c4_479, %c0_480, %c0_481] : memref<9x16x16xbf16, #tpu.memory_space<vmem>>, vector<1x16x16xbf16>
    %469 = vector.shape_cast %468 : vector<1x16x16xbf16> to vector<16x16xbf16>
    %cst_482 = arith.constant dense<0.000000e+00> : vector<80x16xf32>
    %470 = tpu.matmul %467, %469, %cst_482 {dimension_numbers = #tpu.dot_dimension_numbers<[1], [0], [0], [1], [0, 0, 1, 1], [], []>} : vector<80x16xbf16>, vector<16x16xbf16>, vector<80x16xf32> -> vector<80x16xf32>
    %471 = arith.addf %466, %470 : vector<80x16xf32>
    %c21_483 = arith.constant 21 : index
    %c0_484 = arith.constant 0 : index
    %472 = vector.load %arg7[%c21_483, %c0_484] : memref<120x16xbf16, #tpu.memory_space<vmem>>, vector<80x16xbf16>
    %c5_485 = arith.constant 5 : index
    %c0_486 = arith.constant 0 : index
    %c0_487 = arith.constant 0 : index
    %473 = vector.load %arg4[%c5_485, %c0_486, %c0_487] : memref<9x16x16xbf16, #tpu.memory_space<vmem>>, vector<1x16x16xbf16>
    %474 = vector.shape_cast %473 : vector<1x16x16xbf16> to vector<16x16xbf16>
    %cst_488 = arith.constant dense<0.000000e+00> : vector<80x16xf32>
    %475 = tpu.matmul %472, %474, %cst_488 {dimension_numbers = #tpu.dot_dimension_numbers<[1], [0], [0], [1], [0, 0, 1, 1], [], []>} : vector<80x16xbf16>, vector<16x16xbf16>, vector<80x16xf32> -> vector<80x16xf32>
    %476 = arith.addf %471, %475 : vector<80x16xf32>
    %c29_489 = arith.constant 29 : index
    %c0_490 = arith.constant 0 : index
    %477 = vector.load %arg7[%c29_489, %c0_490] : memref<120x16xbf16, #tpu.memory_space<vmem>>, vector<80x16xbf16>
    %c6_491 = arith.constant 6 : index
    %c0_492 = arith.constant 0 : index
    %c0_493 = arith.constant 0 : index
    %478 = vector.load %arg4[%c6_491, %c0_492, %c0_493] : memref<9x16x16xbf16, #tpu.memory_space<vmem>>, vector<1x16x16xbf16>
    %479 = vector.shape_cast %478 : vector<1x16x16xbf16> to vector<16x16xbf16>
    %cst_494 = arith.constant dense<0.000000e+00> : vector<80x16xf32>
    %480 = tpu.matmul %477, %479, %cst_494 {dimension_numbers = #tpu.dot_dimension_numbers<[1], [0], [0], [1], [0, 0, 1, 1], [], []>} : vector<80x16xbf16>, vector<16x16xbf16>, vector<80x16xf32> -> vector<80x16xf32>
    %481 = arith.addf %476, %480 : vector<80x16xf32>
    %c30_495 = arith.constant 30 : index
    %c0_496 = arith.constant 0 : index
    %482 = vector.load %arg7[%c30_495, %c0_496] : memref<120x16xbf16, #tpu.memory_space<vmem>>, vector<80x16xbf16>
    %c7_497 = arith.constant 7 : index
    %c0_498 = arith.constant 0 : index
    %c0_499 = arith.constant 0 : index
    %483 = vector.load %arg4[%c7_497, %c0_498, %c0_499] : memref<9x16x16xbf16, #tpu.memory_space<vmem>>, vector<1x16x16xbf16>
    %484 = vector.shape_cast %483 : vector<1x16x16xbf16> to vector<16x16xbf16>
    %cst_500 = arith.constant dense<0.000000e+00> : vector<80x16xf32>
    %485 = tpu.matmul %482, %484, %cst_500 {dimension_numbers = #tpu.dot_dimension_numbers<[1], [0], [0], [1], [0, 0, 1, 1], [], []>} : vector<80x16xbf16>, vector<16x16xbf16>, vector<80x16xf32> -> vector<80x16xf32>
    %486 = arith.addf %481, %485 : vector<80x16xf32>
    %c31_501 = arith.constant 31 : index
    %c0_502 = arith.constant 0 : index
    %487 = vector.load %arg7[%c31_501, %c0_502] : memref<120x16xbf16, #tpu.memory_space<vmem>>, vector<80x16xbf16>
    %c8_503 = arith.constant 8 : index
    %c0_504 = arith.constant 0 : index
    %c0_505 = arith.constant 0 : index
    %488 = vector.load %arg4[%c8_503, %c0_504, %c0_505] : memref<9x16x16xbf16, #tpu.memory_space<vmem>>, vector<1x16x16xbf16>
    %489 = vector.shape_cast %488 : vector<1x16x16xbf16> to vector<16x16xbf16>
    %cst_506 = arith.constant dense<0.000000e+00> : vector<80x16xf32>
    %490 = tpu.matmul %487, %489, %cst_506 {dimension_numbers = #tpu.dot_dimension_numbers<[1], [0], [0], [1], [0, 0, 1, 1], [], []>} : vector<80x16xbf16>, vector<16x16xbf16>, vector<80x16xf32> -> vector<80x16xf32>
    %491 = arith.addf %486, %490 : vector<80x16xf32>
    %c0_507 = arith.constant 0 : index
    %c0_508 = arith.constant 0 : index
    %492 = vector.load %arg5[%c0_507, %c0_508] : memref<1x16xf32, #tpu.memory_space<vmem>>, vector<1x16xf32>
    %493 = vector.broadcast %492 : vector<1x16xf32> to vector<80x16xf32>
    %494 = arith.addf %491, %493 : vector<80x16xf32>
    %cst_509 = arith.constant 0.000000e+00 : f32
    %495 = vector.broadcast %cst_509 : f32 to vector<80x16xf32>
    %496 = arith.maximumf %494, %495 : vector<80x16xf32>
    %497 = vector.shape_cast %496 : vector<80x16xf32> to vector<10x128xf32>
    %c3_510 = arith.constant 3 : index
    %c0_511 = arith.constant 0 : index
    %c0_512 = arith.constant 0 : index
    %498 = vector.load %arg6[%c3_510, %c0_511, %c0_512] : memref<4x10x128xf32, #tpu.memory_space<vmem>>, vector<1x10x128xf32>
    %499 = vector.shape_cast %498 : vector<1x10x128xf32> to vector<10x128xf32>
    %500 = vector.shape_cast %497 : vector<10x128xf32> to vector<1x10x128xf32>
    tpu.vector_store %arg6[%c3_510, %c0_511, %c0_512], %500 {strides = array<i32>} : memref<4x10x128xf32, #tpu.memory_space<vmem>>, vector<1x10x128xf32>,
    return
  }
  func.func @transform_0(%arg0: i32) -> (i32, i32, i32) {
    %c0_i32 = arith.constant 0 : i32
    %c0_i32_0 = arith.constant 0 : i32
    %c0_i32_1 = arith.constant 0 : i32
    return %arg0, %c0_i32, %c0_i32_0 : i32, i32, i32
  }
  func.func @transform_1(%arg0: i32) -> (i32, i32, i32) {
    %c0_i32 = arith.constant 0 : i32
    %c0_i32_0 = arith.constant 0 : i32
    %c0_i32_1 = arith.constant 0 : i32
    %c0_i32_2 = arith.constant 0 : i32
    return %c0_i32, %c0_i32_0, %c0_i32_1 : i32, i32, i32
  }
  func.func @transform_2(%arg0: i32) -> (i32, i32) {
    %c0_i32 = arith.constant 0 : i32
    %c0_i32_0 = arith.constant 0 : i32
    %c0_i32_1 = arith.constant 0 : i32
    return %c0_i32, %c0_i32_0 : i32, i32
  }
  func.func @transform_3(%arg0: i32) -> (i32, i32, i32) {
    %c0_i32 = arith.constant 0 : i32
    %c0_i32_0 = arith.constant 0 : i32
    %c0_i32_1 = arith.constant 0 : i32
    %c0_i32_2 = arith.constant 0 : i32
    return %c0_i32, %c0_i32_0, %c0_i32_1 : i32, i32, i32
  }
  func.func @transform_4(%arg0: i32) -> (i32, i32) {
    %c0_i32 = arith.constant 0 : i32
    %c0_i32_0 = arith.constant 0 : i32
    %c0_i32_1 = arith.constant 0 : i32
    return %c0_i32, %c0_i32_0 : i32, i32
  }
  func.func @transform_5(%arg0: i32) -> (i32, i32, i32) {
    %c0_i32 = arith.constant 0 : i32
    %c0_i32_0 = arith.constant 0 : i32
    %c0_i32_1 = arith.constant 0 : i32
    return %arg0, %c0_i32, %c0_i32_0 : i32, i32, i32
  }
}

module attributes {stable_mosaic.version = 11 : i64} {
  func.func @unet_conv3_kernel(%arg0: i32, %arg1: memref<1x120x8xbf16, #tpu.memory_space<vmem>>, %arg2: memref<9x8x16xbf16, #tpu.memory_space<vmem>>, %arg3: memref<1x16xf32, #tpu.memory_space<vmem>>, %arg4: memref<9x16x16xbf16, #tpu.memory_space<vmem>>, %arg5: memref<1x16xf32, #tpu.memory_space<vmem>>, %arg6: memref<1x10x128xf32, #tpu.memory_space<vmem>>, %arg7: memref<120x16xbf16, #tpu.memory_space<vmem>>) attributes {dimension_semantics = [#tpu.dimension_semantics<parallel>], iteration_bounds = array<i64: 8>, scalar_prefetch = 0 : i64, scratch_operands = 1 : i64, tpu.core_type = #tpu.core_type<tc>, window_params = [{transform_indices = @transform_0, window_bounds = array<i64: 1, 120, 8>}, {pipeline_mode = #tpu.pipeline_mode<synchronous>, transform_indices = @transform_1, window_bounds = array<i64: 9, 8, 16>}, {pipeline_mode = #tpu.pipeline_mode<synchronous>, transform_indices = @transform_2, window_bounds = array<i64: 1, 16>}, {pipeline_mode = #tpu.pipeline_mode<synchronous>, transform_indices = @transform_3, window_bounds = array<i64: 9, 16, 16>}, {pipeline_mode = #tpu.pipeline_mode<synchronous>, transform_indices = @transform_4, window_bounds = array<i64: 1, 16>}, {transform_indices = @transform_5, window_bounds = array<i64: 1, 10, 128>}]} {
    %cst = arith.constant 0.000000e+00 : bf16
    %0 = vector.broadcast %cst : bf16 to vector<20x16xbf16>
    %c0 = arith.constant 0 : index
    %c0_0 = arith.constant 0 : index
    %1 = vector.load %arg7[%c0, %c0_0] : memref<120x16xbf16, #tpu.memory_space<vmem>>, vector<20x16xbf16>
    tpu.vector_store %arg7[%c0, %c0_0], %0 {strides = array<i32>} : memref<120x16xbf16, #tpu.memory_space<vmem>>, vector<20x16xbf16>,
    %c100 = arith.constant 100 : index
    %c0_1 = arith.constant 0 : index
    %2 = vector.load %arg7[%c100, %c0_1] : memref<120x16xbf16, #tpu.memory_space<vmem>>, vector<20x16xbf16>
    tpu.vector_store %arg7[%c100, %c0_1], %0 {strides = array<i32>} : memref<120x16xbf16, #tpu.memory_space<vmem>>, vector<20x16xbf16>,
    %3 = tpu.iota {dimensions = array<i32: 0>} : vector<80x16xi32>
    %c10_i32 = arith.constant 10 : i32
    %c0_i32 = arith.constant 0 : i32
    %4 = arith.cmpi eq, %c10_i32, %c0_i32 : i32
    %c1_i32 = arith.constant 1 : i32
    %5 = arith.select %4, %c1_i32, %c10_i32 : i32
    %6 = vector.broadcast %5 : i32 to vector<80x16xi32>
    %7 = arith.remsi %3, %6 : vector<80x16xi32>
    %c0_i32_2 = arith.constant 0 : i32
    %8 = vector.broadcast %c0_i32_2 : i32 to vector<80x16xi32>
    %9 = arith.cmpi ne, %7, %8 : vector<80x16xi32>
    %c0_i32_3 = arith.constant 0 : i32
    %10 = vector.broadcast %c0_i32_3 : i32 to vector<80x16xi32>
    %11 = arith.cmpi slt, %7, %10 : vector<80x16xi32>
    %c0_i32_4 = arith.constant 0 : i32
    %12 = arith.cmpi slt, %5, %c0_i32_4 : i32
    %13 = vector.broadcast %12 : i1 to vector<80x16xi1>
    %14 = vector.broadcast %13 : vector<80x16xi1> to vector<80x16xi1>
    %15 = arith.xori %11, %14 : vector<80x16xi1>
    %16 = arith.andi %15, %9 : vector<80x16xi1>
    %17 = vector.broadcast %5 : i32 to vector<80x16xi32>
    %18 = arith.addi %7, %17 : vector<80x16xi32>
    %19 = arith.select %16, %18, %7 : vector<80x16xi1>, vector<80x16xi32>
    %c1_i32_5 = arith.constant 1 : i32
    %20 = vector.broadcast %c1_i32_5 : i32 to vector<80x16xi32>
    %21 = arith.cmpi sge, %19, %20 : vector<80x16xi32>
    %c8_i32 = arith.constant 8 : i32
    %22 = vector.broadcast %c8_i32 : i32 to vector<80x16xi32>
    %23 = arith.cmpi sle, %19, %22 : vector<80x16xi32>
    %24 = arith.andi %21, %23 : vector<80x16xi1>
    %cst_6 = arith.constant 0.000000e+00 : f32
    %25 = vector.broadcast %cst_6 : f32 to vector<80x16xf32>
    %c0_7 = arith.constant 0 : index
    %c9 = arith.constant 9 : index
    %c0_8 = arith.constant 0 : index
    %26 = vector.load %arg1[%c0_7, %c9, %c0_8] : memref<1x120x8xbf16, #tpu.memory_space<vmem>>, vector<1x80x8xbf16>
    %27 = vector.shape_cast %26 : vector<1x80x8xbf16> to vector<80x8xbf16>
    %c0_9 = arith.constant 0 : index
    %c0_10 = arith.constant 0 : index
    %c0_11 = arith.constant 0 : index
    %28 = vector.load %arg2[%c0_9, %c0_10, %c0_11] : memref<9x8x16xbf16, #tpu.memory_space<vmem>>, vector<1x8x16xbf16>
    %29 = vector.shape_cast %28 : vector<1x8x16xbf16> to vector<8x16xbf16>
    %cst_12 = arith.constant dense<0.000000e+00> : vector<80x16xf32>
    %30 = tpu.matmul %27, %29, %cst_12 {dimension_numbers = #tpu.dot_dimension_numbers<[1], [0], [0], [1], [0, 0, 1, 1], [], []>} : vector<80x8xbf16>, vector<8x16xbf16>, vector<80x16xf32> -> vector<80x16xf32>
    %31 = arith.addf %25, %30 : vector<80x16xf32>
    %c0_13 = arith.constant 0 : index
    %c10 = arith.constant 10 : index
    %c0_14 = arith.constant 0 : index
    %32 = vector.load %arg1[%c0_13, %c10, %c0_14] : memref<1x120x8xbf16, #tpu.memory_space<vmem>>, vector<1x80x8xbf16>
    %33 = vector.shape_cast %32 : vector<1x80x8xbf16> to vector<80x8xbf16>
    %c1 = arith.constant 1 : index
    %c0_15 = arith.constant 0 : index
    %c0_16 = arith.constant 0 : index
    %34 = vector.load %arg2[%c1, %c0_15, %c0_16] : memref<9x8x16xbf16, #tpu.memory_space<vmem>>, vector<1x8x16xbf16>
    %35 = vector.shape_cast %34 : vector<1x8x16xbf16> to vector<8x16xbf16>
    %cst_17 = arith.constant dense<0.000000e+00> : vector<80x16xf32>
    %36 = tpu.matmul %33, %35, %cst_17 {dimension_numbers = #tpu.dot_dimension_numbers<[1], [0], [0], [1], [0, 0, 1, 1], [], []>} : vector<80x8xbf16>, vector<8x16xbf16>, vector<80x16xf32> -> vector<80x16xf32>
    %37 = arith.addf %31, %36 : vector<80x16xf32>
    %c0_18 = arith.constant 0 : index
    %c11 = arith.constant 11 : index
    %c0_19 = arith.constant 0 : index
    %38 = vector.load %arg1[%c0_18, %c11, %c0_19] : memref<1x120x8xbf16, #tpu.memory_space<vmem>>, vector<1x80x8xbf16>
    %39 = vector.shape_cast %38 : vector<1x80x8xbf16> to vector<80x8xbf16>
    %c2 = arith.constant 2 : index
    %c0_20 = arith.constant 0 : index
    %c0_21 = arith.constant 0 : index
    %40 = vector.load %arg2[%c2, %c0_20, %c0_21] : memref<9x8x16xbf16, #tpu.memory_space<vmem>>, vector<1x8x16xbf16>
    %41 = vector.shape_cast %40 : vector<1x8x16xbf16> to vector<8x16xbf16>
    %cst_22 = arith.constant dense<0.000000e+00> : vector<80x16xf32>
    %42 = tpu.matmul %39, %41, %cst_22 {dimension_numbers = #tpu.dot_dimension_numbers<[1], [0], [0], [1], [0, 0, 1, 1], [], []>} : vector<80x8xbf16>, vector<8x16xbf16>, vector<80x16xf32> -> vector<80x16xf32>
    %43 = arith.addf %37, %42 : vector<80x16xf32>
    %c0_23 = arith.constant 0 : index
    %c19 = arith.constant 19 : index
    %c0_24 = arith.constant 0 : index
    %44 = vector.load %arg1[%c0_23, %c19, %c0_24] : memref<1x120x8xbf16, #tpu.memory_space<vmem>>, vector<1x80x8xbf16>
    %45 = vector.shape_cast %44 : vector<1x80x8xbf16> to vector<80x8xbf16>
    %c3 = arith.constant 3 : index
    %c0_25 = arith.constant 0 : index
    %c0_26 = arith.constant 0 : index
    %46 = vector.load %arg2[%c3, %c0_25, %c0_26] : memref<9x8x16xbf16, #tpu.memory_space<vmem>>, vector<1x8x16xbf16>
    %47 = vector.shape_cast %46 : vector<1x8x16xbf16> to vector<8x16xbf16>
    %cst_27 = arith.constant dense<0.000000e+00> : vector<80x16xf32>
    %48 = tpu.matmul %45, %47, %cst_27 {dimension_numbers = #tpu.dot_dimension_numbers<[1], [0], [0], [1], [0, 0, 1, 1], [], []>} : vector<80x8xbf16>, vector<8x16xbf16>, vector<80x16xf32> -> vector<80x16xf32>
    %49 = arith.addf %43, %48 : vector<80x16xf32>
    %c0_28 = arith.constant 0 : index
    %c20 = arith.constant 20 : index
    %c0_29 = arith.constant 0 : index
    %50 = vector.load %arg1[%c0_28, %c20, %c0_29] : memref<1x120x8xbf16, #tpu.memory_space<vmem>>, vector<1x80x8xbf16>
    %51 = vector.shape_cast %50 : vector<1x80x8xbf16> to vector<80x8xbf16>
    %c4 = arith.constant 4 : index
    %c0_30 = arith.constant 0 : index
    %c0_31 = arith.constant 0 : index
    %52 = vector.load %arg2[%c4, %c0_30, %c0_31] : memref<9x8x16xbf16, #tpu.memory_space<vmem>>, vector<1x8x16xbf16>
    %53 = vector.shape_cast %52 : vector<1x8x16xbf16> to vector<8x16xbf16>
    %cst_32 = arith.constant dense<0.000000e+00> : vector<80x16xf32>
    %54 = tpu.matmul %51, %53, %cst_32 {dimension_numbers = #tpu.dot_dimension_numbers<[1], [0], [0], [1], [0, 0, 1, 1], [], []>} : vector<80x8xbf16>, vector<8x16xbf16>, vector<80x16xf32> -> vector<80x16xf32>
    %55 = arith.addf %49, %54 : vector<80x16xf32>
    %c0_33 = arith.constant 0 : index
    %c21 = arith.constant 21 : index
    %c0_34 = arith.constant 0 : index
    %56 = vector.load %arg1[%c0_33, %c21, %c0_34] : memref<1x120x8xbf16, #tpu.memory_space<vmem>>, vector<1x80x8xbf16>
    %57 = vector.shape_cast %56 : vector<1x80x8xbf16> to vector<80x8xbf16>
    %c5 = arith.constant 5 : index
    %c0_35 = arith.constant 0 : index
    %c0_36 = arith.constant 0 : index
    %58 = vector.load %arg2[%c5, %c0_35, %c0_36] : memref<9x8x16xbf16, #tpu.memory_space<vmem>>, vector<1x8x16xbf16>
    %59 = vector.shape_cast %58 : vector<1x8x16xbf16> to vector<8x16xbf16>
    %cst_37 = arith.constant dense<0.000000e+00> : vector<80x16xf32>
    %60 = tpu.matmul %57, %59, %cst_37 {dimension_numbers = #tpu.dot_dimension_numbers<[1], [0], [0], [1], [0, 0, 1, 1], [], []>} : vector<80x8xbf16>, vector<8x16xbf16>, vector<80x16xf32> -> vector<80x16xf32>
    %61 = arith.addf %55, %60 : vector<80x16xf32>
    %c0_38 = arith.constant 0 : index
    %c29 = arith.constant 29 : index
    %c0_39 = arith.constant 0 : index
    %62 = vector.load %arg1[%c0_38, %c29, %c0_39] : memref<1x120x8xbf16, #tpu.memory_space<vmem>>, vector<1x80x8xbf16>
    %63 = vector.shape_cast %62 : vector<1x80x8xbf16> to vector<80x8xbf16>
    %c6 = arith.constant 6 : index
    %c0_40 = arith.constant 0 : index
    %c0_41 = arith.constant 0 : index
    %64 = vector.load %arg2[%c6, %c0_40, %c0_41] : memref<9x8x16xbf16, #tpu.memory_space<vmem>>, vector<1x8x16xbf16>
    %65 = vector.shape_cast %64 : vector<1x8x16xbf16> to vector<8x16xbf16>
    %cst_42 = arith.constant dense<0.000000e+00> : vector<80x16xf32>
    %66 = tpu.matmul %63, %65, %cst_42 {dimension_numbers = #tpu.dot_dimension_numbers<[1], [0], [0], [1], [0, 0, 1, 1], [], []>} : vector<80x8xbf16>, vector<8x16xbf16>, vector<80x16xf32> -> vector<80x16xf32>
    %67 = arith.addf %61, %66 : vector<80x16xf32>
    %c0_43 = arith.constant 0 : index
    %c30 = arith.constant 30 : index
    %c0_44 = arith.constant 0 : index
    %68 = vector.load %arg1[%c0_43, %c30, %c0_44] : memref<1x120x8xbf16, #tpu.memory_space<vmem>>, vector<1x80x8xbf16>
    %69 = vector.shape_cast %68 : vector<1x80x8xbf16> to vector<80x8xbf16>
    %c7 = arith.constant 7 : index
    %c0_45 = arith.constant 0 : index
    %c0_46 = arith.constant 0 : index
    %70 = vector.load %arg2[%c7, %c0_45, %c0_46] : memref<9x8x16xbf16, #tpu.memory_space<vmem>>, vector<1x8x16xbf16>
    %71 = vector.shape_cast %70 : vector<1x8x16xbf16> to vector<8x16xbf16>
    %cst_47 = arith.constant dense<0.000000e+00> : vector<80x16xf32>
    %72 = tpu.matmul %69, %71, %cst_47 {dimension_numbers = #tpu.dot_dimension_numbers<[1], [0], [0], [1], [0, 0, 1, 1], [], []>} : vector<80x8xbf16>, vector<8x16xbf16>, vector<80x16xf32> -> vector<80x16xf32>
    %73 = arith.addf %67, %72 : vector<80x16xf32>
    %c0_48 = arith.constant 0 : index
    %c31 = arith.constant 31 : index
    %c0_49 = arith.constant 0 : index
    %74 = vector.load %arg1[%c0_48, %c31, %c0_49] : memref<1x120x8xbf16, #tpu.memory_space<vmem>>, vector<1x80x8xbf16>
    %75 = vector.shape_cast %74 : vector<1x80x8xbf16> to vector<80x8xbf16>
    %c8 = arith.constant 8 : index
    %c0_50 = arith.constant 0 : index
    %c0_51 = arith.constant 0 : index
    %76 = vector.load %arg2[%c8, %c0_50, %c0_51] : memref<9x8x16xbf16, #tpu.memory_space<vmem>>, vector<1x8x16xbf16>
    %77 = vector.shape_cast %76 : vector<1x8x16xbf16> to vector<8x16xbf16>
    %cst_52 = arith.constant dense<0.000000e+00> : vector<80x16xf32>
    %78 = tpu.matmul %75, %77, %cst_52 {dimension_numbers = #tpu.dot_dimension_numbers<[1], [0], [0], [1], [0, 0, 1, 1], [], []>} : vector<80x8xbf16>, vector<8x16xbf16>, vector<80x16xf32> -> vector<80x16xf32>
    %79 = arith.addf %73, %78 : vector<80x16xf32>
    %c0_53 = arith.constant 0 : index
    %c0_54 = arith.constant 0 : index
    %80 = vector.load %arg3[%c0_53, %c0_54] : memref<1x16xf32, #tpu.memory_space<vmem>>, vector<1x16xf32>
    %81 = vector.broadcast %80 : vector<1x16xf32> to vector<80x16xf32>
    %82 = arith.addf %79, %81 : vector<80x16xf32>
    %cst_55 = arith.constant 0.000000e+00 : f32
    %83 = vector.broadcast %cst_55 : f32 to vector<80x16xf32>
    %84 = arith.maximumf %82, %83 : vector<80x16xf32>
    %cst_56 = arith.constant 0.000000e+00 : f32
    %85 = vector.broadcast %cst_56 : f32 to vector<80x16xf32>
    %86 = arith.select %24, %84, %85 : vector<80x16xi1>, vector<80x16xf32>
    %87 = arith.truncf %86 : vector<80x16xf32> to vector<80x16xbf16>
    %c20_57 = arith.constant 20 : index
    %c0_58 = arith.constant 0 : index
    %88 = vector.load %arg7[%c20_57, %c0_58] : memref<120x16xbf16, #tpu.memory_space<vmem>>, vector<80x16xbf16>
    tpu.vector_store %arg7[%c20_57, %c0_58], %87 {strides = array<i32>} : memref<120x16xbf16, #tpu.memory_space<vmem>>, vector<80x16xbf16>,
    %cst_59 = arith.constant 0.000000e+00 : f32
    %89 = vector.broadcast %cst_59 : f32 to vector<80x16xf32>
    %c9_60 = arith.constant 9 : index
    %c0_61 = arith.constant 0 : index
    %90 = vector.load %arg7[%c9_60, %c0_61] : memref<120x16xbf16, #tpu.memory_space<vmem>>, vector<80x16xbf16>
    %c0_62 = arith.constant 0 : index
    %c0_63 = arith.constant 0 : index
    %c0_64 = arith.constant 0 : index
    %91 = vector.load %arg4[%c0_62, %c0_63, %c0_64] : memref<9x16x16xbf16, #tpu.memory_space<vmem>>, vector<1x16x16xbf16>
    %92 = vector.shape_cast %91 : vector<1x16x16xbf16> to vector<16x16xbf16>
    %cst_65 = arith.constant dense<0.000000e+00> : vector<80x16xf32>
    %93 = tpu.matmul %90, %92, %cst_65 {dimension_numbers = #tpu.dot_dimension_numbers<[1], [0], [0], [1], [0, 0, 1, 1], [], []>} : vector<80x16xbf16>, vector<16x16xbf16>, vector<80x16xf32> -> vector<80x16xf32>
    %94 = arith.addf %89, %93 : vector<80x16xf32>
    %c10_66 = arith.constant 10 : index
    %c0_67 = arith.constant 0 : index
    %95 = vector.load %arg7[%c10_66, %c0_67] : memref<120x16xbf16, #tpu.memory_space<vmem>>, vector<80x16xbf16>
    %c1_68 = arith.constant 1 : index
    %c0_69 = arith.constant 0 : index
    %c0_70 = arith.constant 0 : index
    %96 = vector.load %arg4[%c1_68, %c0_69, %c0_70] : memref<9x16x16xbf16, #tpu.memory_space<vmem>>, vector<1x16x16xbf16>
    %97 = vector.shape_cast %96 : vector<1x16x16xbf16> to vector<16x16xbf16>
    %cst_71 = arith.constant dense<0.000000e+00> : vector<80x16xf32>
    %98 = tpu.matmul %95, %97, %cst_71 {dimension_numbers = #tpu.dot_dimension_numbers<[1], [0], [0], [1], [0, 0, 1, 1], [], []>} : vector<80x16xbf16>, vector<16x16xbf16>, vector<80x16xf32> -> vector<80x16xf32>
    %99 = arith.addf %94, %98 : vector<80x16xf32>
    %c11_72 = arith.constant 11 : index
    %c0_73 = arith.constant 0 : index
    %100 = vector.load %arg7[%c11_72, %c0_73] : memref<120x16xbf16, #tpu.memory_space<vmem>>, vector<80x16xbf16>
    %c2_74 = arith.constant 2 : index
    %c0_75 = arith.constant 0 : index
    %c0_76 = arith.constant 0 : index
    %101 = vector.load %arg4[%c2_74, %c0_75, %c0_76] : memref<9x16x16xbf16, #tpu.memory_space<vmem>>, vector<1x16x16xbf16>
    %102 = vector.shape_cast %101 : vector<1x16x16xbf16> to vector<16x16xbf16>
    %cst_77 = arith.constant dense<0.000000e+00> : vector<80x16xf32>
    %103 = tpu.matmul %100, %102, %cst_77 {dimension_numbers = #tpu.dot_dimension_numbers<[1], [0], [0], [1], [0, 0, 1, 1], [], []>} : vector<80x16xbf16>, vector<16x16xbf16>, vector<80x16xf32> -> vector<80x16xf32>
    %104 = arith.addf %99, %103 : vector<80x16xf32>
    %c19_78 = arith.constant 19 : index
    %c0_79 = arith.constant 0 : index
    %105 = vector.load %arg7[%c19_78, %c0_79] : memref<120x16xbf16, #tpu.memory_space<vmem>>, vector<80x16xbf16>
    %c3_80 = arith.constant 3 : index
    %c0_81 = arith.constant 0 : index
    %c0_82 = arith.constant 0 : index
    %106 = vector.load %arg4[%c3_80, %c0_81, %c0_82] : memref<9x16x16xbf16, #tpu.memory_space<vmem>>, vector<1x16x16xbf16>
    %107 = vector.shape_cast %106 : vector<1x16x16xbf16> to vector<16x16xbf16>
    %cst_83 = arith.constant dense<0.000000e+00> : vector<80x16xf32>
    %108 = tpu.matmul %105, %107, %cst_83 {dimension_numbers = #tpu.dot_dimension_numbers<[1], [0], [0], [1], [0, 0, 1, 1], [], []>} : vector<80x16xbf16>, vector<16x16xbf16>, vector<80x16xf32> -> vector<80x16xf32>
    %109 = arith.addf %104, %108 : vector<80x16xf32>
    %c20_84 = arith.constant 20 : index
    %c0_85 = arith.constant 0 : index
    %110 = vector.load %arg7[%c20_84, %c0_85] : memref<120x16xbf16, #tpu.memory_space<vmem>>, vector<80x16xbf16>
    %c4_86 = arith.constant 4 : index
    %c0_87 = arith.constant 0 : index
    %c0_88 = arith.constant 0 : index
    %111 = vector.load %arg4[%c4_86, %c0_87, %c0_88] : memref<9x16x16xbf16, #tpu.memory_space<vmem>>, vector<1x16x16xbf16>
    %112 = vector.shape_cast %111 : vector<1x16x16xbf16> to vector<16x16xbf16>
    %cst_89 = arith.constant dense<0.000000e+00> : vector<80x16xf32>
    %113 = tpu.matmul %110, %112, %cst_89 {dimension_numbers = #tpu.dot_dimension_numbers<[1], [0], [0], [1], [0, 0, 1, 1], [], []>} : vector<80x16xbf16>, vector<16x16xbf16>, vector<80x16xf32> -> vector<80x16xf32>
    %114 = arith.addf %109, %113 : vector<80x16xf32>
    %c21_90 = arith.constant 21 : index
    %c0_91 = arith.constant 0 : index
    %115 = vector.load %arg7[%c21_90, %c0_91] : memref<120x16xbf16, #tpu.memory_space<vmem>>, vector<80x16xbf16>
    %c5_92 = arith.constant 5 : index
    %c0_93 = arith.constant 0 : index
    %c0_94 = arith.constant 0 : index
    %116 = vector.load %arg4[%c5_92, %c0_93, %c0_94] : memref<9x16x16xbf16, #tpu.memory_space<vmem>>, vector<1x16x16xbf16>
    %117 = vector.shape_cast %116 : vector<1x16x16xbf16> to vector<16x16xbf16>
    %cst_95 = arith.constant dense<0.000000e+00> : vector<80x16xf32>
    %118 = tpu.matmul %115, %117, %cst_95 {dimension_numbers = #tpu.dot_dimension_numbers<[1], [0], [0], [1], [0, 0, 1, 1], [], []>} : vector<80x16xbf16>, vector<16x16xbf16>, vector<80x16xf32> -> vector<80x16xf32>
    %119 = arith.addf %114, %118 : vector<80x16xf32>
    %c29_96 = arith.constant 29 : index
    %c0_97 = arith.constant 0 : index
    %120 = vector.load %arg7[%c29_96, %c0_97] : memref<120x16xbf16, #tpu.memory_space<vmem>>, vector<80x16xbf16>
    %c6_98 = arith.constant 6 : index
    %c0_99 = arith.constant 0 : index
    %c0_100 = arith.constant 0 : index
    %121 = vector.load %arg4[%c6_98, %c0_99, %c0_100] : memref<9x16x16xbf16, #tpu.memory_space<vmem>>, vector<1x16x16xbf16>
    %122 = vector.shape_cast %121 : vector<1x16x16xbf16> to vector<16x16xbf16>
    %cst_101 = arith.constant dense<0.000000e+00> : vector<80x16xf32>
    %123 = tpu.matmul %120, %122, %cst_101 {dimension_numbers = #tpu.dot_dimension_numbers<[1], [0], [0], [1], [0, 0, 1, 1], [], []>} : vector<80x16xbf16>, vector<16x16xbf16>, vector<80x16xf32> -> vector<80x16xf32>
    %124 = arith.addf %119, %123 : vector<80x16xf32>
    %c30_102 = arith.constant 30 : index
    %c0_103 = arith.constant 0 : index
    %125 = vector.load %arg7[%c30_102, %c0_103] : memref<120x16xbf16, #tpu.memory_space<vmem>>, vector<80x16xbf16>
    %c7_104 = arith.constant 7 : index
    %c0_105 = arith.constant 0 : index
    %c0_106 = arith.constant 0 : index
    %126 = vector.load %arg4[%c7_104, %c0_105, %c0_106] : memref<9x16x16xbf16, #tpu.memory_space<vmem>>, vector<1x16x16xbf16>
    %127 = vector.shape_cast %126 : vector<1x16x16xbf16> to vector<16x16xbf16>
    %cst_107 = arith.constant dense<0.000000e+00> : vector<80x16xf32>
    %128 = tpu.matmul %125, %127, %cst_107 {dimension_numbers = #tpu.dot_dimension_numbers<[1], [0], [0], [1], [0, 0, 1, 1], [], []>} : vector<80x16xbf16>, vector<16x16xbf16>, vector<80x16xf32> -> vector<80x16xf32>
    %129 = arith.addf %124, %128 : vector<80x16xf32>
    %c31_108 = arith.constant 31 : index
    %c0_109 = arith.constant 0 : index
    %130 = vector.load %arg7[%c31_108, %c0_109] : memref<120x16xbf16, #tpu.memory_space<vmem>>, vector<80x16xbf16>
    %c8_110 = arith.constant 8 : index
    %c0_111 = arith.constant 0 : index
    %c0_112 = arith.constant 0 : index
    %131 = vector.load %arg4[%c8_110, %c0_111, %c0_112] : memref<9x16x16xbf16, #tpu.memory_space<vmem>>, vector<1x16x16xbf16>
    %132 = vector.shape_cast %131 : vector<1x16x16xbf16> to vector<16x16xbf16>
    %cst_113 = arith.constant dense<0.000000e+00> : vector<80x16xf32>
    %133 = tpu.matmul %130, %132, %cst_113 {dimension_numbers = #tpu.dot_dimension_numbers<[1], [0], [0], [1], [0, 0, 1, 1], [], []>} : vector<80x16xbf16>, vector<16x16xbf16>, vector<80x16xf32> -> vector<80x16xf32>
    %134 = arith.addf %129, %133 : vector<80x16xf32>
    %c0_114 = arith.constant 0 : index
    %c0_115 = arith.constant 0 : index
    %135 = vector.load %arg5[%c0_114, %c0_115] : memref<1x16xf32, #tpu.memory_space<vmem>>, vector<1x16xf32>
    %136 = vector.broadcast %135 : vector<1x16xf32> to vector<80x16xf32>
    %137 = arith.addf %134, %136 : vector<80x16xf32>
    %cst_116 = arith.constant 0.000000e+00 : f32
    %138 = vector.broadcast %cst_116 : f32 to vector<80x16xf32>
    %139 = arith.maximumf %137, %138 : vector<80x16xf32>
    %140 = vector.shape_cast %139 : vector<80x16xf32> to vector<10x128xf32>
    %c0_117 = arith.constant 0 : index
    %c0_118 = arith.constant 0 : index
    %c0_119 = arith.constant 0 : index
    %141 = vector.load %arg6[%c0_117, %c0_118, %c0_119] : memref<1x10x128xf32, #tpu.memory_space<vmem>>, vector<1x10x128xf32>
    %142 = vector.shape_cast %141 : vector<1x10x128xf32> to vector<10x128xf32>
    %143 = vector.shape_cast %140 : vector<10x128xf32> to vector<1x10x128xf32>
    tpu.vector_store %arg6[%c0_117, %c0_118, %c0_119], %143 {strides = array<i32>} : memref<1x10x128xf32, #tpu.memory_space<vmem>>, vector<1x10x128xf32>,
    return
  }
  func.func @transform_0(%arg0: i32) -> (i32, i32, i32) {
    %c0_i32 = arith.constant 0 : i32
    %c0_i32_0 = arith.constant 0 : i32
    %c0_i32_1 = arith.constant 0 : i32
    return %arg0, %c0_i32, %c0_i32_0 : i32, i32, i32
  }
  func.func @transform_1(%arg0: i32) -> (i32, i32, i32) {
    %c0_i32 = arith.constant 0 : i32
    %c0_i32_0 = arith.constant 0 : i32
    %c0_i32_1 = arith.constant 0 : i32
    %c0_i32_2 = arith.constant 0 : i32
    return %c0_i32, %c0_i32_0, %c0_i32_1 : i32, i32, i32
  }
  func.func @transform_2(%arg0: i32) -> (i32, i32) {
    %c0_i32 = arith.constant 0 : i32
    %c0_i32_0 = arith.constant 0 : i32
    %c0_i32_1 = arith.constant 0 : i32
    return %c0_i32, %c0_i32_0 : i32, i32
  }
  func.func @transform_3(%arg0: i32) -> (i32, i32, i32) {
    %c0_i32 = arith.constant 0 : i32
    %c0_i32_0 = arith.constant 0 : i32
    %c0_i32_1 = arith.constant 0 : i32
    %c0_i32_2 = arith.constant 0 : i32
    return %c0_i32, %c0_i32_0, %c0_i32_1 : i32, i32, i32
  }
  func.func @transform_4(%arg0: i32) -> (i32, i32) {
    %c0_i32 = arith.constant 0 : i32
    %c0_i32_0 = arith.constant 0 : i32
    %c0_i32_1 = arith.constant 0 : i32
    return %c0_i32, %c0_i32_0 : i32, i32
  }
  func.func @transform_5(%arg0: i32) -> (i32, i32, i32) {
    %c0_i32 = arith.constant 0 : i32
    %c0_i32_0 = arith.constant 0 : i32
    %c0_i32_1 = arith.constant 0 : i32
    return %arg0, %c0_i32, %c0_i32_0 : i32, i32, i32
  }
}

module attributes {stable_mosaic.version = 11 : i64} {
  func.func @unet_conv3_kernel(%arg0: i32, %arg1: memref<1x120x8xbf16, #tpu.memory_space<vmem>>, %arg2: memref<9x8x16xbf16, #tpu.memory_space<vmem>>, %arg3: memref<1x16xf32, #tpu.memory_space<vmem>>, %arg4: memref<9x16x16xbf16, #tpu.memory_space<vmem>>, %arg5: memref<1x16xf32, #tpu.memory_space<vmem>>, %arg6: memref<1x80x16xf32, #tpu.memory_space<vmem>>, %arg7: memref<120x16xbf16, #tpu.memory_space<vmem>>) attributes {dimension_semantics = [#tpu.dimension_semantics<parallel>], iteration_bounds = array<i64: 8>, scalar_prefetch = 0 : i64, scratch_operands = 1 : i64, tpu.core_type = #tpu.core_type<tc>, window_params = [{transform_indices = @transform_0, window_bounds = array<i64: 1, 120, 8>}, {pipeline_mode = #tpu.pipeline_mode<synchronous>, transform_indices = @transform_1, window_bounds = array<i64: 9, 8, 16>}, {pipeline_mode = #tpu.pipeline_mode<synchronous>, transform_indices = @transform_2, window_bounds = array<i64: 1, 16>}, {pipeline_mode = #tpu.pipeline_mode<synchronous>, transform_indices = @transform_3, window_bounds = array<i64: 9, 16, 16>}, {pipeline_mode = #tpu.pipeline_mode<synchronous>, transform_indices = @transform_4, window_bounds = array<i64: 1, 16>}, {transform_indices = @transform_5, window_bounds = array<i64: 1, 80, 16>}]} {
    %cst = arith.constant 0.000000e+00 : bf16
    %0 = vector.broadcast %cst : bf16 to vector<20x16xbf16>
    %c0 = arith.constant 0 : index
    %c0_0 = arith.constant 0 : index
    %1 = vector.load %arg7[%c0, %c0_0] : memref<120x16xbf16, #tpu.memory_space<vmem>>, vector<20x16xbf16>
    tpu.vector_store %arg7[%c0, %c0_0], %0 {strides = array<i32>} : memref<120x16xbf16, #tpu.memory_space<vmem>>, vector<20x16xbf16>,
    %c100 = arith.constant 100 : index
    %c0_1 = arith.constant 0 : index
    %2 = vector.load %arg7[%c100, %c0_1] : memref<120x16xbf16, #tpu.memory_space<vmem>>, vector<20x16xbf16>
    tpu.vector_store %arg7[%c100, %c0_1], %0 {strides = array<i32>} : memref<120x16xbf16, #tpu.memory_space<vmem>>, vector<20x16xbf16>,
    %3 = tpu.iota {dimensions = array<i32: 0>} : vector<80x16xi32>
    %c10_i32 = arith.constant 10 : i32
    %c0_i32 = arith.constant 0 : i32
    %4 = arith.cmpi eq, %c10_i32, %c0_i32 : i32
    %c1_i32 = arith.constant 1 : i32
    %5 = arith.select %4, %c1_i32, %c10_i32 : i32
    %6 = vector.broadcast %5 : i32 to vector<80x16xi32>
    %7 = arith.remsi %3, %6 : vector<80x16xi32>
    %c0_i32_2 = arith.constant 0 : i32
    %8 = vector.broadcast %c0_i32_2 : i32 to vector<80x16xi32>
    %9 = arith.cmpi ne, %7, %8 : vector<80x16xi32>
    %c0_i32_3 = arith.constant 0 : i32
    %10 = vector.broadcast %c0_i32_3 : i32 to vector<80x16xi32>
    %11 = arith.cmpi slt, %7, %10 : vector<80x16xi32>
    %c0_i32_4 = arith.constant 0 : i32
    %12 = arith.cmpi slt, %5, %c0_i32_4 : i32
    %13 = vector.broadcast %12 : i1 to vector<80x16xi1>
    %14 = vector.broadcast %13 : vector<80x16xi1> to vector<80x16xi1>
    %15 = arith.xori %11, %14 : vector<80x16xi1>
    %16 = arith.andi %15, %9 : vector<80x16xi1>
    %17 = vector.broadcast %5 : i32 to vector<80x16xi32>
    %18 = arith.addi %7, %17 : vector<80x16xi32>
    %19 = arith.select %16, %18, %7 : vector<80x16xi1>, vector<80x16xi32>
    %c1_i32_5 = arith.constant 1 : i32
    %20 = vector.broadcast %c1_i32_5 : i32 to vector<80x16xi32>
    %21 = arith.cmpi sge, %19, %20 : vector<80x16xi32>
    %c8_i32 = arith.constant 8 : i32
    %22 = vector.broadcast %c8_i32 : i32 to vector<80x16xi32>
    %23 = arith.cmpi sle, %19, %22 : vector<80x16xi32>
    %24 = arith.andi %21, %23 : vector<80x16xi1>
    %cst_6 = arith.constant 0.000000e+00 : f32
    %25 = vector.broadcast %cst_6 : f32 to vector<80x16xf32>
    %c0_7 = arith.constant 0 : index
    %c9 = arith.constant 9 : index
    %c0_8 = arith.constant 0 : index
    %26 = vector.load %arg1[%c0_7, %c9, %c0_8] : memref<1x120x8xbf16, #tpu.memory_space<vmem>>, vector<1x80x8xbf16>
    %27 = vector.shape_cast %26 : vector<1x80x8xbf16> to vector<80x8xbf16>
    %c0_9 = arith.constant 0 : index
    %c0_10 = arith.constant 0 : index
    %c0_11 = arith.constant 0 : index
    %28 = vector.load %arg2[%c0_9, %c0_10, %c0_11] : memref<9x8x16xbf16, #tpu.memory_space<vmem>>, vector<1x8x16xbf16>
    %29 = vector.shape_cast %28 : vector<1x8x16xbf16> to vector<8x16xbf16>
    %cst_12 = arith.constant dense<0.000000e+00> : vector<80x16xf32>
    %30 = tpu.matmul %27, %29, %cst_12 {dimension_numbers = #tpu.dot_dimension_numbers<[1], [0], [0], [1], [0, 0, 1, 1], [], []>} : vector<80x8xbf16>, vector<8x16xbf16>, vector<80x16xf32> -> vector<80x16xf32>
    %31 = arith.addf %25, %30 : vector<80x16xf32>
    %c0_13 = arith.constant 0 : index
    %c10 = arith.constant 10 : index
    %c0_14 = arith.constant 0 : index
    %32 = vector.load %arg1[%c0_13, %c10, %c0_14] : memref<1x120x8xbf16, #tpu.memory_space<vmem>>, vector<1x80x8xbf16>
    %33 = vector.shape_cast %32 : vector<1x80x8xbf16> to vector<80x8xbf16>
    %c1 = arith.constant 1 : index
    %c0_15 = arith.constant 0 : index
    %c0_16 = arith.constant 0 : index
    %34 = vector.load %arg2[%c1, %c0_15, %c0_16] : memref<9x8x16xbf16, #tpu.memory_space<vmem>>, vector<1x8x16xbf16>
    %35 = vector.shape_cast %34 : vector<1x8x16xbf16> to vector<8x16xbf16>
    %cst_17 = arith.constant dense<0.000000e+00> : vector<80x16xf32>
    %36 = tpu.matmul %33, %35, %cst_17 {dimension_numbers = #tpu.dot_dimension_numbers<[1], [0], [0], [1], [0, 0, 1, 1], [], []>} : vector<80x8xbf16>, vector<8x16xbf16>, vector<80x16xf32> -> vector<80x16xf32>
    %37 = arith.addf %31, %36 : vector<80x16xf32>
    %c0_18 = arith.constant 0 : index
    %c11 = arith.constant 11 : index
    %c0_19 = arith.constant 0 : index
    %38 = vector.load %arg1[%c0_18, %c11, %c0_19] : memref<1x120x8xbf16, #tpu.memory_space<vmem>>, vector<1x80x8xbf16>
    %39 = vector.shape_cast %38 : vector<1x80x8xbf16> to vector<80x8xbf16>
    %c2 = arith.constant 2 : index
    %c0_20 = arith.constant 0 : index
    %c0_21 = arith.constant 0 : index
    %40 = vector.load %arg2[%c2, %c0_20, %c0_21] : memref<9x8x16xbf16, #tpu.memory_space<vmem>>, vector<1x8x16xbf16>
    %41 = vector.shape_cast %40 : vector<1x8x16xbf16> to vector<8x16xbf16>
    %cst_22 = arith.constant dense<0.000000e+00> : vector<80x16xf32>
    %42 = tpu.matmul %39, %41, %cst_22 {dimension_numbers = #tpu.dot_dimension_numbers<[1], [0], [0], [1], [0, 0, 1, 1], [], []>} : vector<80x8xbf16>, vector<8x16xbf16>, vector<80x16xf32> -> vector<80x16xf32>
    %43 = arith.addf %37, %42 : vector<80x16xf32>
    %c0_23 = arith.constant 0 : index
    %c19 = arith.constant 19 : index
    %c0_24 = arith.constant 0 : index
    %44 = vector.load %arg1[%c0_23, %c19, %c0_24] : memref<1x120x8xbf16, #tpu.memory_space<vmem>>, vector<1x80x8xbf16>
    %45 = vector.shape_cast %44 : vector<1x80x8xbf16> to vector<80x8xbf16>
    %c3 = arith.constant 3 : index
    %c0_25 = arith.constant 0 : index
    %c0_26 = arith.constant 0 : index
    %46 = vector.load %arg2[%c3, %c0_25, %c0_26] : memref<9x8x16xbf16, #tpu.memory_space<vmem>>, vector<1x8x16xbf16>
    %47 = vector.shape_cast %46 : vector<1x8x16xbf16> to vector<8x16xbf16>
    %cst_27 = arith.constant dense<0.000000e+00> : vector<80x16xf32>
    %48 = tpu.matmul %45, %47, %cst_27 {dimension_numbers = #tpu.dot_dimension_numbers<[1], [0], [0], [1], [0, 0, 1, 1], [], []>} : vector<80x8xbf16>, vector<8x16xbf16>, vector<80x16xf32> -> vector<80x16xf32>
    %49 = arith.addf %43, %48 : vector<80x16xf32>
    %c0_28 = arith.constant 0 : index
    %c20 = arith.constant 20 : index
    %c0_29 = arith.constant 0 : index
    %50 = vector.load %arg1[%c0_28, %c20, %c0_29] : memref<1x120x8xbf16, #tpu.memory_space<vmem>>, vector<1x80x8xbf16>
    %51 = vector.shape_cast %50 : vector<1x80x8xbf16> to vector<80x8xbf16>
    %c4 = arith.constant 4 : index
    %c0_30 = arith.constant 0 : index
    %c0_31 = arith.constant 0 : index
    %52 = vector.load %arg2[%c4, %c0_30, %c0_31] : memref<9x8x16xbf16, #tpu.memory_space<vmem>>, vector<1x8x16xbf16>
    %53 = vector.shape_cast %52 : vector<1x8x16xbf16> to vector<8x16xbf16>
    %cst_32 = arith.constant dense<0.000000e+00> : vector<80x16xf32>
    %54 = tpu.matmul %51, %53, %cst_32 {dimension_numbers = #tpu.dot_dimension_numbers<[1], [0], [0], [1], [0, 0, 1, 1], [], []>} : vector<80x8xbf16>, vector<8x16xbf16>, vector<80x16xf32> -> vector<80x16xf32>
    %55 = arith.addf %49, %54 : vector<80x16xf32>
    %c0_33 = arith.constant 0 : index
    %c21 = arith.constant 21 : index
    %c0_34 = arith.constant 0 : index
    %56 = vector.load %arg1[%c0_33, %c21, %c0_34] : memref<1x120x8xbf16, #tpu.memory_space<vmem>>, vector<1x80x8xbf16>
    %57 = vector.shape_cast %56 : vector<1x80x8xbf16> to vector<80x8xbf16>
    %c5 = arith.constant 5 : index
    %c0_35 = arith.constant 0 : index
    %c0_36 = arith.constant 0 : index
    %58 = vector.load %arg2[%c5, %c0_35, %c0_36] : memref<9x8x16xbf16, #tpu.memory_space<vmem>>, vector<1x8x16xbf16>
    %59 = vector.shape_cast %58 : vector<1x8x16xbf16> to vector<8x16xbf16>
    %cst_37 = arith.constant dense<0.000000e+00> : vector<80x16xf32>
    %60 = tpu.matmul %57, %59, %cst_37 {dimension_numbers = #tpu.dot_dimension_numbers<[1], [0], [0], [1], [0, 0, 1, 1], [], []>} : vector<80x8xbf16>, vector<8x16xbf16>, vector<80x16xf32> -> vector<80x16xf32>
    %61 = arith.addf %55, %60 : vector<80x16xf32>
    %c0_38 = arith.constant 0 : index
    %c29 = arith.constant 29 : index
    %c0_39 = arith.constant 0 : index
    %62 = vector.load %arg1[%c0_38, %c29, %c0_39] : memref<1x120x8xbf16, #tpu.memory_space<vmem>>, vector<1x80x8xbf16>
    %63 = vector.shape_cast %62 : vector<1x80x8xbf16> to vector<80x8xbf16>
    %c6 = arith.constant 6 : index
    %c0_40 = arith.constant 0 : index
    %c0_41 = arith.constant 0 : index
    %64 = vector.load %arg2[%c6, %c0_40, %c0_41] : memref<9x8x16xbf16, #tpu.memory_space<vmem>>, vector<1x8x16xbf16>
    %65 = vector.shape_cast %64 : vector<1x8x16xbf16> to vector<8x16xbf16>
    %cst_42 = arith.constant dense<0.000000e+00> : vector<80x16xf32>
    %66 = tpu.matmul %63, %65, %cst_42 {dimension_numbers = #tpu.dot_dimension_numbers<[1], [0], [0], [1], [0, 0, 1, 1], [], []>} : vector<80x8xbf16>, vector<8x16xbf16>, vector<80x16xf32> -> vector<80x16xf32>
    %67 = arith.addf %61, %66 : vector<80x16xf32>
    %c0_43 = arith.constant 0 : index
    %c30 = arith.constant 30 : index
    %c0_44 = arith.constant 0 : index
    %68 = vector.load %arg1[%c0_43, %c30, %c0_44] : memref<1x120x8xbf16, #tpu.memory_space<vmem>>, vector<1x80x8xbf16>
    %69 = vector.shape_cast %68 : vector<1x80x8xbf16> to vector<80x8xbf16>
    %c7 = arith.constant 7 : index
    %c0_45 = arith.constant 0 : index
    %c0_46 = arith.constant 0 : index
    %70 = vector.load %arg2[%c7, %c0_45, %c0_46] : memref<9x8x16xbf16, #tpu.memory_space<vmem>>, vector<1x8x16xbf16>
    %71 = vector.shape_cast %70 : vector<1x8x16xbf16> to vector<8x16xbf16>
    %cst_47 = arith.constant dense<0.000000e+00> : vector<80x16xf32>
    %72 = tpu.matmul %69, %71, %cst_47 {dimension_numbers = #tpu.dot_dimension_numbers<[1], [0], [0], [1], [0, 0, 1, 1], [], []>} : vector<80x8xbf16>, vector<8x16xbf16>, vector<80x16xf32> -> vector<80x16xf32>
    %73 = arith.addf %67, %72 : vector<80x16xf32>
    %c0_48 = arith.constant 0 : index
    %c31 = arith.constant 31 : index
    %c0_49 = arith.constant 0 : index
    %74 = vector.load %arg1[%c0_48, %c31, %c0_49] : memref<1x120x8xbf16, #tpu.memory_space<vmem>>, vector<1x80x8xbf16>
    %75 = vector.shape_cast %74 : vector<1x80x8xbf16> to vector<80x8xbf16>
    %c8 = arith.constant 8 : index
    %c0_50 = arith.constant 0 : index
    %c0_51 = arith.constant 0 : index
    %76 = vector.load %arg2[%c8, %c0_50, %c0_51] : memref<9x8x16xbf16, #tpu.memory_space<vmem>>, vector<1x8x16xbf16>
    %77 = vector.shape_cast %76 : vector<1x8x16xbf16> to vector<8x16xbf16>
    %cst_52 = arith.constant dense<0.000000e+00> : vector<80x16xf32>
    %78 = tpu.matmul %75, %77, %cst_52 {dimension_numbers = #tpu.dot_dimension_numbers<[1], [0], [0], [1], [0, 0, 1, 1], [], []>} : vector<80x8xbf16>, vector<8x16xbf16>, vector<80x16xf32> -> vector<80x16xf32>
    %79 = arith.addf %73, %78 : vector<80x16xf32>
    %c0_53 = arith.constant 0 : index
    %c0_54 = arith.constant 0 : index
    %80 = vector.load %arg3[%c0_53, %c0_54] : memref<1x16xf32, #tpu.memory_space<vmem>>, vector<1x16xf32>
    %81 = vector.broadcast %80 : vector<1x16xf32> to vector<80x16xf32>
    %82 = arith.addf %79, %81 : vector<80x16xf32>
    %cst_55 = arith.constant 0.000000e+00 : f32
    %83 = vector.broadcast %cst_55 : f32 to vector<80x16xf32>
    %84 = arith.maximumf %82, %83 : vector<80x16xf32>
    %cst_56 = arith.constant 0.000000e+00 : f32
    %85 = vector.broadcast %cst_56 : f32 to vector<80x16xf32>
    %86 = arith.select %24, %84, %85 : vector<80x16xi1>, vector<80x16xf32>
    %87 = arith.truncf %86 : vector<80x16xf32> to vector<80x16xbf16>
    %c20_57 = arith.constant 20 : index
    %c0_58 = arith.constant 0 : index
    %88 = vector.load %arg7[%c20_57, %c0_58] : memref<120x16xbf16, #tpu.memory_space<vmem>>, vector<80x16xbf16>
    tpu.vector_store %arg7[%c20_57, %c0_58], %87 {strides = array<i32>} : memref<120x16xbf16, #tpu.memory_space<vmem>>, vector<80x16xbf16>,
    %cst_59 = arith.constant 0.000000e+00 : f32
    %89 = vector.broadcast %cst_59 : f32 to vector<80x16xf32>
    %c9_60 = arith.constant 9 : index
    %c0_61 = arith.constant 0 : index
    %90 = vector.load %arg7[%c9_60, %c0_61] : memref<120x16xbf16, #tpu.memory_space<vmem>>, vector<80x16xbf16>
    %c0_62 = arith.constant 0 : index
    %c0_63 = arith.constant 0 : index
    %c0_64 = arith.constant 0 : index
    %91 = vector.load %arg4[%c0_62, %c0_63, %c0_64] : memref<9x16x16xbf16, #tpu.memory_space<vmem>>, vector<1x16x16xbf16>
    %92 = vector.shape_cast %91 : vector<1x16x16xbf16> to vector<16x16xbf16>
    %cst_65 = arith.constant dense<0.000000e+00> : vector<80x16xf32>
    %93 = tpu.matmul %90, %92, %cst_65 {dimension_numbers = #tpu.dot_dimension_numbers<[1], [0], [0], [1], [0, 0, 1, 1], [], []>} : vector<80x16xbf16>, vector<16x16xbf16>, vector<80x16xf32> -> vector<80x16xf32>
    %94 = arith.addf %89, %93 : vector<80x16xf32>
    %c10_66 = arith.constant 10 : index
    %c0_67 = arith.constant 0 : index
    %95 = vector.load %arg7[%c10_66, %c0_67] : memref<120x16xbf16, #tpu.memory_space<vmem>>, vector<80x16xbf16>
    %c1_68 = arith.constant 1 : index
    %c0_69 = arith.constant 0 : index
    %c0_70 = arith.constant 0 : index
    %96 = vector.load %arg4[%c1_68, %c0_69, %c0_70] : memref<9x16x16xbf16, #tpu.memory_space<vmem>>, vector<1x16x16xbf16>
    %97 = vector.shape_cast %96 : vector<1x16x16xbf16> to vector<16x16xbf16>
    %cst_71 = arith.constant dense<0.000000e+00> : vector<80x16xf32>
    %98 = tpu.matmul %95, %97, %cst_71 {dimension_numbers = #tpu.dot_dimension_numbers<[1], [0], [0], [1], [0, 0, 1, 1], [], []>} : vector<80x16xbf16>, vector<16x16xbf16>, vector<80x16xf32> -> vector<80x16xf32>
    %99 = arith.addf %94, %98 : vector<80x16xf32>
    %c11_72 = arith.constant 11 : index
    %c0_73 = arith.constant 0 : index
    %100 = vector.load %arg7[%c11_72, %c0_73] : memref<120x16xbf16, #tpu.memory_space<vmem>>, vector<80x16xbf16>
    %c2_74 = arith.constant 2 : index
    %c0_75 = arith.constant 0 : index
    %c0_76 = arith.constant 0 : index
    %101 = vector.load %arg4[%c2_74, %c0_75, %c0_76] : memref<9x16x16xbf16, #tpu.memory_space<vmem>>, vector<1x16x16xbf16>
    %102 = vector.shape_cast %101 : vector<1x16x16xbf16> to vector<16x16xbf16>
    %cst_77 = arith.constant dense<0.000000e+00> : vector<80x16xf32>
    %103 = tpu.matmul %100, %102, %cst_77 {dimension_numbers = #tpu.dot_dimension_numbers<[1], [0], [0], [1], [0, 0, 1, 1], [], []>} : vector<80x16xbf16>, vector<16x16xbf16>, vector<80x16xf32> -> vector<80x16xf32>
    %104 = arith.addf %99, %103 : vector<80x16xf32>
    %c19_78 = arith.constant 19 : index
    %c0_79 = arith.constant 0 : index
    %105 = vector.load %arg7[%c19_78, %c0_79] : memref<120x16xbf16, #tpu.memory_space<vmem>>, vector<80x16xbf16>
    %c3_80 = arith.constant 3 : index
    %c0_81 = arith.constant 0 : index
    %c0_82 = arith.constant 0 : index
    %106 = vector.load %arg4[%c3_80, %c0_81, %c0_82] : memref<9x16x16xbf16, #tpu.memory_space<vmem>>, vector<1x16x16xbf16>
    %107 = vector.shape_cast %106 : vector<1x16x16xbf16> to vector<16x16xbf16>
    %cst_83 = arith.constant dense<0.000000e+00> : vector<80x16xf32>
    %108 = tpu.matmul %105, %107, %cst_83 {dimension_numbers = #tpu.dot_dimension_numbers<[1], [0], [0], [1], [0, 0, 1, 1], [], []>} : vector<80x16xbf16>, vector<16x16xbf16>, vector<80x16xf32> -> vector<80x16xf32>
    %109 = arith.addf %104, %108 : vector<80x16xf32>
    %c20_84 = arith.constant 20 : index
    %c0_85 = arith.constant 0 : index
    %110 = vector.load %arg7[%c20_84, %c0_85] : memref<120x16xbf16, #tpu.memory_space<vmem>>, vector<80x16xbf16>
    %c4_86 = arith.constant 4 : index
    %c0_87 = arith.constant 0 : index
    %c0_88 = arith.constant 0 : index
    %111 = vector.load %arg4[%c4_86, %c0_87, %c0_88] : memref<9x16x16xbf16, #tpu.memory_space<vmem>>, vector<1x16x16xbf16>
    %112 = vector.shape_cast %111 : vector<1x16x16xbf16> to vector<16x16xbf16>
    %cst_89 = arith.constant dense<0.000000e+00> : vector<80x16xf32>
    %113 = tpu.matmul %110, %112, %cst_89 {dimension_numbers = #tpu.dot_dimension_numbers<[1], [0], [0], [1], [0, 0, 1, 1], [], []>} : vector<80x16xbf16>, vector<16x16xbf16>, vector<80x16xf32> -> vector<80x16xf32>
    %114 = arith.addf %109, %113 : vector<80x16xf32>
    %c21_90 = arith.constant 21 : index
    %c0_91 = arith.constant 0 : index
    %115 = vector.load %arg7[%c21_90, %c0_91] : memref<120x16xbf16, #tpu.memory_space<vmem>>, vector<80x16xbf16>
    %c5_92 = arith.constant 5 : index
    %c0_93 = arith.constant 0 : index
    %c0_94 = arith.constant 0 : index
    %116 = vector.load %arg4[%c5_92, %c0_93, %c0_94] : memref<9x16x16xbf16, #tpu.memory_space<vmem>>, vector<1x16x16xbf16>
    %117 = vector.shape_cast %116 : vector<1x16x16xbf16> to vector<16x16xbf16>
    %cst_95 = arith.constant dense<0.000000e+00> : vector<80x16xf32>
    %118 = tpu.matmul %115, %117, %cst_95 {dimension_numbers = #tpu.dot_dimension_numbers<[1], [0], [0], [1], [0, 0, 1, 1], [], []>} : vector<80x16xbf16>, vector<16x16xbf16>, vector<80x16xf32> -> vector<80x16xf32>
    %119 = arith.addf %114, %118 : vector<80x16xf32>
    %c29_96 = arith.constant 29 : index
    %c0_97 = arith.constant 0 : index
    %120 = vector.load %arg7[%c29_96, %c0_97] : memref<120x16xbf16, #tpu.memory_space<vmem>>, vector<80x16xbf16>
    %c6_98 = arith.constant 6 : index
    %c0_99 = arith.constant 0 : index
    %c0_100 = arith.constant 0 : index
    %121 = vector.load %arg4[%c6_98, %c0_99, %c0_100] : memref<9x16x16xbf16, #tpu.memory_space<vmem>>, vector<1x16x16xbf16>
    %122 = vector.shape_cast %121 : vector<1x16x16xbf16> to vector<16x16xbf16>
    %cst_101 = arith.constant dense<0.000000e+00> : vector<80x16xf32>
    %123 = tpu.matmul %120, %122, %cst_101 {dimension_numbers = #tpu.dot_dimension_numbers<[1], [0], [0], [1], [0, 0, 1, 1], [], []>} : vector<80x16xbf16>, vector<16x16xbf16>, vector<80x16xf32> -> vector<80x16xf32>
    %124 = arith.addf %119, %123 : vector<80x16xf32>
    %c30_102 = arith.constant 30 : index
    %c0_103 = arith.constant 0 : index
    %125 = vector.load %arg7[%c30_102, %c0_103] : memref<120x16xbf16, #tpu.memory_space<vmem>>, vector<80x16xbf16>
    %c7_104 = arith.constant 7 : index
    %c0_105 = arith.constant 0 : index
    %c0_106 = arith.constant 0 : index
    %126 = vector.load %arg4[%c7_104, %c0_105, %c0_106] : memref<9x16x16xbf16, #tpu.memory_space<vmem>>, vector<1x16x16xbf16>
    %127 = vector.shape_cast %126 : vector<1x16x16xbf16> to vector<16x16xbf16>
    %cst_107 = arith.constant dense<0.000000e+00> : vector<80x16xf32>
    %128 = tpu.matmul %125, %127, %cst_107 {dimension_numbers = #tpu.dot_dimension_numbers<[1], [0], [0], [1], [0, 0, 1, 1], [], []>} : vector<80x16xbf16>, vector<16x16xbf16>, vector<80x16xf32> -> vector<80x16xf32>
    %129 = arith.addf %124, %128 : vector<80x16xf32>
    %c31_108 = arith.constant 31 : index
    %c0_109 = arith.constant 0 : index
    %130 = vector.load %arg7[%c31_108, %c0_109] : memref<120x16xbf16, #tpu.memory_space<vmem>>, vector<80x16xbf16>
    %c8_110 = arith.constant 8 : index
    %c0_111 = arith.constant 0 : index
    %c0_112 = arith.constant 0 : index
    %131 = vector.load %arg4[%c8_110, %c0_111, %c0_112] : memref<9x16x16xbf16, #tpu.memory_space<vmem>>, vector<1x16x16xbf16>
    %132 = vector.shape_cast %131 : vector<1x16x16xbf16> to vector<16x16xbf16>
    %cst_113 = arith.constant dense<0.000000e+00> : vector<80x16xf32>
    %133 = tpu.matmul %130, %132, %cst_113 {dimension_numbers = #tpu.dot_dimension_numbers<[1], [0], [0], [1], [0, 0, 1, 1], [], []>} : vector<80x16xbf16>, vector<16x16xbf16>, vector<80x16xf32> -> vector<80x16xf32>
    %134 = arith.addf %129, %133 : vector<80x16xf32>
    %c0_114 = arith.constant 0 : index
    %c0_115 = arith.constant 0 : index
    %135 = vector.load %arg5[%c0_114, %c0_115] : memref<1x16xf32, #tpu.memory_space<vmem>>, vector<1x16xf32>
    %136 = vector.broadcast %135 : vector<1x16xf32> to vector<80x16xf32>
    %137 = arith.addf %134, %136 : vector<80x16xf32>
    %cst_116 = arith.constant 0.000000e+00 : f32
    %138 = vector.broadcast %cst_116 : f32 to vector<80x16xf32>
    %139 = arith.maximumf %137, %138 : vector<80x16xf32>
    %c0_117 = arith.constant 0 : index
    %c0_118 = arith.constant 0 : index
    %c0_119 = arith.constant 0 : index
    %140 = vector.load %arg6[%c0_117, %c0_118, %c0_119] : memref<1x80x16xf32, #tpu.memory_space<vmem>>, vector<1x80x16xf32>
    %141 = vector.shape_cast %140 : vector<1x80x16xf32> to vector<80x16xf32>
    %142 = vector.shape_cast %139 : vector<80x16xf32> to vector<1x80x16xf32>
    tpu.vector_store %arg6[%c0_117, %c0_118, %c0_119], %142 {strides = array<i32>} : memref<1x80x16xf32, #tpu.memory_space<vmem>>, vector<1x80x16xf32>,
    return
  }
  func.func @transform_0(%arg0: i32) -> (i32, i32, i32) {
    %c0_i32 = arith.constant 0 : i32
    %c0_i32_0 = arith.constant 0 : i32
    %c0_i32_1 = arith.constant 0 : i32
    return %arg0, %c0_i32, %c0_i32_0 : i32, i32, i32
  }
  func.func @transform_1(%arg0: i32) -> (i32, i32, i32) {
    %c0_i32 = arith.constant 0 : i32
    %c0_i32_0 = arith.constant 0 : i32
    %c0_i32_1 = arith.constant 0 : i32
    %c0_i32_2 = arith.constant 0 : i32
    return %c0_i32, %c0_i32_0, %c0_i32_1 : i32, i32, i32
  }
  func.func @transform_2(%arg0: i32) -> (i32, i32) {
    %c0_i32 = arith.constant 0 : i32
    %c0_i32_0 = arith.constant 0 : i32
    %c0_i32_1 = arith.constant 0 : i32
    return %c0_i32, %c0_i32_0 : i32, i32
  }
  func.func @transform_3(%arg0: i32) -> (i32, i32, i32) {
    %c0_i32 = arith.constant 0 : i32
    %c0_i32_0 = arith.constant 0 : i32
    %c0_i32_1 = arith.constant 0 : i32
    %c0_i32_2 = arith.constant 0 : i32
    return %c0_i32, %c0_i32_0, %c0_i32_1 : i32, i32, i32
  }
  func.func @transform_4(%arg0: i32) -> (i32, i32) {
    %c0_i32 = arith.constant 0 : i32
    %c0_i32_0 = arith.constant 0 : i32
    %c0_i32_1 = arith.constant 0 : i32
    return %c0_i32, %c0_i32_0 : i32, i32
  }
  func.func @transform_5(%arg0: i32) -> (i32, i32, i32) {
    %c0_i32 = arith.constant 0 : i32
    %c0_i32_0 = arith.constant 0 : i32
    %c0_i32_1 = arith.constant 0 : i32
    return %arg0, %c0_i32, %c0_i32_0 : i32, i32, i32
  }
}

</mosaic_0001>

<bundles_post_ra>
// kernel: forward.1
= control target key start
LH: loop header
LB: loop body
LE: loop exit
PB: predicated region body
PF: predicated region fallthrough
CT: control target
= control target key end

     0   :  { %s4189_s18 = smov 0   ;;  %s5444_s0 = inlined_call_operand.vmem [shape: bf16[8,120,8], index: 0, kind: input, shape index: {}]   ;;  %s5445_s1 = inlined_call_operand.vmem [shape: bf16[9,8,16], index: 1, kind: input, shape index: {}]   ;;  %s5446_s2 = inlined_call_operand.vmem [shape: f32[1,16], index: 2, kind: input, shape index: {}]   ;;  %s5447_s3 = inlined_call_operand.vmem [shape: bf16[9,16,16], index: 3, kind: input, shape index: {}]   ;;  %s5448_s4 = inlined_call_operand.vmem [shape: f32[1,16], index: 4, kind: input, shape index: {}]   ;;  %s5449_s5 = inlined_call_operand.vmem [shape: f32[8,80,16], index: 5, kind: output, shape index: {}]  }
   0x1 LB: > { %s3353_s19 = sadd.s32 4294967295, %s4154_s18   ;;  %p3357_p0 = scmp.ge.s32.totalorder %s4154_s18, 1  ;;  %s4154_s18 = sphi %s4189_s18, %s15_s18  }
   0x2   : > { %p187_p1 = scmp.lt.s32.totalorder %s4154_s18, 9 }
   0x4   : > { %p188_p2 = pnand %p3357_p0, %p187_p1 }
   0x5   : > { %p215_p3 = scmp.lt.s32.totalorder (!%p188_p2), %s3353_s19, 7 }
   0x6   : > { %191 = sbr.rel (%p188_p2) target bundleno = 801 (0x321), region = 40 }
   0xb   : > { %v3360_v0 = vld [vmem:[%s5445_s1 + $0x4] sm:$0xf]  ;;  %vm507_vm0 = vcmask 1043456   ;;  %v4156_v1 = vmov 0.0   ;;  %vm5457_vm1 = vmmov 0   ;;  %s5544_s19 = smov (!%p215_p3, %s3353_s19), 7 }
   0xc   : > { %3663 = vmatprep.subr.bf16.mxu0 %v4156_v1  ;;  %v509_v2 = vsel %vm507_vm0, %v3360_v0, 0  ;;  %3665 = vmatprep.mubr.msk.bf16.mxu0 %vm5457_vm1, %v4156_v1  ;;  %v447_v3 = vld [vmem:[%s5445_s1] sm:$0xf]  ;;  %s4059_s24 = smul.u32 60, %s5544_s19  ;;  %v3378_v10 = vld [vmem:[%s5445_s1 + $0x8] sm:$0xf] }
   0xd   : > { %3664 = vmatpush3.bf16.msra.mxu0 %v509_v2  ;;  %3685 = vmatprep.subr.bf16.mxu1 %v4156_v1  ;;  %v648_v4 = vsel %vm507_vm0, %v447_v3, 0  ;;  %vm5459_vm2 = vcmask 1046528   ;;  %vm491_vm3 = vcmask 64512   ;;  %v779_v18 = vsel %vm507_vm0, %v3378_v10, 0  ;;  %v3385_v22 = vld [vmem:[%s5445_s1 + $0xc] sm:$0xf] }
   0xe   : > { %3707 = vmatprep.subr.bf16.mxu0 %v4156_v1  ;;  %3687 = vmatprep.mubr.msk.bf16.mxu1 %vm5457_vm1, %v4156_v1  ;;  %s4219_s27 = scalar_lea.vmem %s5444_s0, %s4059_s24  ;;  %vm5456_vm4 = vsmask.f32 7424  ;;  %v974_v27 = vsel %vm507_vm0, %v3385_v22, 0  ;;  %vm5454_vm5 = vsmask.f32 6400  ;;  %vm5453_vm6 = vcmask 1045504  }
   0xf   : > { %3686 = vmatpush3.bf16.msra.mxu1 %v648_v4  ;;  %v437_v5 = vld [vmem:[%s4219_s27 + $0x8] sm:$0xf]  ;;  %v448_v6 = vld [vmem:[%s4219_s27 + $0x4] sm:$0xe]  ;;  %v4224_v7 = vld [vmem:[%s4219_s27 + $0xc] sm:$0xff]   ;;  %vm5451_vm8 = vcmask 1044480  }
  0x10   : > { %3729 = vmatprep.subr.bf16.mxu1 %v4156_v1  ;;  %v436_v8 = vld [vmem:[%s4219_s27 + $0x4] sm:$0xf]  ;;  %v4227_v9 = vcombine.low %v448_v6, %v437_v5  ;;  %v481_v12 = vrot.slane %v4224_v7, 1  ;;  %v596_v13 = vshll.u32 %v4224_v7, 16  ;;  %v4236_v17 = vld [vmem:[%s4219_s27 + $0x14] sm:$0xff]   ;;  %v600_v25 = vshrl.u32 %v4224_v7, 16 }
  0x11   : > { %v3372_v11 = vcombine.low %v436_v8, %v437_v5  ;;  %v483_v24 = vrot.slane %v4236_v17, 1  ;;  %v604_v26 = vshll.u32 %v4236_v17, 16  ;;  %v4261_v32 = vld [vmem:[%s4219_s27 + $0x1c] sm:$0xff]   ;;  %v608_v35 = vshrl.u32 %v4236_v17, 16  ;;  %v4278_v40 = vld [vmem:[%s4219_s27 + $0x24] sm:$0xff]   ;;  %v4305_v55 = vld [vmem:[%s4219_s27 + $0x10] sm:$0xff]  }
  0x12   : > { %v480_v14 = vrot.slane %v4227_v9, 1  ;;  %v598_v21 = vrot.slane %v596_v13, 1  ;;  %v485_v34 = vrot.slane %v4261_v32, 1  ;;  %v612_v36 = vshll.u32 %v4261_v32, 16  ;;  %v864_v50 = vld [vmem:[%s4219_s27 + $0x8] sm:$0xe] }
  0x13   : > { %v589_v15 = vshrl.u32 %v3372_v11, 16  ;;  %v591_v16 = vshll.u32 %v3372_v11, 16  ;;  %v484_v29 = vsel %vm5459_vm2, %v481_v12, %v483_v24  ;;  %v606_v31 = vrot.slane %v604_v26, 1  ;;  %v4098_v45 = vld [vmem:[%s4219_s27 + $0x2c] ss:$0 sps:$4 sm:$0x11]  }
  0x14   : > { %v482_v19 = vsel %vm5459_vm2, %v480_v14, %v481_v12  ;;  %v602_v30 = vor.u32 %v600_v25, %v598_v21  ;;  %v486_v37 = vsel %vm5459_vm2, %v483_v24, %v485_v34  ;;  %v614_v39 = vrot.slane %v612_v36, 1  ;;  %v4298_v51 = vld [vmem:[%s4219_s27 + $0xc] sm:$0xf]  ;;  %v4324_v10 = vld [vmem:[%s4219_s27 + $0x18] sm:$0xff]   ;;  %s4060_s14 = smul.u32 80, %s5544_s19 }
  0x15   : > { %v593_v20 = vrot.slane %v591_v16, 1  ;;  %3666 = vmatmul.mubr.msk.bf16.vlgmr.msra.gmra.mxu0 %vm491_vm3, %v482_v19  ;;  %v610_v38 = vor.u32 %v608_v35, %v606_v31  ;;  %v487_v42 = vrot.slane %v4278_v40, 1  ;;  %v616_v43 = vshrl.u32 %v4261_v32, 16 }
  0x16   : > { %3708 = vmatpush3.bf16.msra.mxu0 %v779_v18  ;;  %3669 = vmatprep.mubr.msk.bf16.mxu0 %vm5457_vm1, %v4156_v1  ;;  %v607_v33 = vsel %vm5456_vm4, %v602_v30, %v606_v31  ;;  %v620_v44 = vshll.u32 %v4278_v40, 16  ;;  %v628_v49 = vshll.u32 %v4098_v45, 16  ;;  %v731_v52 = vshrl.u32 %v4227_v9, 16  ;;  %s5398_s21 = scalar_lea.vmem %s5449_s5, %s4060_s14 }
  0x17   : > { %v594_v23 = vor.u32 %v593_v20, %v589_v15  ;;  %3751 = vmatprep.subr.bf16.mxu0 %v4156_v1  ;;  %v615_v41 = vsel %vm5456_vm4, %v610_v38, %v614_v39  ;;  %v488_v46 = vsel %vm5459_vm2, %v485_v34, %v487_v42  ;;  %v618_v47 = vor.u32 %v616_v43, %v614_v39  ;;  %v3397_v15 = vld [vmem:[%s5445_s1 + $0x10] sm:$0xf] }
  0x18   : > { %v622_v48 = vrot.slane %v620_v44, 1  ;;  %v734_v53 = vshll.u32 %v4227_v9, 16  ;;  %v624_v54 = vshrl.u32 %v4278_v40, 16  ;;  %v489_v57 = vrot.slane %v4098_v45, 1 }
  0x19   : > { %v599_v28 = vsel %vm5456_vm4, %v594_v23, %v598_v21  ;;  %v3386_v58 = vcombine.low %v864_v50, %v4298_v51  ;;  %v739_v59 = vrot.slane %v596_v13, 2  ;;  %v738_v60 = vrot.slane %v600_v25, 1  ;;  %v3404_v25 = vld [vmem:[%s5445_s1 + $0x14] sm:$0xf] }
  0x1a   : > { %3688 = vmatmul.mubr.msk.bf16.vlgmr.msra.gmra.mxu1 %vm491_vm3, %v599_v28  ;;  %v623_v56 = vsel %vm5456_vm4, %v618_v47, %v622_v48  ;;  %v630_v61 = vrot.slane %v628_v49, 1  ;;  %v733_v62 = vrot.slane %v731_v52, 1  ;;  %v736_v63 = vrot.slane %v734_v53, 2 }
  0x1b   : > { %3691 = vmatprep.mubr.msk.bf16.mxu1 %vm5457_vm1, %v4156_v1  ;;  %3730 = vmatpush3.bf16.msra.mxu1 %v974_v27  ;;  %v626_v0 = vor.u32 %v624_v54, %v622_v48  ;;  %v914_v2 = vshrl.u32 %v4305_v55, 16  ;;  %v917_v3 = vshll.u32 %v4305_v55, 16  ;;  %v490_v4 = vsel %vm5459_vm2, %v487_v42, %v489_v57  ;;  %v4380_v42 = vld [vmem:[%s4219_s27 + $0x28] sm:$0xff]   ;;  %v4402_v57 = vld [vmem:[%s4219_s27 + $0x30] ss:$0 sps:$4 sm:$0x33]  }
  0x1c   : > { %3773 = vmatprep.subr.bf16.mxu1 %v4156_v1  ;;  %v906_v5 = vshrl.u32 %v3386_v58, 16  ;;  %v909_v6 = vshll.u32 %v3386_v58, 16  ;;  %v737_v8 = vor.u32 %v736_v63, %v733_v62  ;;  %v740_v9 = vor.u32 %v739_v59, %v738_v60 }
  0x1d   : > { %3670 = vmatmul.mubr.msk.bf16.gmra.mxu0 %vm491_vm3, %v484_v29  ;;  %v631_v7 = vsel %vm5456_vm4, %v626_v0, %v630_v61  ;;  %v916_v13 = vrot.slane %v914_v2, 1  ;;  %v919_v14 = vrot.slane %v917_v3, 2  ;;  %v742_v16 = vrot.slane %v608_v35, 1  ;;  %v4356_v29 = vld [vmem:[%s4219_s27 + $0x20] sm:$0xff]   ;;  %v1059_v0 = vld [vmem:[%s4219_s27 + $0x8] sm:$0xc] }
  0x1e   : > { %3673 = vmatprep.mubr.msk.bf16.mxu0 %vm5457_vm1, %v4156_v1  ;;  %v908_v11 = vrot.slane %v906_v5, 1  ;;  %v911_v12 = vrot.slane %v909_v6, 2  ;;  %v743_v18 = vrot.slane %v604_v26, 2  ;;  %v923_v19 = vshrl.u32 %v4324_v10, 16 }
  0x1f   : > { %v741_v20 = vsel %vm5454_vm5, %v737_v8, %v740_v9  ;;  %v920_v22 = vor.u32 %v919_v14, %v916_v13  ;;  %v926_v23 = vshll.u32 %v4324_v10, 16  ;;  %v1093_v24 = vsel %vm507_vm0, %v3397_v15, 0 }
  0x20   : > { %v912_v21 = vor.u32 %v911_v12, %v908_v11  ;;  %v744_v26 = vor.u32 %v743_v18, %v742_v16  ;;  %v925_v27 = vrot.slane %v923_v19, 1  ;;  %v1234_v30 = vsel %vm507_vm0, %v3404_v25, 0 }
  0x21   : > { %v928_v28 = vrot.slane %v926_v23, 2  ;;  %v746_v31 = vrot.slane %v616_v43, 1  ;;  %v935_v38 = vshll.u32 %v4356_v29, 16  ;;  %v750_v43 = vrot.slane %v624_v54, 1 }
  0x22   : > { %3692 = vmatmul.mubr.msk.bf16.gmra.mxu1 %vm491_vm3, %v607_v33  ;;  %v921_v17 = vsel %vm5454_vm5, %v912_v21, %v920_v22  ;;  %v747_v33 = vrot.slane %v612_v36, 2  ;;  %v745_v34 = vsel %vm5454_vm5, %v740_v9, %v744_v26  ;;  %v751_v45 = vrot.slane %v620_v44, 2 }
  0x23   : > { %3695 = vmatprep.mubr.msk.bf16.mxu1 %vm5457_vm1, %v4156_v1  ;;  %v929_v35 = vor.u32 %v928_v28, %v925_v27  ;;  %v941_v49 = vshrl.u32 %v4380_v42, 16  ;;  %v944_v50 = vshll.u32 %v4380_v42, 16  ;;  %v950_v62 = vshrl.u32 %v4402_v57, 16 }
  0x24   : > { %v748_v32 = vor.u32 %v747_v33, %v746_v31  ;;  %v752_v52 = vor.u32 %v751_v45, %v750_v43  ;;  %v953_v63 = vshll.u32 %v4402_v57, 16  ;;  %v1067_v14 = vrot.slane %v4305_v55, 2  ;;  %v3423_v55 = vld [vmem:[%s5445_s1 + $0x1c] sm:$0xf]  ;;  %v1320_v43 = vld [vmem:[%s4219_s27 + $0x10] sm:$0xf] }
  0x25   : > { %3674 = vmatmul.mubr.msk.bf16.gmra.mxu0 %vm491_vm3, %v486_v37  ;;  %v932_v37 = vshrl.u32 %v4356_v29, 16  ;;  %v930_v39 = vsel %vm5454_vm5, %v920_v22, %v929_v35  ;;  %v943_v44 = vrot.slane %v941_v49, 1  ;;  %v946_v54 = vrot.slane %v944_v50, 2  ;;  %v3411_v22 = vld [vmem:[%s5445_s1 + $0x18] sm:$0xf] }
  0x26   : > { %3677 = vmatprep.mubr.msk.bf16.mxu0 %vm5457_vm1, %v4156_v1  ;;  %v749_v47 = vsel %vm5454_vm5, %v744_v26, %v748_v32  ;;  %v753_v58 = vsel %vm5454_vm5, %v748_v32, %v752_v52  ;;  %v955_v8 = vrot.slane %v953_v63, 2  ;;  %v1193_v15 = vrot.slane %v914_v2, 2 }
  0x27   : > { %v934_v36 = vrot.slane %v932_v37, 1  ;;  %v947_v60 = vor.u32 %v946_v54, %v943_v44  ;;  %v1194_v21 = vrot.slane %v917_v3, 3  ;;  %vm5452_vm7 = vsmask.f32 5376 }
  0x28   : > { %v1069_v26 = vrot.slane %v4324_v10, 2  ;;  %v1197_v27 = vrot.slane %v923_v19, 2  ;;  %v1198_v28 = vrot.slane %v926_v23, 3  ;;  %v1071_v19 = vrot.slane %v4356_v29, 2 }
  0x29   : > { %v1195_v25 = vor.u32 %v1194_v21, %v1193_v15  ;;  %v1201_v23 = vrot.slane %v932_v37, 2  ;;  %v1205_v32 = vrot.slane %v941_v49, 2  ;;  %v1206_v37 = vrot.slane %v944_v50, 3 }
  0x2a   : > { %3696 = vmatmul.mubr.msk.bf16.gmra.mxu1 %vm491_vm3, %v615_v41  ;;  %v937_v41 = vrot.slane %v935_v38, 2  ;;  %v1070_v31 = vsel %vm5453_vm6, %v1067_v14, %v1069_v26  ;;  %v1199_v33 = vor.u32 %v1198_v28, %v1197_v27  ;;  %vm5450_vm9 = vsmask.f32 4352 }
  0x2b   : > { %3699 = vmatprep.mubr.msk.bf16.mxu1 %vm5457_vm1, %v4156_v1  ;;  %v1207_v45 = vor.u32 %v1206_v37, %v1205_v32  ;;  %vm5460_vm10 = vcmask 125952   ;;  %vm5455_vm11 = vcmask 123904   ;;  %vm231_vm12 = vcmask 125954  }
  0x2c   : > { %v938_v48 = vor.u32 %v937_v41, %v934_v36  ;;  %v1200_v10 = vsel %vm5452_vm7, %v1195_v25, %v1199_v33  ;;  %v4107_v36 = vld [vmem:[%s4219_s27 + $0x30] ss:$0 sps:$4 sm:$0x77]   ;;  %v1319_v41 = vld [vmem:[%s4219_s27 + $0xc] sm:$0xc] }
  0x2d   : > { %3678 = vmatmul.mubr.msk.bf16.gmra.mxu0 %vm491_vm3, %v488_v46  ;;  %v4104_v46 = vld [vmem:[%s4219_s27 + $0x2c] ss:$0 sps:$4 sm:$0x33]   ;;  %v1213_v49 = vshll.u32 %v4107_v36, 16  ;;  %v3412_v50 = vcombine.low %v1319_v41, %v1320_v43 }
  0x2e   : > { %3681 = vmatprep.mubr.msk.bf16.mxu0 %vm5457_vm1, %v4156_v1  ;;  %v755_v53 = vshrl.u32 %v4104_v46, 16  ;;  %v939_v40 = vsel %vm5454_vm5, %v929_v35, %v938_v48  ;;  %v948_v5 = vsel %vm5454_vm5, %v938_v48, %v947_v60  ;;  %v1072_v35 = vsel %vm5453_vm6, %v1069_v26, %v1071_v19  ;;  %v4113_v26 = vld [vmem:[%s4219_s27 + $0x2c] sm:$0xff]  }
  0x2f   : > { %v1215_v44 = vrot.slane %v1213_v49, 3  ;;  %v1361_v54 = vshrl.u32 %v3412_v50, 16 }
  0x30   : > { %v757_v59 = vrot.slane %v755_v53, 1 }
  0x32   : > { %3700 = vmatmul.mubr.msk.bf16.gmra.mxu1 %vm491_vm3, %v623_v56  ;;  %v758_v56 = vshll.u32 %v4104_v46, 16  ;;  %v1210_v46 = vshrl.u32 %v4107_v36, 16 }
  0x33   : > { %3703 = vmatprep.mubr.msk.bf16.mxu1 %vm5457_vm1, %v4156_v1 }
  0x34   : > { %v760_v61 = vrot.slane %v758_v56, 2  ;;  %v1212_v53 = vrot.slane %v1210_v46, 2  ;;  %v1364_v56 = vshll.u32 %v3412_v50, 16 }
  0x35   : > { %3682 = vmatmul.mubr.msk.bf16.gmra.mxu0 %vm491_vm3, %v490_v4  ;;  %v3398_v4 = vcombine.low %v1059_v0, %v4298_v51 }
  0x36   : > { %3709 = vmatprep.mubr.msk.bf16.mxu0 %vm5457_vm1, %v4156_v1  ;;  %v761_v6 = vor.u32 %v760_v61, %v757_v59  ;;  %v1216_v61 = vor.u32 %v1215_v44, %v1212_v53  ;;  %v1366_v63 = vrot.slane %v1364_v56, 3 }
  0x37   : > { %v1186_v12 = vshrl.u32 %v3398_v4, 16  ;;  %v1189_v13 = vshll.u32 %v3398_v4, 16  ;;  %v1066_v51 = vrot.slane %v3398_v4, 2  ;;  %v1514_v4 = vld [vmem:[%s4219_s27 + $0xc] sm:$0x8] }
  0x38   : > { %v762_v9 = vsel %vm5454_vm5, %v752_v52, %v761_v6  ;;  %v1075_v52 = vrot.slane %v4402_v57, 2  ;;  %v4500_v57 = vld [vmem:[%s4219_s27 + $0x1c] sm:$0xff]  }
  0x39   : > { %v1188_v18 = vrot.slane %v1186_v12, 2  ;;  %v1378_v6 = vshrl.u32 %v4500_v57, 16  ;;  %v3430_v12 = vld [vmem:[%s5445_s1 + $0x20] sm:$0xf] }
  0x3a   : > { %3704 = vmatmul.mubr.msk.bf16.gmra.mxu1 %vm491_vm3, %v631_v7  ;;  %v952_v7 = vrot.slane %v950_v62, 1  ;;  %v1363_v62 = vrot.slane %v1361_v54, 2 }
  0x3b   : > { %3731 = vmatprep.mubr.msk.bf16.mxu1 %vm5457_vm1, %v4156_v1  ;;  %v1380_v15 = vrot.slane %v1378_v6, 2 }
  0x3c   : > { %v956_v11 = vor.u32 %v955_v8, %v952_v7  ;;  %v1217_v7 = vsel %vm5452_vm7, %v1207_v45, %v1216_v61  ;;  %v1367_v8 = vor.u32 %v1366_v63, %v1363_v62 }
  0x3d   : > { %3710 = vmatmul.mubr.msk.bf16.vlgmr.msra.gmra.mxu0 %vm491_vm3, %v741_v20  ;;  %v1191_v20 = vrot.slane %v1189_v13, 3 }
  0x3e   : > { %3752 = vmatpush3.bf16.msra.mxu0 %v1093_v24  ;;  %3713 = vmatprep.mubr.msk.bf16.mxu0 %vm5457_vm1, %v4156_v1  ;;  %v957_v16 = vsel %vm5454_vm5, %v947_v60, %v956_v11  ;;  %v1068_v24 = vsel %vm5453_vm6, %v1066_v51, %v1067_v14  ;;  %v1381_v11 = vshll.u32 %v4500_v57, 16 }
  0x3f   : > { %3795 = vmatprep.subr.bf16.mxu0 %v4156_v1  ;;  %v1192_v2 = vor.u32 %v1191_v20, %v1188_v18  ;;  %v4529_v18 = vld [vmem:[%s4219_s27 + $0x24] sm:$0xff]   ;;  %v1689_v20 = vsel %vm507_vm0, %v3430_v12, 0 }
  0x41   : > { %v1196_v3 = vsel %vm5452_vm7, %v1192_v2, %v1195_v25  ;;  %v1390_v2 = vshll.u32 %v4529_v18, 16 }
  0x42   : > { %3732 = vmatmul.mubr.msk.bf16.vlgmr.msra.gmra.mxu1 %vm491_vm3, %v921_v17  ;;  %v1429_v17 = vsel %vm507_vm0, %v3411_v22, 0 }
  0x43   : > { %3735 = vmatprep.mubr.msk.bf16.mxu1 %vm5457_vm1, %v4156_v1  ;;  %3774 = vmatpush3.bf16.msra.mxu1 %v1234_v30  ;;  %v1548_v30 = vsel %vm507_vm0, %v3423_v55, 0  ;;  %v1657_v63 = vrot.slane %v1390_v2, 4 }
  0x44   : > { %3817 = vmatprep.subr.bf16.mxu1 %v4156_v1 }
  0x45   : > { %3714 = vmatmul.mubr.msk.bf16.gmra.mxu0 %vm491_vm3, %v745_v34  ;;  %v1202_v34 = vrot.slane %v935_v38, 3  ;;  %v1073_v38 = vrot.slane %v4380_v42, 2 }
  0x46   : > { %3717 = vmatprep.mubr.msk.bf16.mxu0 %vm5457_vm1, %v4156_v1 }
  0x47   : > { %v1074_v48 = vsel %vm5453_vm6, %v1071_v19, %v1073_v38  ;;  %v1076_v59 = vsel %vm5453_vm6, %v1073_v38, %v1075_v52 }
  0x4a   : > { %3736 = vmatmul.mubr.msk.bf16.gmra.mxu1 %vm491_vm3, %v930_v39  ;;  %v1203_v39 = vor.u32 %v1202_v34, %v1201_v23  ;;  %v4114_v34 = vld [vmem:[%s4219_s27 + $0x34] ss:$0 sps:$4 sm:$0x77]  }
  0x4b   : > { %3739 = vmatprep.mubr.msk.bf16.mxu1 %vm5457_vm1, %v4156_v1  ;;  %v1405_v32 = vshrl.u32 %v4114_v34, 16  ;;  %v1408_v37 = vshll.u32 %v4114_v34, 16  ;;  %v1530_v49 = vrot.slane %v4114_v34, 3 }
  0x4c   : > { %v1204_v29 = vsel %vm5452_vm7, %v1199_v33, %v1203_v39  ;;  %v1208_v42 = vsel %vm5452_vm7, %v1203_v39, %v1207_v45 }
  0x4d   : > { %3718 = vmatmul.mubr.msk.bf16.gmra.mxu0 %vm491_vm3, %v749_v47  ;;  %v4483_v47 = vld [vmem:[%s4219_s27 + $0x14] sm:$0xff]   ;;  %v1407_v38 = vrot.slane %v1405_v32, 2  ;;  %v1410_v41 = vrot.slane %v1408_v37, 3 }
  0x4e   : > { %3721 = vmatprep.mubr.msk.bf16.mxu0 %vm5457_vm1, %v4156_v1  ;;  %v1522_v13 = vrot.slane %v4483_v47, 3 }
  0x4f   : > { %v1411_v45 = vor.u32 %v1410_v41, %v1407_v38 }
  0x52   : > { %3740 = vmatmul.mubr.msk.bf16.gmra.mxu1 %vm491_vm3, %v939_v40  ;;  %v1369_v40 = vshrl.u32 %v4483_v47, 16 }
  0x53   : > { %3743 = vmatprep.mubr.msk.bf16.mxu1 %vm5457_vm1, %v4156_v1 }
  0x54   : > { %v1371_v60 = vrot.slane %v1369_v40, 2  ;;  %v1648_v50 = vrot.slane %v1369_v40, 3 }
  0x55   : > { %3722 = vmatmul.mubr.msk.bf16.gmra.mxu0 %vm491_vm3, %v753_v58  ;;  %v1372_v58 = vshll.u32 %v4483_v47, 16  ;;  %v1653_v47 = vrot.slane %v1381_v11, 4 }
  0x56   : > { %3725 = vmatprep.mubr.msk.bf16.mxu0 %vm5457_vm1, %v4156_v1 }
  0x57   : > { %v1374_v0 = vrot.slane %v1372_v58, 3  ;;  %v1649_v44 = vrot.slane %v1372_v58, 4 }
  0x5a   : > { %3744 = vmatmul.mubr.msk.bf16.gmra.mxu1 %vm491_vm3, %v948_v5  ;;  %v4508_v5 = vcombine.low %v1514_v4, %v1320_v43 }
  0x5b   : > { %3747 = vmatprep.mubr.msk.bf16.mxu1 %vm5457_vm1, %v4156_v1 }
  0x5c   : > { %v1521_v14 = vrot.slane %v4508_v5, 3  ;;  %v1641_v46 = vshrl.u32 %v4508_v5, 16 }
  0x5d   : > { %3726 = vmatmul.mubr.msk.bf16.gmra.mxu0 %vm491_vm3, %v762_v9  ;;  %v1375_v9 = vor.u32 %v1374_v0, %v1371_v60  ;;  %v1652_v60 = vrot.slane %v1378_v6, 3  ;;  %v4115_v6 = vld [vmem:[%s4219_s27 + $0x34] ss:$0 sps:$4 sm:$0xff]  }
  0x5e   : > { %3753 = vmatprep.mubr.msk.bf16.mxu0 %vm5457_vm1, %v4156_v1  ;;  %v1523_v21 = vsel %vm5451_vm8, %v1521_v14, %v1522_v13  ;;  %v1643_v52 = vrot.slane %v1641_v46, 3  ;;  %v4116_v46 = vld [vmem:[%s5447_s3 + $0x8] sm:$0xff]  }
  0x5f   : > { %v1376_v51 = vsel %vm5452_vm7, %v1367_v8, %v1375_v9  ;;  %v1654_v58 = vor.u32 %v1653_v47, %v1652_v60  ;;  %v1665_v8 = vshrl.u32 %v4115_v6, 16 }
  0x61   : > { %v1667_v12 = vrot.slane %v1665_v8, 3 }
  0x62   : > { %3748 = vmatmul.mubr.msk.bf16.gmra.mxu1 %vm491_vm3, %v957_v16  ;;  %v1383_v16 = vrot.slane %v1381_v11, 3 }
  0x63   : > { %3775 = vmatprep.mubr.msk.bf16.mxu1 %vm5457_vm1, %v4156_v1 }
  0x64   : > { %v1384_v22 = vor.u32 %v1383_v16, %v1380_v15 }
  0x65   : > { %3754 = vmatmul.mubr.msk.bf16.vlgmr.msra.gmra.mxu0 %vm491_vm3, %v1068_v24  ;;  %v1387_v24 = vshrl.u32 %v4529_v18, 16 }
  0x66   : > { %3796 = vmatpush3.bf16.msra.mxu0 %v1429_v17  ;;  %3757 = vmatprep.mubr.msk.bf16.mxu0 %vm5457_vm1, %v4156_v1  ;;  %v1385_v25 = vsel %vm5452_vm7, %v1375_v9, %v1384_v22  ;;  %v1524_v17 = vrot.slane %v4500_v57, 3  ;;  %v1668_v9 = vshll.u32 %v4115_v6, 16 }
  0x67   : > { %3839 = vmatprep.subr.bf16.mxu0 %v4156_v1  ;;  %v1389_v55 = vrot.slane %v1387_v24, 2  ;;  %v1656_v62 = vrot.slane %v1387_v24, 3 }
  0x68   : > { %v1525_v27 = vsel %vm5451_vm8, %v1522_v13, %v1524_v17  ;;  %v1670_v13 = vrot.slane %v1668_v9, 4 }
  0x69   : > { %v1658_v57 = vor.u32 %v1657_v63, %v1656_v62 }
  0x6a   : > { %3776 = vmatmul.mubr.msk.bf16.vlgmr.msra.gmra.mxu1 %vm491_vm3, %v1196_v3  ;;  %v1392_v3 = vrot.slane %v1390_v2, 3 }
  0x6b   : > { %3779 = vmatprep.mubr.msk.bf16.mxu1 %vm5457_vm1, %v4156_v1  ;;  %3818 = vmatpush3.bf16.msra.mxu1 %v1548_v30  ;;  %v1396_v30 = vshrl.u32 %v4113_v26, 16  ;;  %v1659_v0 = vsel %vm5450_vm9, %v1654_v58, %v1658_v57 }
  0x6c   : > { %3861 = vmatprep.subr.bf16.mxu1 %v4156_v1  ;;  %v1393_v28 = vor.u32 %v1392_v3, %v1389_v55 }
  0x6d   : > { %3758 = vmatmul.mubr.msk.bf16.gmra.mxu0 %vm491_vm3, %v1070_v31  ;;  %v1399_v31 = vshll.u32 %v4113_v26, 16  ;;  %v1398_v19 = vrot.slane %v1396_v30, 2  ;;  %v1660_v4 = vrot.slane %v1396_v30, 3 }
  0x6e   : > { %3761 = vmatprep.mubr.msk.bf16.mxu0 %vm5457_vm1, %v4156_v1  ;;  %v1394_v33 = vsel %vm5452_vm7, %v1384_v22, %v1393_v28 }
  0x6f   : > { %v1401_v23 = vrot.slane %v1399_v31, 3 }
  0x71   : > { %v1402_v39 = vor.u32 %v1401_v23, %v1398_v19 }
  0x72   : > { %3780 = vmatmul.mubr.msk.bf16.gmra.mxu1 %vm491_vm3, %v1200_v10  ;;  %v1526_v10 = vrot.slane %v4529_v18, 3 }
  0x73   : > { %3783 = vmatprep.mubr.msk.bf16.mxu1 %vm5457_vm1, %v4156_v1  ;;  %v1403_v36 = vsel %vm5452_vm7, %v1393_v28, %v1402_v39 }
  0x75   : > { %3762 = vmatmul.mubr.msk.bf16.gmra.mxu0 %vm491_vm3, %v1072_v35  ;;  %v1527_v35 = vsel %vm5451_vm8, %v1524_v17, %v1526_v10 }
  0x76   : > { %3765 = vmatprep.mubr.msk.bf16.mxu0 %vm5457_vm1, %v4156_v1 }
  0x7a   : > { %3784 = vmatmul.mubr.msk.bf16.gmra.mxu1 %vm491_vm3, %v1204_v29  ;;  %v1528_v29 = vrot.slane %v4113_v26, 3 }
  0x7b   : > { %3787 = vmatprep.mubr.msk.bf16.mxu1 %vm5457_vm1, %v4156_v1 }
  0x7c   : > { %v1529_v43 = vsel %vm5451_vm8, %v1526_v10, %v1528_v29  ;;  %v1531_v54 = vsel %vm5451_vm8, %v1528_v29, %v1530_v49 }
  0x7d   : > { %3766 = vmatmul.mubr.msk.bf16.gmra.mxu0 %vm491_vm3, %v1074_v48  ;;  %v1644_v48 = vshll.u32 %v4508_v5, 16  ;;  %v1661_v5 = vrot.slane %v1399_v31, 4 }
  0x7e   : > { %3769 = vmatprep.mubr.msk.bf16.mxu0 %vm5457_vm1, %v4156_v1 }
  0x7f   : > { %v1646_v53 = vrot.slane %v1644_v48, 4 }
  0x81   : > { %v1647_v56 = vor.u32 %v1646_v53, %v1643_v52 }
  0x82   : > { %3788 = vmatmul.mubr.msk.bf16.gmra.mxu1 %vm491_vm3, %v1208_v42  ;;  %v1412_v42 = vsel %vm5452_vm7, %v1402_v39, %v1411_v45 }
  0x83   : > { %3791 = vmatprep.mubr.msk.bf16.mxu1 %vm5457_vm1, %v4156_v1 }
  0x85   : > { %3770 = vmatmul.mubr.msk.bf16.gmra.mxu0 %vm491_vm3, %v1076_v59  ;;  %v1650_v59 = vor.u32 %v1649_v44, %v1648_v50 }
  0x86   : > { %3797 = vmatprep.mubr.msk.bf16.mxu0 %vm5457_vm1, %v4156_v1 }
  0x87   : > { %v1651_v40 = vsel %vm5450_vm9, %v1647_v56, %v1650_v59  ;;  %v1655_v61 = vsel %vm5450_vm9, %v1650_v59, %v1654_v58 }
  0x8a   : > { %3792 = vmatmul.mubr.msk.bf16.gmra.mxu1 %vm491_vm3, %v1217_v7  ;;  %v1662_v7 = vor.u32 %v1661_v5, %v1660_v4 }
  0x8b   : > { %3819 = vmatprep.mubr.msk.bf16.mxu1 %vm5457_vm1, %v4156_v1 }
  0x8c   : > { %v1663_v11 = vsel %vm5450_vm9, %v1658_v57, %v1662_v7 }
  0x8d   : > { %3798 = vmatmul.mubr.msk.bf16.vlgmr.msra.gmra.mxu0 %vm491_vm3, %v1376_v51  ;;  %v1671_v51 = vor.u32 %v1670_v13, %v1667_v12 }
  0x8e   : > { %3840 = vmatpush3.bf16.msra.mxu0 %v1689_v20  ;;  %3801 = vmatprep.mubr.msk.bf16.mxu0 %vm5457_vm1, %v4156_v1 }
  0x8f   : > { %3883 = vmatprep.subr.bf16.mxu0 %v4156_v1  ;;  %v1672_v14 = vsel %vm5450_vm9, %v1662_v7, %v1671_v51 }
  0x92   : > { %3820 = vmatmul.mubr.msk.bf16.vlgmr.msra.gmra.mxu1 %vm491_vm3, %v1523_v21 }
  0x93   : > { %3823 = vmatprep.mubr.msk.bf16.mxu1 %vm5457_vm1, %v4156_v1  ;;  %3862 = vmatpush3.bf16.msra.mxu1 %v4116_v46 }
  0x94   : > { %3905 = vmatprep.subr.bf16.mxu1 %v4156_v1 }
  0x95   : > { %3802 = vmatmul.mubr.msk.bf16.gmra.mxu0 %vm491_vm3, %v1385_v25 }
  0x96   : > { %3805 = vmatprep.mubr.msk.bf16.mxu0 %vm5457_vm1, %v4156_v1 }
  0x9a   : > { %3824 = vmatmul.mubr.msk.bf16.gmra.mxu1 %vm491_vm3, %v1525_v27 }
  0x9b   : > { %3827 = vmatprep.mubr.msk.bf16.mxu1 %vm5457_vm1, %v4156_v1 }
  0x9d   : > { %3806 = vmatmul.mubr.msk.bf16.gmra.mxu0 %vm491_vm3, %v1394_v33 }
  0x9e   : > { %3809 = vmatprep.mubr.msk.bf16.mxu0 %vm5457_vm1, %v4156_v1 }
  0xa2   : > { %3828 = vmatmul.mubr.msk.bf16.gmra.mxu1 %vm491_vm3, %v1527_v35 }
  0xa3   : > { %3831 = vmatprep.mubr.msk.bf16.mxu1 %vm5457_vm1, %v4156_v1 }
  0xa5   : > { %3810 = vmatmul.mubr.msk.bf16.gmra.mxu0 %vm491_vm3, %v1403_v36 }
  0xa6   : > { %3813 = vmatprep.mubr.msk.bf16.mxu0 %vm5457_vm1, %v4156_v1 }
  0xaa   : > { %3832 = vmatmul.mubr.msk.bf16.gmra.mxu1 %vm491_vm3, %v1529_v43 }
  0xab   : > { %3835 = vmatprep.mubr.msk.bf16.mxu1 %vm5457_vm1, %v4156_v1 }
  0xad   : > { %3814 = vmatmul.mubr.msk.bf16.gmra.mxu0 %vm491_vm3, %v1412_v42 }
  0xae   : > { %3841 = vmatprep.mubr.msk.bf16.mxu0 %vm5457_vm1, %v4156_v1 }
  0xb2   : > { %3836 = vmatmul.mubr.msk.bf16.gmra.mxu1 %vm491_vm3, %v1531_v54 }
  0xb3   : > { %3863 = vmatprep.mubr.msk.bf16.mxu1 %vm5457_vm1, %v4156_v1 }
  0xb5   : > { %3842 = vmatmul.mubr.msk.bf16.vlgmr.msra.gmra.mxu0 %vm491_vm3, %v1651_v40  ;;  %v4158_v40 = vmov 0  }
  0xb6   : > { %3845 = vmatprep.mubr.msk.bf16.mxu0 %vm5457_vm1, %v4156_v1  ;;  %228 = vst.msk [vmem:[#allocation2 + $0x4] sm:$0xf] %vm5460_vm10, %v4158_v40  ;;  %233 = vst.msk [vmem:[#allocation2 + $0x34] sm:$0xf] %vm5460_vm10, %v4158_v40 }
  0xb7   : > { %230 = vst.msk [vmem:[#allocation2 + $0x8] sm:$0x3] %vm5455_vm11, %v4158_v40 }
  0xb8   : > { %232 = vst.msk [vmem:[#allocation2 + $0x30] sm:$0xc] %vm231_vm12, %v4158_v40 }
  0xbd   : > { %3846 = vmatmul.mubr.msk.bf16.gmra.mxu0 %vm491_vm3, %v1655_v61 }
  0xbe   : > { %3849 = vmatprep.mubr.msk.bf16.mxu0 %vm5457_vm1, %v4156_v1 }
  0xc5   : > { %3850 = vmatmul.mubr.msk.bf16.gmra.mxu0 %vm491_vm3, %v1659_v0 }
  0xc6   : > { %3853 = vmatprep.mubr.msk.bf16.mxu0 %vm5457_vm1, %v4156_v1 }
  0xcd   : > { %3854 = vmatmul.mubr.msk.bf16.gmra.mxu0 %vm491_vm3, %v1663_v11 }
  0xce   : > { %3857 = vmatprep.mubr.msk.bf16.mxu0 %vm5457_vm1, %v4156_v1 }
  0xd5   : > { %v545_v15 = vpop.f32.mrf.mxu0  ;;  %3858 = vmatmul.mubr.msk.bf16.gmra.mxu0 %vm491_vm3, %v1672_v14 }
  0xd6   : > { %3885 = vmatprep.mubr.msk.bf16.mxu0 %vm5457_vm1, %v4156_v1 }
  0xd7   : > { %v3667_v16 = vpop.f32.mrf.mxu0 }
  0xd9   : > { %v548_v18 = vpop.f32.mrf.mxu0 }
  0xda   : > { %v684_v20 = vpop.f32.mrf.mxu1 }
  0xdb   : > { %v685_v21 = vadd.f32 %v684_v20, %v545_v15  ;;  %v3668_v22 = vpop.f32.mrf.mxu0 }
  0xdc   : > { %v3689_v24 = vpop.f32.mrf.mxu1 }
  0xdd   : > { %v553_v2 = vpop.f32.mrf.mxu0 }
  0xde   : > { %v687_v25 = vpop.f32.mrf.mxu1 }
  0xdf   : > { %v688_v17 = vadd.f32 %v687_v25, %v548_v18  ;;  %v3671_v55 = vpop.f32.mrf.mxu0 }
  0xe0   : > { %v3690_v3 = vpop.f32.mrf.mxu1 }
  0xe1   : > { %v556_v26 = vpop.f32.mrf.mxu0 }
  0xe2   : > { %v692_v27 = vpop.f32.mrf.mxu1 }
  0xe3   : > { %v693_v28 = vadd.f32 %v692_v27, %v553_v2  ;;  %v3672_v30 = vpop.f32.mrf.mxu0 }
  0xe4   : > { %v3693_v31 = vpop.f32.mrf.mxu1 }
  0xe5   : > { %v561_v33 = vpop.f32.mrf.mxu0 }
  0xe6   : > { %v695_v10 = vpop.f32.mrf.mxu1 }
  0xe7   : > { %v696_v19 = vadd.f32 %v695_v10, %v556_v26  ;;  %v3675_v23 = vpop.f32.mrf.mxu0 }
  0xe8   : > { %v3694_v34 = vpop.f32.mrf.mxu1 }
  0xe9   : > { %v564_v35 = vpop.f32.mrf.mxu0 }
  0xea   : > { %v700_v39 = vpop.f32.mrf.mxu1 }
  0xeb   : > { %v701_v32 = vadd.f32 %v700_v39, %v561_v33  ;;  %v3676_v37 = vpop.f32.mrf.mxu0  ;;  %v4117_v39 = vld [vmem:[%s5447_s3] sm:$0xff]  }
  0xec   : > { %v3697_v36 = vpop.f32.mrf.mxu1  ;;  %3884 = vmatpush3.bf16.msra.mxu0 %v4117_v39 }
  0xed   : > { %v569_v29 = vpop.f32.mrf.mxu0  ;;  %3927 = vmatprep.subr.bf16.mxu0 %v4156_v1 }
  0xee   : > { %v703_v38 = vpop.f32.mrf.mxu1 }
  0xef   : > { %v704_v41 = vadd.f32 %v703_v38, %v564_v35  ;;  %v3679_v43 = vpop.f32.mrf.mxu0 }
  0xf0   : > { %v3698_v45 = vpop.f32.mrf.mxu1 }
  0xf1   : > { %v572_v48 = vpop.f32.mrf.mxu0 }
  0xf2   : > { %v708_v49 = vpop.f32.mrf.mxu1 }
  0xf3   : > { %v709_v50 = vadd.f32 %v708_v49, %v569_v29  ;;  %v3680_v42 = vpop.f32.mrf.mxu0 }
  0xf4   : > { %v3701_v52 = vpop.f32.mrf.mxu1 }
  0xf5   : > { %v577_v53 = vpop.f32.mrf.mxu0 }
  0xf6   : > { %v711_v44 = vpop.f32.mrf.mxu1 }
  0xf7   : > { %v4621_v54 = vadd.f32 %v711_v44, %v572_v48  ;;  %v3683_v56 = vpop.f32.mrf.mxu0 }
  0xf8   : > { %v3702_v59 = vpop.f32.mrf.mxu1 }
  0xf9   : > { %v580_v60 = vpop.f32.mrf.mxu0 }
  0xfa   : > { %v716_v47 = vpop.f32.mrf.mxu1 }
  0xfb   : > { %v717_v58 = vadd.f32 %v716_v47, %v577_v53  ;;  %v3684_v61 = vpop.f32.mrf.mxu0 }
  0xfc   : > { %v3705_v62 = vpop.f32.mrf.mxu1 }
  0xfd   : > { %v815_v57 = vpop.f32.mrf.mxu0 }
  0xfe   : > { %v719_v63 = vpop.f32.mrf.mxu1  ;;  %v854_v4 = vadd.f32 %v815_v57, %v685_v21 }
  0xff   : > { %v720_v0 = vadd.f32 %v719_v63, %v580_v60  ;;  %v3711_v6 = vpop.f32.mrf.mxu0 }
 0x100   : > { %v3706_v5 = vpop.f32.mrf.mxu1 }
 0x101   : > { %v818_v7 = vpop.f32.mrf.mxu0 }
 0x102   : > { %v1010_v8 = vpop.f32.mrf.mxu1  ;;  %v855_v9 = vadd.f32 %v818_v7, %v688_v17 }
 0x103   : > { %v1049_v11 = vadd.f32 %v1010_v8, %v854_v4  ;;  %v3712_v12 = vpop.f32.mrf.mxu0 }
 0x104   : > { %v3733_v13 = vpop.f32.mrf.mxu1 }
 0x105   : > { %v823_v51 = vpop.f32.mrf.mxu0 }
 0x106   : > { %v1013_v14 = vpop.f32.mrf.mxu1  ;;  %v856_v15 = vadd.f32 %v823_v51, %v693_v28 }
 0x107   : > { %v1050_v16 = vadd.f32 %v1013_v14, %v855_v9  ;;  %v3715_v18 = vpop.f32.mrf.mxu0 }
 0x108   : > { %v3734_v20 = vpop.f32.mrf.mxu1 }
 0x109   : > { %v826_v22 = vpop.f32.mrf.mxu0 }
 0x10a   : > { %v1018_v24 = vpop.f32.mrf.mxu1  ;;  %v857_v2 = vadd.f32 %v826_v22, %v696_v19 }
 0x10b   : > { %v1051_v25 = vadd.f32 %v1018_v24, %v856_v15  ;;  %v3716_v55 = vpop.f32.mrf.mxu0 }
 0x10c   : > { %v3737_v21 = vpop.f32.mrf.mxu1 }
 0x10d   : > { %v831_v3 = vpop.f32.mrf.mxu0 }
 0x10e   : > { %v1021_v26 = vpop.f32.mrf.mxu1  ;;  %v858_v27 = vadd.f32 %v831_v3, %v701_v32 }
 0x10f   : > { %v1052_v30 = vadd.f32 %v1021_v26, %v857_v2  ;;  %v3719_v17 = vpop.f32.mrf.mxu0 }
 0x110   : > { %v3738_v31 = vpop.f32.mrf.mxu1 }
 0x111   : > { %v834_v33 = vpop.f32.mrf.mxu0 }
 0x112   : > { %v1026_v10 = vpop.f32.mrf.mxu1  ;;  %v859_v23 = vadd.f32 %v834_v33, %v704_v41 }
 0x113   : > { %v1053_v34 = vadd.f32 %v1026_v10, %v858_v27  ;;  %v3720_v28 = vpop.f32.mrf.mxu0 }
 0x114   : > { %v3741_v35 = vpop.f32.mrf.mxu1 }
 0x115   : > { %v839_v19 = vpop.f32.mrf.mxu0 }
 0x116   : > { %v1029_v37 = vpop.f32.mrf.mxu1  ;;  %v860_v36 = vadd.f32 %v839_v19, %v709_v50 }
 0x117   : > { %v1054_v29 = vadd.f32 %v1029_v37, %v859_v23  ;;  %v3723_v32 = vpop.f32.mrf.mxu0 }
 0x118   : > { %v3742_v38 = vpop.f32.mrf.mxu1 }
 0x119   : > { %v842_v43 = vpop.f32.mrf.mxu0 }
 0x11a   : > { %v1034_v45 = vpop.f32.mrf.mxu1  ;;  %v861_v41 = vadd.f32 %v842_v43, %v4621_v54 }
 0x11b   : > { %v1055_v46 = vadd.f32 %v1034_v45, %v860_v36  ;;  %v3724_v48 = vpop.f32.mrf.mxu0 }
 0x11c   : > { %v3745_v49 = vpop.f32.mrf.mxu1 }
 0x11d   : > { %v847_v42 = vpop.f32.mrf.mxu0 }
 0x11e   : > { %v1037_v52 = vpop.f32.mrf.mxu1  ;;  %v862_v53 = vadd.f32 %v847_v42, %v717_v58 }
 0x11f   : > { %v1056_v44 = vadd.f32 %v1037_v52, %v861_v41  ;;  %v3727_v56 = vpop.f32.mrf.mxu0 }
 0x120   : > { %v3746_v59 = vpop.f32.mrf.mxu1 }
 0x121   : > { %v850_v40 = vpop.f32.mrf.mxu0 }
 0x122   : > { %v1042_v50 = vpop.f32.mrf.mxu1  ;;  %v863_v60 = vadd.f32 %v850_v40, %v720_v0 }
 0x123   : > { %v1057_v47 = vadd.f32 %v1042_v50, %v862_v53  ;;  %v3728_v61 = vpop.f32.mrf.mxu0 }
 0x124   : > { %v3749_v62 = vpop.f32.mrf.mxu1 }
 0x125   : > { %v1129_v57 = vpop.f32.mrf.mxu0 }
 0x126   : > { %v1045_v63 = vpop.f32.mrf.mxu1  ;;  %v1168_v5 = vadd.f32 %v1129_v57, %v1049_v11  ;;  %v235_v57 = vlaneseq }
 0x127   : > { %v1058_v4 = vadd.f32 %v1045_v63, %v863_v60  ;;  %v3755_v6 = vpop.f32.mrf.mxu0 }
 0x128   : > { %v3750_v54 = vpop.f32.mrf.mxu1 }
 0x129   : > { %v1132_v7 = vpop.f32.mrf.mxu0 }
 0x12a   : > { %v1270_v8 = vpop.f32.mrf.mxu1  ;;  %v1169_v9 = vadd.f32 %v1132_v7, %v1050_v16  ;;  %v4658_v7 = vshrl.u32 %v235_v57, 7 }
 0x12b   : > { %v4632_v12 = vadd.f32 %v1270_v8, %v1168_v5  ;;  %v3756_v58 = vpop.f32.mrf.mxu0 }
 0x12c   : > { %v3777_v13 = vpop.f32.mrf.mxu1 }
 0x12d   : > { %v1137_v51 = vpop.f32.mrf.mxu0 }
 0x12e   : > { %v1273_v14 = vpop.f32.mrf.mxu1  ;;  %v1170_v15 = vadd.f32 %v1137_v51, %v1051_v25 }
 0x12f   : > { %v4634_v0 = vadd.f32 %v1273_v14, %v1169_v9  ;;  %v3759_v18 = vpop.f32.mrf.mxu0  ;;  %v237_v9 = vadd.s32 8, %v4658_v7  ;;  %v4666_v51 = vmul.u32.u64.low 3435973837, %v4658_v7  ;;  %v4667_v14 = vmul.u32.u64.high 3435973837, %v4658_v7, %v4666_v51 }
 0x130   : > { %v3778_v20 = vpop.f32.mrf.mxu1 }
 0x131   : > { %v1140_v22 = vpop.f32.mrf.mxu0 }
 0x132   : > { %v1278_v24 = vpop.f32.mrf.mxu1  ;;  %v1171_v2 = vadd.f32 %v1140_v22, %v1052_v30 }
 0x133   : > { %v4636_v11 = vadd.f32 %v1278_v24, %v1170_v15  ;;  %v3760_v55 = vpop.f32.mrf.mxu0  ;;  %v238_v15 = vadd.s32 16, %v4658_v7  ;;  %v4670_v22 = vmul.u32.u64.low 3435973837, %v237_v9  ;;  %v4671_v24 = vmul.u32.u64.high 3435973837, %v237_v9, %v4670_v22 }
 0x134   : > { %v3781_v21 = vpop.f32.mrf.mxu1 }
 0x135   : > { %v1145_v3 = vpop.f32.mrf.mxu0 }
 0x136   : > { %v1281_v16 = vpop.f32.mrf.mxu1  ;;  %v1172_v26 = vadd.f32 %v1145_v3, %v1053_v34  ;;  %v4677_v21 = vmul.u32.u64.low 3435973837, %v238_v15  ;;  %v4678_v3 = vmul.u32.u64.high 3435973837, %v238_v15, %v4677_v21 }
 0x137   : > { %v4638_v27 = vadd.f32 %v1281_v16, %v1171_v2  ;;  %v3763_v17 = vpop.f32.mrf.mxu0  ;;  %v239_v16 = vadd.s32 24, %v4658_v7 }
 0x138   : > { %v3782_v31 = vpop.f32.mrf.mxu1 }
 0x139   : > { %v1148_v33 = vpop.f32.mrf.mxu0  ;;  %v4682_v31 = vadd.s32 32, %v4658_v7 }
 0x13a   : > { %v1286_v25 = vpop.f32.mrf.mxu1  ;;  %v1173_v10 = vadd.f32 %v1148_v33, %v1054_v29 }
 0x13b   : > { %v4640_v23 = vadd.f32 %v1286_v25, %v1172_v26  ;;  %v3764_v28 = vpop.f32.mrf.mxu0 }
 0x13c   : > { %v3785_v35 = vpop.f32.mrf.mxu1 }
 0x13d   : > { %v1153_v39 = vpop.f32.mrf.mxu0  ;;  %v4689_v28 = vmul.u32.u64.low 3435973837, %v239_v16  ;;  %v4690_v35 = vmul.u32.u64.high 3435973837, %v239_v16, %v4689_v28 }
 0x13e   : > { %v1289_v30 = vpop.f32.mrf.mxu1  ;;  %v1174_v19 = vadd.f32 %v1153_v39, %v1055_v46 }
 0x13f   : > { %v4642_v37 = vadd.f32 %v1289_v30, %v1173_v10  ;;  %v3767_v36 = vpop.f32.mrf.mxu0  ;;  %v252_v10 = vshrl.u32 %v4667_v14, 3 }
 0x140   : > { %v3786_v32 = vpop.f32.mrf.mxu1 }
 0x141   : > { %v1156_v38 = vpop.f32.mrf.mxu0  ;;  %v4694_v36 = vmul.u32.u64.low 3435973837, %v4682_v31  ;;  %v4695_v32 = vmul.u32.u64.high 3435973837, %v4682_v31, %v4694_v36 }
 0x142   : > { %v1294_v34 = vpop.f32.mrf.mxu1  ;;  %v1175_v43 = vadd.f32 %v1156_v38, %v1056_v44 }
 0x143   : > { %v4644_v45 = vadd.f32 %v1294_v34, %v1174_v19  ;;  %v3768_v41 = vpop.f32.mrf.mxu0  ;;  %v263_v19 = vshrl.u32 %v4671_v24, 3  ;;  %v296_v51 = vshrl.u32 %v4695_v32, 3 }
 0x144   : > { %v3789_v48 = vpop.f32.mrf.mxu1  ;;  %v253_v41 = vmul.u32 10, %v252_v10 }
 0x145   : > { %v1161_v49 = vpop.f32.mrf.mxu0  ;;  %v274_v48 = vshrl.u32 %v4678_v3, 3 }
 0x146   : > { %v1297_v29 = vpop.f32.mrf.mxu1  ;;  %v1176_v42 = vadd.f32 %v1161_v49, %v1057_v47 }
 0x147   : > { %v4646_v52 = vadd.f32 %v1297_v29, %v1175_v43  ;;  %v3771_v53 = vpop.f32.mrf.mxu0  ;;  %v4702_v43 = vadd.s32 40, %v4658_v7 }
 0x148   : > { %v3790_v56 = vpop.f32.mrf.mxu1  ;;  %v264_v53 = vmul.u32 10, %v263_v19 }
 0x149   : > { %v1164_v59 = vpop.f32.mrf.mxu0 }
 0x14a   : > { %v1302_v46 = vpop.f32.mrf.mxu1  ;;  %v1177_v40 = vadd.f32 %v1164_v59, %v1058_v4 }
 0x14b   : > { %v4648_v50 = vadd.f32 %v1302_v46, %v1176_v42  ;;  %v3772_v60 = vpop.f32.mrf.mxu0  ;;  %v4706_v42 = vadd.s32 48, %v4658_v7 }
 0x14c   : > { %v3793_v61 = vpop.f32.mrf.mxu1  ;;  %v254_v60 = vsub.s32 %v4658_v7, %v253_v41 }
 0x14d   : > { %v4650_v44 = vpop.f32.mrf.mxu0  ;;  %v275_v61 = vmul.u32 10, %v274_v48 }
 0x14e   : > { %v1305_v62 = vpop.f32.mrf.mxu1  ;;  %vm356_vm13 = vcmp.ne.s32.totalorder %v254_v60, 0  ;;  %vm366_vm14 = vcmp.lt.s32.totalorder %v254_v60, 0 }
 0x14f   : > { %v4652_v63 = vadd.f32 %v1305_v62, %v1177_v40  ;;  %v3799_v54 = vpop.f32.mrf.mxu0  ;;  %v4713_v46 = vmul.u32.u64.low 3435973837, %v4702_v43  ;;  %v4714_v40 = vmul.u32.u64.high 3435973837, %v4702_v43, %v4713_v46  ;;  %v285_v62 = vshrl.u32 %v4690_v35, 3  ;;  %vm376_vm0 = vmand %vm366_vm14, %vm356_vm13 }
 0x150   : > { %v3794_v5 = vpop.f32.mrf.mxu1  ;;  %v276_v22 = vsub.s32 %v238_v15, %v275_v61 }
 0x151   : > { %v4654_v47 = vpop.f32.mrf.mxu0  ;;  %v286_v24 = vmul.u32 10, %v285_v62  ;;  %v307_v35 = vshrl.u32 %v4714_v40, 3  ;;  %v1504_v62 = vadd.f32 %v4650_v44, %v4632_v12  ;;  %v4763_v12 = vld [vmem:[%s5446_s2] ss:$0 sm:$0xff] }
 0x152   : > { %v4656_v6 = vpop.f32.mrf.mxu1  ;;  %vm358_vm9 = vcmp.ne.s32.totalorder %v276_v22, 0  ;;  %vm368_vm8 = vcmp.lt.s32.totalorder %v276_v22, 0 }
 0x153   : > { %v3800_v8 = vpop.f32.mrf.mxu0  ;;  %vm378_vm14 = vmand %vm368_vm8, %vm358_vm9 }
 0x154   : > { %v3821_v4 = vpop.f32.mrf.mxu1  ;;  %v4719_v54 = vmul.u32.u64.low 3435973837, %v4706_v42  ;;  %v4720_v8 = vmul.u32.u64.high 3435973837, %v4706_v42, %v4719_v54 }
 0x155   : > { %v4661_v58 = vpop.f32.mrf.mxu0  ;;  %v265_v4 = vsub.s32 %v237_v9, %v264_v53  ;;  %v297_v9 = vmul.u32 10, %v296_v51  ;;  %v388_v53 = vadd.s32 10, %v276_v22 }
 0x156   : > { %v4663_v13 = vpop.f32.mrf.mxu1  ;;  %v318_v41 = vshrl.u32 %v4720_v8, 3  ;;  %v1623_v8 = vadd.f32 %v4656_v6, %v1504_v62 }
 0x157   : > { %v3803_v18 = vpop.f32.mrf.mxu0  ;;  %vm357_vm15 = vcmp.ne.s32.totalorder %v265_v4, 0  ;;  %vm367_vm3 = vcmp.lt.s32.totalorder %v265_v4, 0  ;;  %v387_v32 = vadd.s32 10, %v265_v4  ;;  %v298_v46 = vsub.s32 %v4682_v31, %v297_v9 }
 0x158   : > { %v3822_v20 = vpop.f32.mrf.mxu1  ;;  %vm377_vm13 = vmand %vm367_vm3, %vm357_vm15  ;;  %v319_v54 = vmul.u32 10, %v318_v41  ;;  %v4756_v31 = vsel %vm378_vm14, %v388_v53, %v276_v22  ;;  %v4774_v22 = vadd.s32 72, %v4658_v7  ;;  %vm1841_vm14 = vcmask 1041408  }
 0x159   : > { %v4673_v2 = vpop.f32.mrf.mxu0  ;;  %v4728_v20 = vadd.s32 56, %v4658_v7  ;;  %vm360_vm15 = vcmp.ne.s32.totalorder %v298_v46, 0  ;;  %vm370_vm9 = vcmp.lt.s32.totalorder %v298_v46, 0  ;;  %vm418_vm11 = vcmp.le.s32.totalorder %v4756_v31, 8 }
 0x15a   : > { %v4675_v55 = vpop.f32.mrf.mxu1  ;;  %vm380_vm4 = vmand %vm370_vm9, %vm360_vm15 }
 0x15b   : > { %v3804_v26 = vpop.f32.mrf.mxu0 }
 0x15c   : > { %v3825_v17 = vpop.f32.mrf.mxu1  ;;  %v4731_v26 = vadd.s32 64, %v4658_v7 }
 0x15d   : > { %v4684_v33 = vpop.f32.mrf.mxu0  ;;  %v386_v17 = vadd.s32 10, %v254_v60 }
 0x15e   : > { %v4686_v25 = vpop.f32.mrf.mxu1 }
 0x15f   : > { %v3807_v39 = vpop.f32.mrf.mxu0 }
 0x160   : > { %v3826_v30 = vpop.f32.mrf.mxu1  ;;  %v4739_v39 = vmul.u32.u64.low 3435973837, %v4728_v20  ;;  %v4740_v15 = vmul.u32.u64.high 3435973837, %v4728_v20, %v4739_v39 }
 0x161   : > { %v4697_v38 = vpop.f32.mrf.mxu0  ;;  %v287_v30 = vsub.s32 %v239_v16, %v286_v24  ;;  %v308_v16 = vmul.u32 10, %v307_v35  ;;  %v390_v35 = vadd.s32 10, %v298_v46  ;;  %v320_v39 = vsub.s32 %v4706_v42, %v319_v54 }
 0x162   : > { %v4699_v34 = vpop.f32.mrf.mxu1 }
 0x163   : > { %v3808_v49 = vpop.f32.mrf.mxu0  ;;  %vm359_vm7 = vcmp.ne.s32.totalorder %v287_v30, 0  ;;  %vm369_vm6 = vcmp.lt.s32.totalorder %v287_v30, 0  ;;  %v389_v51 = vadd.s32 10, %v287_v30  ;;  %v309_v6 = vsub.s32 %v4702_v43, %v308_v16 }
 0x164   : > { %v3829_v29 = vpop.f32.mrf.mxu1  ;;  %v4744_v48 = vmul.u32.u64.low 3435973837, %v4731_v26  ;;  %v4745_v49 = vmul.u32.u64.high 3435973837, %v4731_v26, %v4744_v48  ;;  %vm4767_vm8 = vmand %vm369_vm6, %vm359_vm7  ;;  %vm1842_vm6 = vcmask 1045508   ;;  %vm408_vm7 = vcmp.ge.s32.totalorder %v4756_v31, 1 }
 0x165   : > { %v4708_v56 = vpop.f32.mrf.mxu0  ;;  %v396_v29 = vsel %vm376_vm0, %v386_v17, %v254_v60  ;;  %v397_v60 = vsel %vm377_vm13, %v387_v32, %v265_v4  ;;  %v329_v4 = vshrl.u32 %v4740_v15, 3  ;;  %vm361_vm2 = vcmp.ne.s32.totalorder %v309_v6, 0 }
 0x166   : > { %v4710_v59 = vpop.f32.mrf.mxu1  ;;  %vm406_vm5 = vcmp.ge.s32.totalorder %v396_v29, 1  ;;  %vm416_vm0 = vcmp.le.s32.totalorder %v396_v29, 8  ;;  %vm407_vm3 = vcmp.ge.s32.totalorder %v397_v60, 1  ;;  %vm417_vm13 = vcmp.le.s32.totalorder %v397_v60, 8 }
 0x167   : > { %v3811_v57 = vpop.f32.mrf.mxu0  ;;  %v340_v15 = vshrl.u32 %v4745_v49, 3  ;;  %vm426_vm1 = vmand %vm406_vm5, %vm416_vm0  ;;  %v330_v42 = vmul.u32 10, %v329_v4  ;;  %vm371_vm10 = vcmp.lt.s32.totalorder %v309_v6, 0  ;;  %v4796_v49 = vsel %vm380_vm4, %v390_v35, %v298_v46 }
 0x168   : > { %v3830_v5 = vpop.f32.mrf.mxu1  ;;  %vm362_vm15 = vcmp.ne.s32.totalorder %v320_v39, 0  ;;  %vm4801_vm5 = vmand %vm407_vm3, %vm417_vm13  ;;  %v392_v54 = vadd.s32 10, %v320_v39  ;;  %v1507_v60 = vadd.f32 %v4673_v2, %v4638_v27  ;;  %vm410_vm3 = vcmp.ge.s32.totalorder %v4796_v49, 1 }
 0x169   : > { %v4723_v14 = vpop.f32.mrf.mxu0  ;;  %v341_v29 = vmul.u32 10, %v340_v15  ;;  %vm4807_vm4 = vmand %vm371_vm10, %vm361_vm2  ;;  %vm420_vm2 = vcmp.le.s32.totalorder %v4796_v49, 8 }
 0x16a   : > { %v4725_v18 = vpop.f32.mrf.mxu1  ;;  %vm4832_vm10 = vmand %vm408_vm7, %vm418_vm11 }
 0x16b   : > { %v3812_v21 = vpop.f32.mrf.mxu0  ;;  %v342_v4 = vsub.s32 %v4731_v26, %v341_v29  ;;  %v1908_v26 = vld [vmem:[#allocation2 + $0x4] sm:$0xe] }
 0x16c   : > { %v3833_v3 = vpop.f32.mrf.mxu1 }
 0x16d   : > { %v4733_v10 = vpop.f32.mrf.mxu0  ;;  %v1505_v3 = vadd.f32 %v4654_v47, %v4634_v0  ;;  %v399_v0 = vsel %vm4767_vm8, %v389_v51, %v287_v30  ;;  %vm372_vm8 = vcmp.lt.s32.totalorder %v320_v39, 0  ;;  %vm364_vm11 = vcmp.ne.s32.totalorder %v342_v4, 0 }
 0x16e   : > { %v4735_v28 = vpop.f32.mrf.mxu1  ;;  %vm409_vm0 = vcmp.ge.s32.totalorder %v399_v0, 1  ;;  %vm382_vm9 = vmand %vm372_vm8, %vm362_vm15  ;;  %vm374_vm7 = vcmp.lt.s32.totalorder %v342_v4, 0 }
 0x16f   : > { %v3815_v19 = vpop.f32.mrf.mxu0  ;;  %v1624_v7 = vadd.f32 %v4663_v13, %v1505_v3  ;;  %v1506_v13 = vadd.f32 %v4661_v58, %v4636_v11  ;;  %v391_v58 = vadd.s32 10, %v309_v6  ;;  %v1626_v3 = vadd.f32 %v4686_v25, %v1507_v60 }
 0x170   : > { %v3834_v36 = vpop.f32.mrf.mxu1 }
 0x171   : > { %v4749_v40 = vpop.f32.mrf.mxu0  ;;  %v4791_v36 = vmul.u32.u64.low 3435973837, %v4774_v22  ;;  %v4792_v32 = vmul.u32.u64.high 3435973837, %v4774_v22, %v4791_v36  ;;  %v1625_v53 = vadd.f32 %v4675_v55, %v1506_v13  ;;  %v331_v55 = vsub.s32 %v4728_v20, %v330_v42 }
 0x172   : > { %v4751_v61 = vpop.f32.mrf.mxu1  ;;  %v4825_v2 = vsel %vm4807_vm4, %v391_v58, %v309_v6  ;;  %v1508_v6 = vadd.f32 %v4684_v33, %v4640_v23  ;;  %vm4872_vm4 = vmand %vm374_vm7, %vm364_vm11 }
 0x173   : > { %v3816_v57 = vpop.f32.mrf.mxu0  ;;  %vm363_vm13 = vcmp.ne.s32.totalorder %v331_v55, 0  ;;  %vm373_vm15 = vcmp.lt.s32.totalorder %v331_v55, 0  ;;  %v351_v15 = vshrl.u32 %v4792_v32, 3  ;;  %v393_v36 = vadd.s32 10, %v331_v55 }
 0x174   : > { %v3837_v5 = vpop.f32.mrf.mxu1  ;;  %vm4862_vm8 = vmand %vm373_vm15, %vm363_vm13 }
 0x175   : > { %v1725_v21 = vpop.f32.mrf.mxu0  ;;  %v352_v58 = vmul.u32 10, %v351_v15  ;;  %v4883_v46 = vsel %vm4862_vm8, %v393_v36, %v331_v55 }
 0x176   : > { %v4758_v24 = vpop.f32.mrf.mxu1  ;;  %v1764_v17 = vadd.f32 %v1725_v21, %v1623_v8  ;;  %vm423_vm15 = vcmp.le.s32.totalorder %v4883_v46, 8 }
 0x177   : > { %v3843_v9 = vpop.f32.mrf.mxu0 }
 0x178   : > { %v3838_v43 = vpop.f32.mrf.mxu1  ;;  %v1781_v19 = vadd.f32 %v4763_v12, %v1764_v17  ;;  %v4836_v9 = vsel %vm382_vm9, %v392_v54, %v320_v39  ;;  %v1627_v39 = vadd.f32 %v4699_v34, %v1508_v6  ;;  %vm4891_vm9 = vmand %vm410_vm3, %vm420_vm2  ;;  %vm413_vm3 = vcmp.ge.s32.totalorder %v4883_v46, 1  ;;  %v4125_v46 = vld [vmem:[%s5447_s3 + $0x18] sm:$0xff]  }
 0x179   : > { %v1728_v47 = vpop.f32.mrf.mxu0  ;;  %vm1957_vm2 = vcmask 130048   ;;  %v1511_v6 = vadd.f32 %v4723_v14, %v4646_v52 }
 0x17a   : > { %v1791_v41 = vmax.f32 %v1781_v19, 0.0  ;;  %v1765_v48 = vadd.f32 %v1728_v47, %v1624_v7 }
 0x17b   : > { %v3844_v30 = vpop.f32.mrf.mxu0 }
 0x17c   : > { %v1801_v16 = vsel %vm426_vm1, %v1791_v41, 0.0  ;;  %v1782_v11 = vadd.f32 %v4763_v12, %v1765_v48  ;;  %vm419_vm1 = vcmp.le.s32.totalorder %v399_v0, 8  ;;  %v394_v0 = vadd.s32 10, %v342_v4 }
 0x17d   : > { %v3545_v57 = vpack.c.bf16 %v1801_v16, %v1801_v16  ;;  %v1733_v5 = vpop.f32.mrf.mxu0  ;;  %v1509_v48 = vadd.f32 %v4697_v38, %v4642_v37 }
 0x17e   : > { %v1792_v8 = vmax.f32 %v1782_v11, 0.0  ;;  %v1766_v51 = vadd.f32 %v1733_v5, %v1625_v53  ;;  %v4898_v55 = vsel %vm4872_vm4, %v394_v0, %v342_v4 }
 0x17f   : > { %v1844_v21 = vrot.slane %v3545_v57, 6  ;;  %v3847_v44 = vpop.f32.mrf.mxu0  ;;  %v1895_v57 = vld [vmem:[#allocation2 + $0x4] sm:$0xf]  ;;  %v1628_v37 = vadd.f32 %v4710_v59, %v1509_v48  ;;  %vm414_vm7 = vcmp.ge.s32.totalorder %v4898_v55, 1  ;;  %vm424_vm8 = vcmp.le.s32.totalorder %v4898_v55, 8 }
 0x180   : > { %v1802_v20 = vsel %vm4801_vm5, %v1792_v8, 0.0  ;;  %v1783_v27 = vadd.f32 %v4763_v12, %v1766_v51  ;;  %vm5475_vm5 = vcmask 125952  }
 0x181   : > { %1884 = vst.msk [vmem:[#allocation2 + $0x8] sm:$0xc] %vm231_vm12, %v1844_v21  ;;  %v3546_v17 = vpack.c.bf16 %v1802_v20, %v1802_v20  ;;  %v1736_v25 = vpop.f32.mrf.mxu0  ;;  %vm4842_vm12 = vmor %vm1841_vm14, %vm1842_vm6  ;;  %v1845_v7 = vrot.slane %v1844_v21, 4  ;;  %vm411_vm6 = vcmp.ge.s32.totalorder %v4825_v2, 1  ;;  %v1510_v21 = vadd.f32 %v4708_v56, %v4644_v45 }
 0x182   : > { %v1793_v43 = vmax.f32 %v1783_v27, 0.0  ;;  %v1767_v31 = vadd.f32 %v1736_v25, %v1626_v3  ;;  %vm4852_vm14 = vmand %vm409_vm0, %vm419_vm1  ;;  %vm421_vm0 = vcmp.le.s32.totalorder %v4825_v2, 8  ;;  %vm412_vm1 = vcmp.ge.s32.totalorder %v4836_v9, 1 }
 0x183   : > { %v1846_v19 = vrot.slane %v3546_v17, 6  ;;  %v3848_v47 = vpop.f32.mrf.mxu0  ;;  %vm5480_vm13 = vmmov %vm5475_vm5  ;;  %v4907_v25 = vsub.s32 %v4774_v22, %v352_v58  ;;  %v1629_v4 = vadd.f32 %v4725_v18, %v1510_v21  ;;  %v1630_v2 = vadd.f32 %v4735_v28, %v1511_v6 }
 0x184   : > { %v1803_v23 = vsel %vm4832_vm10, %v1793_v43, 0.0  ;;  %v1784_v42 = vadd.f32 %v4763_v12, %v1767_v31  ;;  %vm422_vm10 = vcmp.le.s32.totalorder %v4836_v9, 8  ;;  %vm431_vm11 = vmand %vm411_vm6, %vm421_vm0 }
 0x185   : > { %v1847_v32 = vsel %vm4842_vm12, %v1845_v7, %v1846_v19  ;;  %v3547_v13 = vpack.c.bf16 %v1803_v23, %v1803_v23  ;;  %v1741_v41 = vpop.f32.mrf.mxu0  ;;  %v1848_v16 = vrot.slane %v1846_v19, 4  ;;  %vm4934_vm6 = vmand %vm412_vm1, %vm422_vm10  ;;  %vm375_vm0 = vcmp.lt.s32.totalorder %v4907_v25, 0 }
 0x186   : > { %1885 = vst.msk [vmem:[#allocation2 + $0xc] sm:$0xf] %vm5475_vm5, %v1847_v32  ;;  %v1794_v30 = vmax.f32 %v1784_v42, 0.0  ;;  %v1768_v29 = vadd.f32 %v1741_v41, %v1627_v39  ;;  %v1512_v42 = vadd.f32 %v4733_v10, %v4648_v50  ;;  %v395_v9 = vadd.s32 10, %v4907_v25  ;;  %vm5484_vm4 = vmmov %vm5480_vm13  ;;  %v4120_v10 = vld [vmem:[%s5447_s3 + $0x10] sm:$0xff]  }
 0x187   : > { %v1849_v62 = vrot.slane %v3547_v13, 6  ;;  %v3851_v11 = vpop.f32.mrf.mxu0  ;;  %vm5489_vm10 = vcmask 1046528  }
 0x188   : > { %v1804_v38 = vsel %vm4852_vm14, %v1794_v30, 0.0  ;;  %v1785_v5 = vadd.f32 %v4763_v12, %v1768_v29  ;;  %v1896_v54 = vld [vmem:[#allocation2 + $0x8] sm:$0xf]  ;;  %vm5481_vm14 = vmmov %vm5475_vm5  ;;  %vm365_vm5 = vcmp.ne.s32.totalorder %v4907_v25, 0 }
 0x189   : > { %v1850_v60 = vsel %vm4842_vm12, %v1848_v16, %v1849_v62  ;;  %v3548_v8 = vpack.c.bf16 %v1804_v38, %v1804_v38  ;;  %v1744_v51 = vpop.f32.mrf.mxu0  ;;  %v4903_v20 = vcombine.low %v1895_v57, %v1896_v54  ;;  %v1851_v49 = vrot.slane %v1849_v62, 4  ;;  %vm4962_vm1 = vmand %vm375_vm0, %vm365_vm5 }
 0x18a   : > { %1886 = vst.msk [vmem:[#allocation2 + $0x10] sm:$0xf] %vm5480_vm13, %v1850_v60  ;;  %v1795_v44 = vmax.f32 %v1785_v5, 0.0  ;;  %v1769_v3 = vadd.f32 %v1744_v51, %v1628_v37  ;;  %v4924_v7 = vcombine.low %v1908_v26, %v1896_v54  ;;  %v1631_v62 = vadd.f32 %v4751_v61, %v1512_v42  ;;  %vm5490_vm13 = vmmov %vm5484_vm4 }
 0x18b   : > { %v1852_v27 = vrot.slane %v3548_v8, 6  ;;  %v3852_v17 = vpop.f32.mrf.mxu0  ;;  %v2052_v52 = vshll.u32 %v4903_v20, 16  ;;  %v2050_v37 = vshrl.u32 %v4903_v20, 16  ;;  %v1513_v38 = vadd.f32 %v4749_v40, %v4652_v63  ;;  %vm5497_vm0 = vmmov %vm5484_vm4 }
 0x18c   : > { %v1805_v45 = vsel %vm4891_vm9, %v1795_v44, 0.0  ;;  %v1786_v56 = vadd.f32 %v4763_v12, %v1769_v3  ;;  %v1940_v0 = vrot.slane %v4924_v7, 1  ;;  %vm4975_vm9 = vmand %vm413_vm3, %vm423_vm15  ;;  %v405_v20 = vsel %vm4962_vm1, %v395_v9, %v4907_v25 }
 0x18d   : > { %v1853_v43 = vsel %vm4842_vm12, %v1851_v49, %v1852_v27  ;;  %v3549_v31 = vpack.c.bf16 %v1805_v45, %v1805_v45  ;;  %v1749_v18 = vpop.f32.mrf.mxu0  ;;  %v1854_v14 = vrot.slane %v1852_v27, 4  ;;  %v2054_v48 = vrot.slane %v2052_v52, 1  ;;  %vm4999_vm15 = vmand %vm414_vm7, %vm424_vm8 }
 0x18e   : > { %1887 = vst.msk [vmem:[#allocation2 + $0x14] sm:$0xf] %vm5481_vm14, %v1853_v43  ;;  %v1796_v22 = vmax.f32 %v1786_v56, 0.0  ;;  %v1770_v15 = vadd.f32 %v1749_v18, %v1629_v4  ;;  %vm5491_vm3 = vmmov 0   ;;  %v1632_v49 = vadd.f32 %v4758_v24, %v1513_v38  ;;  %vm5495_vm14 = vmmov %vm5484_vm4 }
 0x18f   : > { %v1855_v19 = vrot.slane %v3549_v31, 6  ;;  %v3855_v47 = vpop.f32.mrf.mxu0  ;;  %v2055_v63 = vor.u32 %v2054_v48, %v2050_v37  ;;  %vm415_vm7 = vcmp.ge.s32.totalorder %v405_v20, 1  ;;  %vm425_vm8 = vcmp.le.s32.totalorder %v405_v20, 8  ;;  %vm5499_vm1 = vmmov %vm5497_vm0 }
 0x190   : > { %v1806_v39 = vsel %vm431_vm11, %v1796_v22, 0.0  ;;  %v1787_v33 = vadd.f32 %v4763_v12, %v1770_v15  ;;  %vm5494_vm11 = vsmask.f32 7424  ;;  %vm435_vm5 = vmand %vm415_vm7, %vm425_vm8  ;;  %v2198_v20 = vshll.u32 %v4924_v7, 16 }
 0x191   : > { %v1856_v36 = vsel %vm4842_vm12, %v1854_v14, %v1855_v19  ;;  %v3550_v28 = vpack.c.bf16 %v1806_v39, %v1806_v39  ;;  %v1752_v32 = vpop.f32.mrf.mxu0  ;;  %v4944_v13 = vld [vmem:[#allocation2 + $0xc] sm:$0xff]   ;;  %v1857_v30 = vrot.slane %v1855_v19, 4  ;;  %vm5508_vm8 = vsmask.f32 6400 }
 0x192   : > { %1888 = vst.msk [vmem:[#allocation2 + $0x18] sm:$0xf] %vm5484_vm4, %v1856_v36  ;;  %v1797_v41 = vmax.f32 %v1787_v33, 0.0  ;;  %v1771_v34 = vadd.f32 %v1752_v32, %v1630_v2  ;;  %v1941_v50 = vrot.slane %v4944_v13, 1  ;;  %v2057_v16 = vshll.u32 %v4944_v13, 16  ;;  %vm5498_vm4 = vmmov %vm5494_vm11 }
 0x193   : > { %v1858_v29 = vrot.slane %v3550_v28, 6  ;;  %v3856_v53 = vpop.f32.mrf.mxu0  ;;  %v2061_v19 = vshrl.u32 %v4944_v13, 16  ;;  %vm5507_vm7 = vmmov %vm5498_vm4 }
 0x194   : > { %v1807_v11 = vsel %vm4934_vm6, %v1797_v41, 0.0  ;;  %v1788_v58 = vadd.f32 %v4763_v12, %v1771_v34  ;;  %v1942_v8 = vsel %vm5489_vm10, %v1940_v0, %v1941_v50  ;;  %v2059_v40 = vrot.slane %v2057_v16, 1  ;;  %vm5496_vm6 = vmmov %vm5489_vm10 }
 0x195   : > { %v1859_v61 = vsel %vm4842_vm12, %v1857_v30, %v1858_v29  ;;  %v3551_v5 = vpack.c.bf16 %v1807_v11, %v1807_v11  ;;  %v1757_v60 = vpop.f32.mrf.mxu0  ;;  %3864 = vmatmul.mubr.msk.bf16.vlgmr.msra.gmra.mxu1 %vm1957_vm2, %v1942_v8  ;;  %v1860_v21 = vrot.slane %v1858_v29, 4  ;;  %vm5501_vm10 = vmmov %vm5497_vm0 }
 0x196   : > { %1889 = vst.msk [vmem:[#allocation2 + $0x1c] sm:$0xf] %vm5490_vm13, %v1859_v61  ;;  %v1798_v59 = vmax.f32 %v1788_v58, 0.0  ;;  %v1772_v51 = vadd.f32 %v1757_v60, %v1631_v62  ;;  %3906 = vmatpush3.bf16.msra.mxu1 %v4120_v10  ;;  %3867 = vmatprep.mubr.msk.bf16.mxu1 %vm5491_vm3, %v4156_v1  ;;  %v2060_v25 = vsel %vm5494_vm11, %v2055_v63, %v2059_v40  ;;  %vm5502_vm13 = vcmask 123904   ;;  %vm5505_vm11 = vmmov %vm5498_vm4  ;;  %v5076_v63 = vld [vmem:[#allocation2 + $0x10] sm:$0xff]  }
 0x197   : > { %v1861_v44 = vrot.slane %v3551_v5, 6  ;;  %v3859_v3 = vpop.f32.mrf.mxu0  ;;  %3949 = vmatprep.subr.bf16.mxu1 %v4156_v1  ;;  %3886 = vmatmul.mubr.msk.bf16.vlgmr.msra.gmra.mxu0 %vm1957_vm2, %v2060_v25  ;;  %v2063_v33 = vor.u32 %v2061_v19, %v2059_v40  ;;  %v2202_v25 = vrot.slane %v2061_v19, 1 }
 0x198   : > { %v1808_v27 = vsel %vm4975_vm9, %v1798_v59, 0.0  ;;  %v1789_v26 = vadd.f32 %v4763_v12, %v1772_v51  ;;  %3889 = vmatprep.mubr.msk.bf16.mxu0 %vm5491_vm3, %v4156_v1  ;;  %3928 = vmatpush3.bf16.msra.mxu0 %v4125_v46  ;;  %vm5500_vm9 = vmmov %vm5496_vm6  ;;  %v5071_v59 = vld [vmem:[#allocation2 + $0xc] sm:$0xf]  ;;  %v2195_v3 = vshrl.u32 %v4924_v7, 16 }
 0x199   : > { %v1862_v24 = vsel %vm4842_vm12, %v1860_v21, %v1861_v44  ;;  %v3552_v4 = vpack.c.bf16 %v1808_v27, %v1808_v27  ;;  %v1760_v45 = vpop.f32.mrf.mxu0  ;;  %v5009_v56 = vld [vmem:[#allocation2 + $0x14] sm:$0xff]   ;;  %v1863_v43 = vrot.slane %v1861_v44, 4  ;;  %3971 = vmatprep.subr.bf16.mxu0 %v4156_v1  ;;  %v2331_v21 = vld [vmem:[#allocation2 + $0x8] sm:$0xe]  ;;  %v2385_v27 = vshll.u32 %v5076_v63, 16 }
 0x19a   : > { %1890 = vst.msk [vmem:[#allocation2 + $0x20] sm:$0xf] %vm5495_vm14, %v1862_v24  ;;  %v1799_v55 = vmax.f32 %v1789_v26, 0.0  ;;  %v1773_v6 = vadd.f32 %v1760_v45, %v1632_v49  ;;  %v1943_v22 = vrot.slane %v5009_v56, 1  ;;  %v2065_v15 = vshll.u32 %v5009_v56, 16  ;;  %vm5506_vm14 = vmmov %vm5496_vm6 }
 0x19b   : > { %v1864_v31 = vrot.slane %v3552_v4, 6  ;;  %v3860_v18 = vpop.f32.mrf.mxu0  ;;  %v2069_v0 = vshrl.u32 %v5009_v56, 16  ;;  %v3480_v44 = vcombine.low %v2331_v21, %v5071_v59  ;;  %v2382_v49 = vshrl.u32 %v5076_v63, 16 }
 0x19c   : > { %v1809_v52 = vsel %vm4999_vm15, %v1799_v55, 0.0  ;;  %v1790_v14 = vadd.f32 %v4763_v12, %v1773_v6  ;;  %v1944_v39 = vsel %vm5496_vm6, %v1941_v50, %v1943_v22  ;;  %v2067_v12 = vrot.slane %v2065_v15, 1  ;;  %vm5503_vm15 = vmmov %vm5498_vm4 }
 0x19d   : > { %v1865_v47 = vsel %vm4842_vm12, %v1863_v43, %v1864_v31  ;;  %v3553_v2 = vpack.c.bf16 %v1809_v52, %v1809_v52  ;;  %3868 = vmatmul.mubr.msk.bf16.gmra.mxu1 %vm1957_vm2, %v1944_v39  ;;  %v1866_v42 = vrot.slane %v1864_v31, 4  ;;  %v2203_v4 = vrot.slane %v2057_v16, 2  ;;  %v5100_v16 = vld [vmem:[#allocation2 + $0x18] sm:$0xff]  }
 0x19e   : > { %1891 = vst.msk [vmem:[#allocation2 + $0x24] sm:$0xf] %vm5497_vm0, %v1865_v47  ;;  %v1800_v23 = vmax.f32 %v1790_v14, 0.0  ;;  %3871 = vmatprep.mubr.msk.bf16.mxu1 %vm5491_vm3, %v4156_v1  ;;  %v2068_v32 = vsel %vm5498_vm4, %v2063_v33, %v2067_v12  ;;  %v2071_v50 = vor.u32 %v2069_v0, %v2067_v12  ;;  %v2374_v55 = vshrl.u32 %v3480_v44, 16  ;;  %v4126_v47 = vld [vmem:[%s5447_s3 + $0x20] sm:$0xff]  }
 0x19f   : > { %v1867_v36 = vrot.slane %v3553_v2, 6  ;;  %3890 = vmatmul.mubr.msk.bf16.gmra.mxu0 %vm1957_vm2, %v2068_v32  ;;  %v2377_v7 = vshll.u32 %v3480_v44, 16  ;;  %v2197_v6 = vrot.slane %v2195_v3, 1  ;;  %v2200_v43 = vrot.slane %v2198_v20, 2 }
 0x1a0   : > { %v1810_v28 = vsel %vm435_vm5, %v1800_v23, 0.0  ;;  %3893 = vmatprep.mubr.msk.bf16.mxu0 %vm5491_vm3, %v4156_v1  ;;  %v2384_v18 = vrot.slane %v2382_v49, 1  ;;  %v2387_v13 = vrot.slane %v2385_v27, 2  ;;  %v2376_v52 = vrot.slane %v2374_v55, 1  ;;  %vm5509_vm5 = vmmov %vm5508_vm8 }
 0x1a1   : > { %v1868_v9 = vsel %vm4842_vm12, %v1866_v42, %v1867_v36  ;;  %v3554_v41 = vpack.c.bf16 %v1810_v28, %v1810_v28  ;;  %v5036_v34 = vld [vmem:[#allocation2 + $0x1c] sm:$0xff]   ;;  %v1869_v48 = vrot.slane %v1867_v36, 4  ;;  %v2379_v14 = vrot.slane %v2377_v7, 2  ;;  %v4134_v28 = vld [vmem:[%s5447_s3 + $0x28] sm:$0xff]   ;;  %vm5511_vm0 = vmmov %vm5509_vm5 }
 0x1a2   : > { %1892 = vst.msk [vmem:[#allocation2 + $0x28] sm:$0xf] %vm5499_vm1, %v1868_v9  ;;  %v1945_v29 = vrot.slane %v5036_v34, 1  ;;  %v2073_v53 = vshll.u32 %v5036_v34, 16  ;;  %v2077_v37 = vshrl.u32 %v5036_v34, 16  ;;  %v2201_v19 = vor.u32 %v2200_v43, %v2197_v6  ;;  %vm5512_vm4 = vmmov %vm5511_vm0 }
 0x1a3   : > { %v1870_v30 = vrot.slane %v3554_v41, 6  ;;  %v2388_v2 = vor.u32 %v2387_v13, %v2384_v18  ;;  %v2391_v39 = vshrl.u32 %v5100_v16, 16  ;;  %v2394_v23 = vshll.u32 %v5100_v16, 16  ;;  %vm5513_vm1 = vmmov %vm5511_vm0  ;;  %v2530_v6 = vld [vmem:[#allocation2 + $0x8] sm:$0xc] }
 0x1a4   : > { %v1946_v11 = vsel %vm5500_vm9, %v1943_v22, %v1945_v29  ;;  %v2075_v58 = vrot.slane %v2073_v53, 1  ;;  %v2204_v22 = vor.u32 %v2203_v4, %v2202_v25  ;;  %v2206_v12 = vrot.slane %v2069_v0, 1  ;;  %vm5514_vm9 = vmmov %vm5511_vm0 }
 0x1a5   : > { %v1871_v10 = vsel %vm4842_vm12, %v1869_v48, %v1870_v30  ;;  %v1872_v62 = vrot.slane %v1870_v30, 4  ;;  %3872 = vmatmul.mubr.msk.bf16.gmra.mxu1 %vm1957_vm2, %v1946_v11  ;;  %vm5504_vm12 = vmmov %vm5496_vm6  ;;  %v2207_v42 = vrot.slane %v2065_v15, 2  ;;  %v2380_v36 = vor.u32 %v2379_v14, %v2376_v52  ;;  %v5126_v15 = vld [vmem:[#allocation2 + $0x20] sm:$0xff]  }
 0x1a6   : > { %1893 = vst.msk [vmem:[#allocation2 + $0x2c] sm:$0xf] %vm5501_vm10, %v1871_v10  ;;  %v2076_v57 = vsel %vm5503_vm15, %v2071_v50, %v2075_v58  ;;  %3875 = vmatprep.mubr.msk.bf16.mxu1 %vm5491_vm3, %v4156_v1  ;;  %v2079_v5 = vor.u32 %v2077_v37, %v2075_v58  ;;  %v2205_v33 = vsel %vm5508_vm8, %v2201_v19, %v2204_v22  ;;  %v2393_v9 = vrot.slane %v2391_v39, 1  ;;  %vm5510_vm6 = vmmov %vm5509_vm5 }
 0x1a7   : > { %1894 = vst.msk [vmem:[#allocation2 + $0x30] sm:$0x3] %vm5502_vm13, %v1872_v62  ;;  %3894 = vmatmul.mubr.msk.bf16.gmra.mxu0 %vm1957_vm2, %v2076_v57  ;;  %v2389_v32 = vsel %vm5509_vm5, %v2380_v36, %v2388_v2  ;;  %v2396_v56 = vrot.slane %v2394_v23, 2  ;;  %v2208_v41 = vor.u32 %v2207_v42, %v2206_v12  ;;  %v2400_v48 = vshrl.u32 %v5126_v15, 16  ;;  %vm5515_vm10 = vmmov %vm5511_vm0  ;;  %v4136_v12 = vld [vmem:[%s5447_s3 + $0x30] sm:$0xff]  }
 0x1a8   : > { %3897 = vmatprep.mubr.msk.bf16.mxu0 %vm5491_vm3, %v4156_v1  ;;  %v2403_v30 = vshll.u32 %v5126_v15, 16  ;;  %v2210_v50 = vrot.slane %v2077_v37, 1  ;;  %v2211_v10 = vrot.slane %v2073_v53, 2  ;;  %v3494_v43 = vcombine.low %v2530_v6, %v5071_v59  ;;  %vm5516_vm13 = vmmov %vm5511_vm0 }
 0x1a9   : > { %v5058_v35 = vld [vmem:[#allocation2 + $0x24] sm:$0xff]   ;;  %v2397_v0 = vor.u32 %v2396_v56, %v2393_v9  ;;  %v2402_v11 = vrot.slane %v2400_v48, 1  ;;  %vm5517_vm15 = vmmov %vm5511_vm0  ;;  %v2667_v14 = vrot.slane %v2382_v49, 2  ;;  %v2668_v19 = vrot.slane %v2385_v27, 3 }
 0x1aa   : > { %v1947_v38 = vrot.slane %v5058_v35, 1  ;;  %v2081_v61 = vshll.u32 %v5058_v35, 16  ;;  %v2085_v17 = vshrl.u32 %v5058_v35, 16  ;;  %v2405_v58 = vrot.slane %v2403_v30, 2 }
 0x1ab   : > { %v2398_v62 = vsel %vm5511_vm0, %v2388_v2, %v2397_v0  ;;  %v2212_v37 = vor.u32 %v2211_v10, %v2210_v50  ;;  %v2660_v13 = vshrl.u32 %v3494_v43, 16  ;;  %v2538_v59 = vrot.slane %v5076_v63, 2  ;;  %v4138_v63 = vld [vmem:[%s5447_s3 + $0x38] sm:$0xff]  }
 0x1ac   : > { %v1948_v54 = vsel %vm5504_vm12, %v1945_v29, %v1947_v38  ;;  %v2083_v60 = vrot.slane %v2081_v61, 1  ;;  %v2209_v29 = vsel %vm5510_vm6, %v2204_v22, %v2208_v41  ;;  %v2406_v34 = vor.u32 %v2405_v58, %v2402_v11 }
 0x1ad   : > { %v4124_v8 = vld [vmem:[#allocation2 + $0x2c] ss:$0 sps:$4 sm:$0x11]   ;;  %3876 = vmatmul.mubr.msk.bf16.gmra.mxu1 %vm1957_vm2, %v1948_v54  ;;  %v2214_v54 = vrot.slane %v2085_v17, 1  ;;  %v2663_v22 = vshll.u32 %v3494_v43, 16  ;;  %v2669_v42 = vor.u32 %v2668_v19, %v2667_v14  ;;  %vm5518_vm12 = vcmask 1045504  }
 0x1ae   : > { %v2084_v51 = vsel %vm5505_vm11, %v2079_v5, %v2083_v60  ;;  %3879 = vmatprep.mubr.msk.bf16.mxu1 %vm5491_vm3, %v4156_v1  ;;  %v2089_v40 = vshll.u32 %v4124_v8, 16  ;;  %v1949_v46 = vrot.slane %v4124_v8, 1  ;;  %v2087_v45 = vor.u32 %v2085_v17, %v2083_v60  ;;  %v5148_v57 = vld [vmem:[#allocation2 + $0x28] sm:$0xff]   ;;  %v5168_v21 = vld [vmem:[#allocation2 + $0x30] ss:$0 sps:$4 sm:$0x33]   ;;  %vm5522_vm8 = vmmov %vm5518_vm12 }
 0x1af   : > { %3898 = vmatmul.mubr.msk.bf16.gmra.mxu0 %vm1957_vm2, %v2084_v51  ;;  %v2409_v53 = vshrl.u32 %v5148_v57, 16  ;;  %v2213_v5 = vsel %vm5512_vm4, %v2208_v41, %v2212_v37  ;;  %v2215_v60 = vrot.slane %v2081_v61, 2  ;;  %v4132_v8 = vld [vmem:[#allocation2 + $0x2c] ss:$0 sps:$4 sm:$0x33]   ;;  %v2407_v51 = vsel %vm5513_vm1, %v2397_v0, %v2406_v34  ;;  %vm5524_vm6 = vmmov %vm5522_vm8  ;;  %v5283_v14 = vld [vmem:[#allocation2 + $0x24] sm:$0xff]  }
 0x1b0   : > { %3901 = vmatprep.mubr.msk.bf16.mxu0 %vm5491_vm3, %v4156_v1  ;;  %v2091_v26 = vrot.slane %v2089_v40, 1  ;;  %v1950_v24 = vsel %vm5506_vm14, %v1947_v38, %v1949_v46  ;;  %v2412_v38 = vshll.u32 %v5148_v57, 16  ;;  %v2219_v61 = vshrl.u32 %v4132_v8, 16  ;;  %vm5520_vm14 = vmmov %vm5518_vm12 }
 0x1b1   : > { %v2411_v40 = vrot.slane %v2409_v53, 1  ;;  %v2216_v35 = vor.u32 %v2215_v60, %v2214_v54  ;;  %v2222_v44 = vshll.u32 %v4132_v8, 16  ;;  %v2418_v20 = vshrl.u32 %v5168_v21, 16  ;;  %v5244_v54 = vld [vmem:[#allocation2 + $0x14] sm:$0xff]   ;;  %vm5526_vm4 = vmmov %vm5524_vm6 }
 0x1b2   : > { %v2092_v31 = vsel %vm5507_vm7, %v2087_v45, %v2091_v26  ;;  %v2414_v46 = vrot.slane %v2412_v38, 2  ;;  %v2421_v17 = vshll.u32 %v5168_v21, 16  ;;  %v2221_v25 = vrot.slane %v2219_v61, 1 }
 0x1b3   : > { %v2217_v26 = vsel %vm5514_vm9, %v2212_v37, %v2216_v35  ;;  %v2420_v45 = vrot.slane %v2418_v20, 1  ;;  %v2665_v2 = vrot.slane %v2663_v22, 3  ;;  %vm5519_vm11 = vsmask.f32 5376 }
 0x1b4   : > { %v2415_v3 = vor.u32 %v2414_v46, %v2411_v40  ;;  %v2423_v55 = vrot.slane %v2421_v17, 2  ;;  %v2540_v9 = vrot.slane %v5100_v16, 2  ;;  %vm5521_vm7 = vmmov %vm5519_vm11  ;;  %v2676_v16 = vrot.slane %v2403_v30, 3 }
 0x1b5   : > { %3880 = vmatmul.mubr.msk.bf16.gmra.mxu1 %vm1957_vm2, %v1950_v24  ;;  %v2224_v24 = vrot.slane %v2222_v44, 2  ;;  %v2542_v0 = vrot.slane %v5126_v15, 2  ;;  %vm5523_vm5 = vmmov %vm5521_vm7  ;;  %v2679_v30 = vrot.slane %v2409_v53, 2  ;;  %v2680_v10 = vrot.slane %v2412_v38, 3  ;;  %v2796_v53 = vld [vmem:[#allocation2 + $0xc] sm:$0xc] }
 0x1b6   : > { %3907 = vmatprep.mubr.msk.bf16.mxu1 %vm5491_vm3, %v4156_v1  ;;  %v2416_v4 = vsel %vm5515_vm10, %v2406_v34, %v2415_v3  ;;  %v2541_v41 = vsel %vm5520_vm14, %v2538_v59, %v2540_v9  ;;  %v4137_v15 = vld [vmem:[#allocation2 + $0x30] ss:$0 sps:$4 sm:$0x77]   ;;  %vm5525_vm0 = vmmov %vm5523_vm5  ;;  %v2847_v40 = vshrl.u32 %v5244_v54, 16  ;;  %v2850_v46 = vshll.u32 %v5244_v54, 16 }
 0x1b7   : > { %3902 = vmatmul.mubr.msk.bf16.gmra.mxu0 %vm1957_vm2, %v2092_v31  ;;  %v2225_v7 = vor.u32 %v2224_v24, %v2221_v25  ;;  %v2424_v31 = vor.u32 %v2423_v55, %v2420_v45  ;;  %v2543_v50 = vsel %vm5522_vm8, %v2540_v9, %v2542_v0  ;;  %v2681_v11 = vor.u32 %v2680_v10, %v2679_v30  ;;  %v2797_v34 = vld [vmem:[#allocation2 + $0x10] sm:$0xf]  ;;  %vm5527_vm1 = vmmov %vm5525_vm0  ;;  %v2995_v45 = vld [vmem:[#allocation2 + $0xc] sm:$0x8] }
 0x1b8   : > { %3929 = vmatprep.mubr.msk.bf16.mxu0 %vm5491_vm3, %v4156_v1  ;;  %v2684_v58 = vshrl.u32 %v4137_v15, 16  ;;  %v2687_v37 = vshll.u32 %v4137_v15, 16  ;;  %v3512_v38 = vcombine.low %v2796_v53, %v2797_v34  ;;  %v2849_v20 = vrot.slane %v2847_v40, 2  ;;  %vm5528_vm9 = vmmov %vm5525_vm0 }
 0x1b9   : > { %v2226_v18 = vsel %vm5516_vm13, %v2216_v35, %v2225_v7  ;;  %v2425_v52 = vsel %vm5517_vm15, %v2415_v3, %v2424_v31  ;;  %v2852_v17 = vrot.slane %v2850_v46, 3  ;;  %v5272_v6 = vcombine.low %v2995_v45, %v2797_v34  ;;  %v4141_v31 = vld [vmem:[%s5447_s3 + $0x40] sm:$0xff]   ;;  %vm5530_vm13 = vmmov %vm5525_vm0 }
 0x1ba   : > { %v2686_v60 = vrot.slane %v2684_v58, 2  ;;  %v2689_v8 = vrot.slane %v2687_v37, 3  ;;  %v2839_v35 = vshrl.u32 %v3512_v38, 16  ;;  %v2842_v61 = vshll.u32 %v3512_v38, 16  ;;  %vm5534_vm14 = vmmov %vm5525_vm0 }
 0x1bb   : > { %v3002_v19 = vrot.slane %v5272_v6, 3  ;;  %vm5529_vm10 = vcmask 1044480   ;;  %v3125_v37 = vshrl.u32 %v5272_v6, 16  ;;  %v3128_v34 = vshll.u32 %v5272_v6, 16  ;;  %vm5536_vm8 = vmmov %vm5525_vm0 }
 0x1bc   : > { %v2690_v44 = vor.u32 %v2689_v8, %v2686_v60  ;;  %v2844_v25 = vrot.slane %v2842_v61, 3  ;;  %vm5531_vm15 = vmmov %vm5529_vm10  ;;  %v3132_v38 = vrot.slane %v2847_v40, 3 }
 0x1bd   : > { %3908 = vmatmul.mubr.msk.bf16.vlgmr.msra.gmra.mxu1 %vm1957_vm2, %v2205_v33  ;;  %v2537_v33 = vrot.slane %v3494_v43, 2  ;;  %v3127_v60 = vrot.slane %v3125_v37, 3  ;;  %v3130_v8 = vrot.slane %v3128_v34, 4 }
 0x1be   : > { %3950 = vmatpush3.bf16.msra.mxu1 %v4126_v47  ;;  %3911 = vmatprep.mubr.msk.bf16.mxu1 %vm5491_vm3, %v4156_v1  ;;  %v2662_v47 = vrot.slane %v2660_v13, 2  ;;  %v2691_v24 = vsel %vm5527_vm1, %v2681_v11, %v2690_v44 }
 0x1bf   : > { %3993 = vmatprep.subr.bf16.mxu1 %v4156_v1  ;;  %3930 = vmatmul.mubr.msk.bf16.vlgmr.msra.gmra.mxu0 %vm1957_vm2, %v2389_v32  ;;  %v2539_v49 = vsel %vm5518_vm12, %v2537_v33, %v2538_v59  ;;  %v2672_v32 = vrot.slane %v2394_v23, 3  ;;  %v2675_v23 = vrot.slane %v2400_v48, 2  ;;  %v2868_v33 = vshll.u32 %v5283_v14, 16  ;;  %vm5532_vm12 = vmmov %vm5525_vm0 }
 0x1c0   : > { %3933 = vmatprep.mubr.msk.bf16.mxu0 %vm5491_vm3, %v4156_v1  ;;  %3972 = vmatpush3.bf16.msra.mxu0 %v4134_v28  ;;  %v2666_v27 = vor.u32 %v2665_v2, %v2662_v47  ;;  %v2671_v28 = vrot.slane %v2391_v39, 2  ;;  %v2865_v2 = vshrl.u32 %v5283_v14, 16  ;;  %v3131_v61 = vor.u32 %v3130_v8, %v3127_v60 }
 0x1c1   : > { %4015 = vmatprep.subr.bf16.mxu0 %v4156_v1 }
 0x1c2   : > { %v2670_v36 = vsel %vm5519_vm11, %v2666_v27, %v2669_v42  ;;  %v2673_v56 = vor.u32 %v2672_v32, %v2671_v28  ;;  %v2870_v27 = vrot.slane %v2868_v33, 3  ;;  %vm5533_vm11 = vmmov %vm5529_vm10 }
 0x1c4   : > { %v2674_v39 = vsel %vm5521_vm7, %v2669_v42, %v2673_v56  ;;  %vm5535_vm7 = vmmov %vm5529_vm10 }
 0x1c5   : > { %3912 = vmatmul.mubr.msk.bf16.gmra.mxu1 %vm1957_vm2, %v2209_v29  ;;  %v2677_v29 = vor.u32 %v2676_v16, %v2675_v23  ;;  %v4146_v16 = vld [vmem:[#allocation2 + $0x34] ss:$0 sps:$4 sm:$0x77]  }
 0x1c6   : > { %3915 = vmatprep.mubr.msk.bf16.mxu1 %vm5491_vm3, %v4156_v1 }
 0x1c7   : > { %3934 = vmatmul.mubr.msk.bf16.gmra.mxu0 %vm1957_vm2, %v2398_v62  ;;  %v2678_v48 = vsel %vm5523_vm5, %v2673_v56, %v2677_v29  ;;  %v2544_v62 = vrot.slane %v5148_v57, 2  ;;  %v2682_v57 = vsel %vm5525_vm0, %v2677_v29, %v2681_v11  ;;  %v3007_v56 = vrot.slane %v5283_v14, 3  ;;  %vm5537_vm5 = vmmov %vm5535_vm7 }
 0x1c8   : > { %3937 = vmatprep.mubr.msk.bf16.mxu0 %vm5491_vm3, %v4156_v1 }
 0x1cd   : > { %3916 = vmatmul.mubr.msk.bf16.gmra.mxu1 %vm1957_vm2, %v2213_v5  ;;  %v2545_v5 = vsel %vm5524_vm6, %v2542_v0, %v2544_v62  ;;  %vm5538_vm6 = vsmask.f32 4352 }
 0x1ce   : > { %3919 = vmatprep.mubr.msk.bf16.mxu1 %vm5491_vm3, %v4156_v1  ;;  %vm5539_vm0 = vmmov %vm5538_vm6 }
 0x1cf   : > { %3938 = vmatmul.mubr.msk.bf16.gmra.mxu0 %vm1957_vm2, %v2407_v51  ;;  %v2546_v51 = vrot.slane %v5168_v21, 2  ;;  %v2841_v21 = vrot.slane %v2839_v35, 2  ;;  %vm5541_vm1 = vmmov %vm5539_vm0 }
 0x1d0   : > { %3941 = vmatprep.mubr.msk.bf16.mxu0 %vm5491_vm3, %v4156_v1 }
 0x1d1   : > { %v2547_v3 = vsel %vm5526_vm4, %v2544_v62, %v2546_v51  ;;  %v2845_v43 = vor.u32 %v2844_v25, %v2841_v21  ;;  %vm5540_vm4 = vmmov %vm5539_vm0 }
 0x1d5   : > { %3920 = vmatmul.mubr.msk.bf16.gmra.mxu1 %vm1957_vm2, %v2217_v26  ;;  %v5261_v26 = vld [vmem:[#allocation2 + $0x1c] sm:$0xff]  }
 0x1d6   : > { %3923 = vmatprep.mubr.msk.bf16.mxu1 %vm5491_vm3, %v4156_v1  ;;  %v2856_v55 = vshrl.u32 %v5261_v26, 16  ;;  %v2859_v7 = vshll.u32 %v5261_v26, 16 }
 0x1d7   : > { %3942 = vmatmul.mubr.msk.bf16.gmra.mxu0 %vm1957_vm2, %v2416_v4  ;;  %v2853_v4 = vor.u32 %v2852_v17, %v2849_v20  ;;  %v3140_v20 = vrot.slane %v2865_v2, 3  ;;  %v3141_v17 = vrot.slane %v2868_v33, 4 }
 0x1d8   : > { %3945 = vmatprep.mubr.msk.bf16.mxu0 %vm5491_vm3, %v4156_v1  ;;  %v2858_v22 = vrot.slane %v2856_v55, 2  ;;  %v3136_v40 = vrot.slane %v2856_v55, 3 }
 0x1d9   : > { %v2854_v13 = vsel %vm5528_vm9, %v2845_v43, %v2853_v4  ;;  %v3142_v21 = vor.u32 %v3141_v17, %v3140_v20  ;;  %vm5542_vm9 = vmmov %vm5539_vm0 }
 0x1dd   : > { %3924 = vmatmul.mubr.msk.bf16.gmra.mxu1 %vm1957_vm2, %v2226_v18  ;;  %v3003_v18 = vrot.slane %v5244_v54, 3  ;;  %v3137_v54 = vrot.slane %v2859_v7, 4 }
 0x1de   : > { %3951 = vmatprep.mubr.msk.bf16.mxu1 %vm5491_vm3, %v4156_v1 }
 0x1df   : > { %3946 = vmatmul.mubr.msk.bf16.gmra.mxu0 %vm1957_vm2, %v2425_v52  ;;  %v2861_v52 = vrot.slane %v2859_v7, 3  ;;  %v3004_v59 = vsel %vm5529_vm10, %v3002_v19, %v3003_v18 }
 0x1e0   : > { %3973 = vmatprep.mubr.msk.bf16.mxu0 %vm5491_vm3, %v4156_v1 }
 0x1e1   : > { %v2862_v47 = vor.u32 %v2861_v52, %v2858_v22 }
 0x1e3   : > { %v2863_v42 = vsel %vm5530_vm13, %v2853_v4, %v2862_v47  ;;  %v4147_v4 = vld [vmem:[#allocation2 + $0x34] ss:$0 sps:$4 sm:$0xff]  }
 0x1e4   : > { %v3149_v55 = vshrl.u32 %v4147_v4, 16  ;;  %v3152_v7 = vshll.u32 %v4147_v4, 16 }
 0x1e5   : > { %3952 = vmatmul.mubr.msk.bf16.vlgmr.msra.gmra.mxu1 %vm1957_vm2, %v2539_v49  ;;  %v2867_v49 = vrot.slane %v2865_v2, 2 }
 0x1e6   : > { %3994 = vmatpush3.bf16.msra.mxu1 %v4136_v12  ;;  %3955 = vmatprep.mubr.msk.bf16.mxu1 %vm5491_vm3, %v4156_v1  ;;  %v3005_v12 = vrot.slane %v5261_v26, 3  ;;  %v3151_v43 = vrot.slane %v3149_v55, 3 }
 0x1e7   : > { %4037 = vmatprep.subr.bf16.mxu1 %v4156_v1  ;;  %3974 = vmatmul.mubr.msk.bf16.vlgmr.msra.gmra.mxu0 %vm1957_vm2, %v2670_v36  ;;  %v2871_v28 = vor.u32 %v2870_v27, %v2867_v49 }
 0x1e8   : > { %3977 = vmatprep.mubr.msk.bf16.mxu0 %vm5491_vm3, %v4156_v1  ;;  %4016 = vmatpush3.bf16.msra.mxu0 %v4138_v63  ;;  %v4145_v63 = vld [vmem:[#allocation2 + $0x2c] sm:$0xff]   ;;  %v3006_v36 = vsel %vm5531_vm15, %v3003_v18, %v3005_v12  ;;  %v3008_v0 = vsel %vm5533_vm11, %v3005_v12, %v3007_v56 }
 0x1e9   : > { %v2874_v32 = vshrl.u32 %v4145_v63, 16  ;;  %v2877_v9 = vshll.u32 %v4145_v63, 16  ;;  %v3009_v30 = vrot.slane %v4145_v63, 3 }
 0x1eb   : > { %v2879_v23 = vrot.slane %v2877_v9, 3  ;;  %v3010_v11 = vsel %vm5535_vm7, %v3007_v56, %v3009_v30  ;;  %v3144_v26 = vrot.slane %v2874_v32, 3 }
 0x1ed   : > { %3956 = vmatmul.mubr.msk.bf16.gmra.mxu1 %vm1957_vm2, %v2541_v41  ;;  %v2872_v41 = vsel %vm5532_vm12, %v2862_v47, %v2871_v28 }
 0x1ee   : > { %3959 = vmatprep.mubr.msk.bf16.mxu1 %vm5491_vm3, %v4156_v1 }
 0x1ef   : > { %3978 = vmatmul.mubr.msk.bf16.gmra.mxu0 %vm1957_vm2, %v2674_v39  ;;  %v2876_v39 = vrot.slane %v2874_v32, 2 }
 0x1f0   : > { %3981 = vmatprep.mubr.msk.bf16.mxu0 %vm5491_vm3, %v4156_v1 }
 0x1f1   : > { %v2880_v29 = vor.u32 %v2879_v23, %v2876_v39 }
 0x1f3   : > { %v2881_v10 = vsel %vm5534_vm14, %v2871_v28, %v2880_v29 }
 0x1f5   : > { %3960 = vmatmul.mubr.msk.bf16.gmra.mxu1 %vm1957_vm2, %v2543_v50  ;;  %v2883_v50 = vshrl.u32 %v4146_v16, 16 }
 0x1f6   : > { %3963 = vmatprep.mubr.msk.bf16.mxu1 %vm5491_vm3, %v4156_v1 }
 0x1f7   : > { %3982 = vmatmul.mubr.msk.bf16.gmra.mxu0 %vm1957_vm2, %v2678_v48  ;;  %v2886_v48 = vshll.u32 %v4146_v16, 16  ;;  %v2885_v15 = vrot.slane %v2883_v50, 2 }
 0x1f8   : > { %3985 = vmatprep.mubr.msk.bf16.mxu0 %vm5491_vm3, %v4156_v1 }
 0x1f9   : > { %v2888_v62 = vrot.slane %v2886_v48, 3 }
 0x1fb   : > { %v2889_v58 = vor.u32 %v2888_v62, %v2885_v15 }
 0x1fd   : > { %3964 = vmatmul.mubr.msk.bf16.gmra.mxu1 %vm1957_vm2, %v2545_v5  ;;  %v3011_v5 = vrot.slane %v4146_v16, 3  ;;  %v2890_v53 = vsel %vm5536_vm8, %v2880_v29, %v2889_v58 }
 0x1fe   : > { %3967 = vmatprep.mubr.msk.bf16.mxu1 %vm5491_vm3, %v4156_v1 }
 0x1ff   : > { %3986 = vmatmul.mubr.msk.bf16.gmra.mxu0 %vm1957_vm2, %v2682_v57  ;;  %v3133_v57 = vrot.slane %v2850_v46, 4  ;;  %v3012_v51 = vsel %vm5537_vm5, %v3009_v30, %v3011_v5  ;;  %v3138_v46 = vor.u32 %v3137_v54, %v3136_v40 }
 0x200   : > { %3989 = vmatprep.mubr.msk.bf16.mxu0 %vm5491_vm3, %v4156_v1 }
 0x201   : > { %v3134_v35 = vor.u32 %v3133_v57, %v3132_v38  ;;  %v3143_v25 = vsel %vm5540_vm4, %v3138_v46, %v3142_v21 }
 0x203   : > { %v3135_v44 = vsel %vm5538_vm6, %v3131_v61, %v3134_v35 }
 0x205   : > { %3968 = vmatmul.mubr.msk.bf16.gmra.mxu1 %vm1957_vm2, %v2547_v3  ;;  %v3139_v3 = vsel %vm5539_vm0, %v3134_v35, %v3138_v46 }
 0x206   : > { %3995 = vmatprep.mubr.msk.bf16.mxu1 %vm5491_vm3, %v4156_v1 }
 0x207   : > { %3990 = vmatmul.mubr.msk.bf16.gmra.mxu0 %vm1957_vm2, %v2691_v24  ;;  %v3145_v24 = vrot.slane %v2877_v9, 4 }
 0x208   : > { %4017 = vmatprep.mubr.msk.bf16.mxu0 %vm5491_vm3, %v4156_v1 }
 0x209   : > { %v3146_v45 = vor.u32 %v3145_v24, %v3144_v26 }
 0x20b   : > { %v3147_v6 = vsel %vm5541_vm1, %v3142_v21, %v3146_v45 }
 0x20d   : > { %3996 = vmatmul.mubr.msk.bf16.vlgmr.msra.gmra.mxu1 %vm1957_vm2, %v2854_v13 }
 0x20e   : > { %4038 = vmatpush3.bf16.msra.mxu1 %v4141_v31  ;;  %3999 = vmatprep.mubr.msk.bf16.mxu1 %vm5491_vm3, %v4156_v1  ;;  %v3154_v31 = vrot.slane %v3152_v7, 4 }
 0x20f   : > { %4018 = vmatmul.mubr.msk.bf16.vlgmr.msra.gmra.mxu0 %vm1957_vm2, %v3004_v59 }
 0x210   : > { %4021 = vmatprep.mubr.msk.bf16.mxu0 %vm5491_vm3, %v4156_v1  ;;  %v3155_v18 = vor.u32 %v3154_v31, %v3151_v43 }
 0x212   : > { %v3156_v13 = vsel %vm5542_vm9, %v3146_v45, %v3155_v18 }
 0x215   : > { %4000 = vmatmul.mubr.msk.bf16.gmra.mxu1 %vm1957_vm2, %v2863_v42 }
 0x216   : > { %4003 = vmatprep.mubr.msk.bf16.mxu1 %vm5491_vm3, %v4156_v1 }
 0x217   : > { %4022 = vmatmul.mubr.msk.bf16.gmra.mxu0 %vm1957_vm2, %v3006_v36 }
 0x218   : > { %4025 = vmatprep.mubr.msk.bf16.mxu0 %vm5491_vm3, %v4156_v1 }
 0x21d   : > { %4004 = vmatmul.mubr.msk.bf16.gmra.mxu1 %vm1957_vm2, %v2872_v41 }
 0x21e   : > { %4007 = vmatprep.mubr.msk.bf16.mxu1 %vm5491_vm3, %v4156_v1 }
 0x21f   : > { %4026 = vmatmul.mubr.msk.bf16.gmra.mxu0 %vm1957_vm2, %v3008_v0 }
 0x220   : > { %4029 = vmatprep.mubr.msk.bf16.mxu0 %vm5491_vm3, %v4156_v1 }
 0x225   : > { %4008 = vmatmul.mubr.msk.bf16.gmra.mxu1 %vm1957_vm2, %v2881_v10 }
 0x226   : > { %4011 = vmatprep.mubr.msk.bf16.mxu1 %vm5491_vm3, %v4156_v1 }
 0x227   : > { %4030 = vmatmul.mubr.msk.bf16.gmra.mxu0 %vm1957_vm2, %v3010_v11 }
 0x228   : > { %4033 = vmatprep.mubr.msk.bf16.mxu0 %vm5491_vm3, %v4156_v1 }
 0x22d   : > { %4012 = vmatmul.mubr.msk.bf16.gmra.mxu1 %vm1957_vm2, %v2890_v53 }
 0x22e   : > { %4039 = vmatprep.mubr.msk.bf16.mxu1 %vm5491_vm3, %v4156_v1 }
 0x22f   : > { %4034 = vmatmul.mubr.msk.bf16.gmra.mxu0 %vm1957_vm2, %v3012_v51 }
 0x235   : > { %4040 = vmatmul.mubr.msk.bf16.vlgmr.msra.gmra.mxu1 %vm1957_vm2, %v3135_v44 }
 0x236   : > { %4043 = vmatprep.mubr.msk.bf16.mxu1 %vm5491_vm3, %v4156_v1 }
 0x23d   : > { %4044 = vmatmul.mubr.msk.bf16.gmra.mxu1 %vm1957_vm2, %v3139_v3 }
 0x23e   : > { %4047 = vmatprep.mubr.msk.bf16.mxu1 %vm5491_vm3, %v4156_v1 }
 0x245   : > { %4048 = vmatmul.mubr.msk.bf16.gmra.mxu1 %vm1957_vm2, %v3143_v25 }
 0x246   : > { %4051 = vmatprep.mubr.msk.bf16.mxu1 %vm5491_vm3, %v4156_v1 }
 0x24d   : > { %4052 = vmatmul.mubr.msk.bf16.gmra.mxu1 %vm1957_vm2, %v3147_v6 }
 0x24e   : > { %4055 = vmatprep.mubr.msk.bf16.mxu1 %vm5491_vm3, %v4156_v1 }
 0x255   : > { %v2007_v22 = vpop.f32.mrf.mxu1  ;;  %4056 = vmatmul.mubr.msk.bf16.gmra.mxu1 %vm1957_vm2, %v3156_v13 }
 0x257   : > { %v3865_v52 = vpop.f32.mrf.mxu1  ;;  %v2148_v14 = vpop.f32.mrf.mxu0 }
 0x258   : > { %v2149_v19 = vadd.f32 %v2148_v14, %v2007_v22 }
 0x259   : > { %v2010_v59 = vpop.f32.mrf.mxu1  ;;  %v3887_v47 = vpop.f32.mrf.mxu0 }
 0x25b   : > { %v3866_v2 = vpop.f32.mrf.mxu1  ;;  %v2151_v33 = vpop.f32.mrf.mxu0 }
 0x25c   : > { %v2152_v12 = vadd.f32 %v2151_v33, %v2010_v59 }
 0x25d   : > { %v2015_v42 = vpop.f32.mrf.mxu1  ;;  %v3888_v49 = vpop.f32.mrf.mxu0 }
 0x25f   : > { %v3869_v27 = vpop.f32.mrf.mxu1  ;;  %v2156_v63 = vpop.f32.mrf.mxu0 }
 0x260   : > { %v2157_v36 = vadd.f32 %v2156_v63, %v2015_v42 }
 0x261   : > { %v2018_v1 = vpop.f32.mrf.mxu1  ;;  %v3891_v28 = vpop.f32.mrf.mxu0 }
 0x263   : > { %v3870_v32 = vpop.f32.mrf.mxu1  ;;  %v2159_v9 = vpop.f32.mrf.mxu0 }
 0x264   : > { %v2160_v56 = vadd.f32 %v2159_v9, %v2018_v1 }
 0x265   : > { %v2023_v41 = vpop.f32.mrf.mxu1  ;;  %v3892_v39 = vpop.f32.mrf.mxu0 }
 0x267   : > { %v3873_v23 = vpop.f32.mrf.mxu1  ;;  %v2164_v16 = vpop.f32.mrf.mxu0 }
 0x268   : > { %v2165_v0 = vadd.f32 %v2164_v16, %v2023_v41 }
 0x269   : > { %v2026_v29 = vpop.f32.mrf.mxu1  ;;  %v3895_v50 = vpop.f32.mrf.mxu0 }
 0x26b   : > { %v3874_v48 = vpop.f32.mrf.mxu1  ;;  %v2167_v30 = vpop.f32.mrf.mxu0 }
 0x26c   : > { %v2168_v10 = vadd.f32 %v2167_v30, %v2026_v29 }
 0x26d   : > { %v2031_v15 = vpop.f32.mrf.mxu1  ;;  %v3896_v62 = vpop.f32.mrf.mxu0 }
 0x26f   : > { %v3877_v11 = vpop.f32.mrf.mxu1  ;;  %v2172_v58 = vpop.f32.mrf.mxu0 }
 0x270   : > { %v2173_v37 = vadd.f32 %v2172_v58, %v2031_v15 }
 0x271   : > { %v2034_v34 = vpop.f32.mrf.mxu1  ;;  %v3899_v5 = vpop.f32.mrf.mxu0 }
 0x273   : > { %v3878_v53 = vpop.f32.mrf.mxu1  ;;  %v2175_v38 = vpop.f32.mrf.mxu0 }
 0x274   : > { %v2176_v57 = vadd.f32 %v2175_v38, %v2034_v34 }
 0x275   : > { %v2039_v60 = vpop.f32.mrf.mxu1  ;;  %v3900_v8 = vpop.f32.mrf.mxu0 }
 0x277   : > { %v3881_v51 = vpop.f32.mrf.mxu1  ;;  %v2180_v35 = vpop.f32.mrf.mxu0 }
 0x278   : > { %v2181_v61 = vadd.f32 %v2180_v35, %v2039_v60 }
 0x279   : > { %v2042_v44 = vpop.f32.mrf.mxu1  ;;  %v3903_v40 = vpop.f32.mrf.mxu0 }
 0x27b   : > { %v3882_v54 = vpop.f32.mrf.mxu1  ;;  %v2183_v46 = vpop.f32.mrf.mxu0 }
 0x27c   : > { %v2184_v3 = vadd.f32 %v2183_v46, %v2042_v44 }
 0x27d   : > { %v2282_v20 = vpop.f32.mrf.mxu1  ;;  %v3904_v17 = vpop.f32.mrf.mxu0 }
 0x27e   : > { %v2321_v21 = vadd.f32 %v2282_v20, %v2149_v19 }
 0x27f   : > { %v3909_v25 = vpop.f32.mrf.mxu1  ;;  %v2481_v26 = vpop.f32.mrf.mxu0 }
 0x280   : > { %v2520_v24 = vadd.f32 %v2481_v26, %v2321_v21 }
 0x281   : > { %v2285_v4 = vpop.f32.mrf.mxu1  ;;  %v3931_v55 = vpop.f32.mrf.mxu0 }
 0x282   : > { %v2322_v45 = vadd.f32 %v2285_v4, %v2152_v12 }
 0x283   : > { %v3910_v7 = vpop.f32.mrf.mxu1  ;;  %v2484_v6 = vpop.f32.mrf.mxu0 }
 0x284   : > { %v2521_v43 = vadd.f32 %v2484_v6, %v2322_v45 }
 0x285   : > { %v2290_v31 = vpop.f32.mrf.mxu1  ;;  %v3932_v13 = vpop.f32.mrf.mxu0 }
 0x286   : > { %v2323_v18 = vadd.f32 %v2290_v31, %v2157_v36 }
 0x287   : > { %v3913_v22 = vpop.f32.mrf.mxu1  ;;  %v2489_v52 = vpop.f32.mrf.mxu0 }
 0x288   : > { %v2522_v14 = vadd.f32 %v2489_v52, %v2323_v18 }
 0x289   : > { %v2293_v59 = vpop.f32.mrf.mxu1  ;;  %v3935_v2 = vpop.f32.mrf.mxu0 }
 0x28a   : > { %v2324_v47 = vadd.f32 %v2293_v59, %v2160_v56 }
 0x28b   : > { %v3914_v33 = vpop.f32.mrf.mxu1  ;;  %v2492_v19 = vpop.f32.mrf.mxu0 }
 0x28c   : > { %v2523_v42 = vadd.f32 %v2492_v19, %v2324_v47 }
 0x28d   : > { %v2298_v49 = vpop.f32.mrf.mxu1  ;;  %v3936_v63 = vpop.f32.mrf.mxu0 }
 0x28e   : > { %v2325_v27 = vadd.f32 %v2298_v49, %v2165_v0 }
 0x28f   : > { %v3917_v12 = vpop.f32.mrf.mxu1  ;;  %v2497_v1 = vpop.f32.mrf.mxu0 }
 0x290   : > { %v2524_v28 = vadd.f32 %v2497_v1, %v2325_v27 }
 0x291   : > { %v2301_v32 = vpop.f32.mrf.mxu1  ;;  %v3939_v41 = vpop.f32.mrf.mxu0 }
 0x292   : > { %v2326_v9 = vadd.f32 %v2301_v32, %v2168_v10 }
 0x293   : > { %v3918_v36 = vpop.f32.mrf.mxu1  ;;  %v2500_v39 = vpop.f32.mrf.mxu0 }
 0x294   : > { %v2525_v23 = vadd.f32 %v2500_v39, %v2326_v9 }
 0x295   : > { %v2306_v16 = vpop.f32.mrf.mxu1  ;;  %v3940_v50 = vpop.f32.mrf.mxu0 }
 0x296   : > { %v2327_v29 = vadd.f32 %v2306_v16, %v2173_v37 }
 0x297   : > { %v3921_v56 = vpop.f32.mrf.mxu1  ;;  %v2505_v48 = vpop.f32.mrf.mxu0 }
 0x298   : > { %v2526_v30 = vadd.f32 %v2505_v48, %v2327_v29 }
 0x299   : > { %v2309_v15 = vpop.f32.mrf.mxu1  ;;  %v3943_v11 = vpop.f32.mrf.mxu0 }
 0x29a   : > { %v2328_v62 = vadd.f32 %v2309_v15, %v2176_v57 }
 0x29b   : > { %v3922_v0 = vpop.f32.mrf.mxu1  ;;  %v2508_v58 = vpop.f32.mrf.mxu0 }
 0x29c   : > { %v2527_v34 = vadd.f32 %v2508_v58, %v2328_v62 }
 0x29d   : > { %v2314_v5 = vpop.f32.mrf.mxu1  ;;  %v3944_v38 = vpop.f32.mrf.mxu0 }
 0x29e   : > { %v2329_v53 = vadd.f32 %v2314_v5, %v2181_v61 }
 0x29f   : > { %v3925_v10 = vpop.f32.mrf.mxu1  ;;  %v2513_v60 = vpop.f32.mrf.mxu0 }
 0x2a0   : > { %v2528_v8 = vadd.f32 %v2513_v60, %v2329_v53 }
 0x2a1   : > { %v2317_v51 = vpop.f32.mrf.mxu1  ;;  %v3947_v44 = vpop.f32.mrf.mxu0 }
 0x2a2   : > { %v2330_v35 = vadd.f32 %v2317_v51, %v2184_v3 }
 0x2a3   : > { %v3926_v37 = vpop.f32.mrf.mxu1  ;;  %v2516_v40 = vpop.f32.mrf.mxu0 }
 0x2a4   : > { %v2529_v54 = vadd.f32 %v2516_v40, %v2330_v35 }
 0x2a5   : > { %v2603_v46 = vpop.f32.mrf.mxu1  ;;  %v3948_v20 = vpop.f32.mrf.mxu0 }
 0x2a6   : > { %v2642_v17 = vadd.f32 %v2603_v46, %v2520_v24 }
 0x2a7   : > { %v3953_v57 = vpop.f32.mrf.mxu1  ;;  %v2747_v21 = vpop.f32.mrf.mxu0 }
 0x2a8   : > { %v5355_v25 = vadd.f32 %v2747_v21, %v2642_v17 }
 0x2a9   : > { %v2606_v26 = vpop.f32.mrf.mxu1  ;;  %v3975_v61 = vpop.f32.mrf.mxu0 }
 0x2aa   : > { %v2643_v4 = vadd.f32 %v2606_v26, %v2521_v43 }
 0x2ab   : > { %v3954_v45 = vpop.f32.mrf.mxu1  ;;  %v2750_v55 = vpop.f32.mrf.mxu0 }
 0x2ac   : > { %v5357_v7 = vadd.f32 %v2750_v55, %v2643_v4 }
 0x2ad   : > { %v2611_v6 = vpop.f32.mrf.mxu1  ;;  %v3976_v31 = vpop.f32.mrf.mxu0 }
 0x2ae   : > { %v2644_v3 = vadd.f32 %v2611_v6, %v2522_v14 }
 0x2af   : > { %v3957_v18 = vpop.f32.mrf.mxu1  ;;  %v2755_v13 = vpop.f32.mrf.mxu0 }
 0x2b0   : > { %v5359_v22 = vadd.f32 %v2755_v13, %v2644_v3 }
 0x2b1   : > { %v2614_v52 = vpop.f32.mrf.mxu1  ;;  %v3979_v59 = vpop.f32.mrf.mxu0 }
 0x2b2   : > { %v2645_v24 = vadd.f32 %v2614_v52, %v2523_v42 }
 0x2b3   : > { %v3958_v47 = vpop.f32.mrf.mxu1  ;;  %v2758_v2 = vpop.f32.mrf.mxu0 }
 0x2b4   : > { %v5361_v33 = vadd.f32 %v2758_v2, %v2645_v24 }
 0x2b5   : > { %v2619_v43 = vpop.f32.mrf.mxu1  ;;  %v3980_v49 = vpop.f32.mrf.mxu0 }
 0x2b6   : > { %v2646_v19 = vadd.f32 %v2619_v43, %v2524_v28 }
 0x2b7   : > { %v3961_v27 = vpop.f32.mrf.mxu1  ;;  %v2763_v63 = vpop.f32.mrf.mxu0 }
 0x2b8   : > { %v5363_v12 = vadd.f32 %v2763_v63, %v2646_v19 }
 0x2b9   : > { %v2622_v14 = vpop.f32.mrf.mxu1  ;;  %v3983_v32 = vpop.f32.mrf.mxu0 }
 0x2ba   : > { %v2647_v1 = vadd.f32 %v2622_v14, %v2525_v23 }
 0x2bb   : > { %v3962_v9 = vpop.f32.mrf.mxu1  ;;  %v2766_v41 = vpop.f32.mrf.mxu0 }
 0x2bc   : > { %v5365_v36 = vadd.f32 %v2766_v41, %v2647_v1 }
 0x2bd   : > { %v2627_v42 = vpop.f32.mrf.mxu1  ;;  %v3984_v16 = vpop.f32.mrf.mxu0 }
 0x2be   : > { %v2648_v39 = vadd.f32 %v2627_v42, %v2526_v30 }
 0x2bf   : > { %v3965_v29 = vpop.f32.mrf.mxu1  ;;  %v2771_v50 = vpop.f32.mrf.mxu0 }
 0x2c0   : > { %v5367_v56 = vadd.f32 %v2771_v50, %v2648_v39 }
 0x2c1   : > { %v2630_v28 = vpop.f32.mrf.mxu1  ;;  %v3987_v15 = vpop.f32.mrf.mxu0 }
 0x2c2   : > { %v2649_v48 = vadd.f32 %v2630_v28, %v2527_v34 }
 0x2c3   : > { %v3966_v62 = vpop.f32.mrf.mxu1  ;;  %v2774_v11 = vpop.f32.mrf.mxu0 }
 0x2c4   : > { %v5369_v0 = vadd.f32 %v2774_v11, %v2649_v48 }
 0x2c5   : > { %v2635_v23 = vpop.f32.mrf.mxu1  ;;  %v3988_v5 = vpop.f32.mrf.mxu0 }
 0x2c6   : > { %v2650_v58 = vadd.f32 %v2635_v23, %v2528_v8  ;;  %v5391_v23 = vld [vmem:[%s5448_s4] ss:$0 sm:$0xff] }
 0x2c7   : > { %v3969_v53 = vpop.f32.mrf.mxu1  ;;  %v2779_v38 = vpop.f32.mrf.mxu0 }
 0x2c8   : > { %v5371_v10 = vadd.f32 %v2779_v38, %v2650_v58 }
 0x2c9   : > { %v2638_v30 = vpop.f32.mrf.mxu1  ;;  %v3991_v51 = vpop.f32.mrf.mxu0 }
 0x2ca   : > { %v2651_v60 = vadd.f32 %v2638_v30, %v2529_v54 }
 0x2cb   : > { %v3970_v35 = vpop.f32.mrf.mxu1  ;;  %v2782_v44 = vpop.f32.mrf.mxu0 }
 0x2cc   : > { %v5373_v37 = vadd.f32 %v2782_v44, %v2651_v60 }
 0x2cd   : > { %v2946_v34 = vpop.f32.mrf.mxu1  ;;  %v3992_v40 = vpop.f32.mrf.mxu0 }
 0x2ce   : > { %v2985_v39 = vadd.f32 %v2946_v34, %v5355_v25 }
 0x2cf   : > { %v3997_v46 = vpop.f32.mrf.mxu1  ;;  %v3068_v20 = vpop.f32.mrf.mxu0 }
 0x2d0   : > { %v3107_v48 = vadd.f32 %v3068_v20, %v2985_v39 }
 0x2d1   : > { %v2949_v17 = vpop.f32.mrf.mxu1  ;;  %v4019_v57 = vpop.f32.mrf.mxu0 }
 0x2d2   : > { %v2986_v15 = vadd.f32 %v2949_v17, %v5357_v7 }
 0x2d3   : > { %v3998_v21 = vpop.f32.mrf.mxu1  ;;  %v3071_v8 = vpop.f32.mrf.mxu0 }
 0x2d4   : > { %v3108_v53 = vadd.f32 %v3071_v8, %v2986_v15 }
 0x2d5   : > { %v2954_v26 = vpop.f32.mrf.mxu1  ;;  %v4020_v4 = vpop.f32.mrf.mxu0 }
 0x2d6   : > { %v2987_v38 = vadd.f32 %v2954_v26, %v5359_v22 }
 0x2d7   : > { %v4001_v61 = vpop.f32.mrf.mxu1  ;;  %v3076_v45 = vpop.f32.mrf.mxu0 }
 0x2d8   : > { %v3109_v44 = vadd.f32 %v3076_v45, %v2987_v38 }
 0x2d9   : > { %v2957_v55 = vpop.f32.mrf.mxu1  ;;  %v4023_v6 = vpop.f32.mrf.mxu0 }
 0x2da   : > { %v2988_v34 = vadd.f32 %v2957_v55, %v5361_v33 }
 0x2db   : > { %v4002_v54 = vpop.f32.mrf.mxu1  ;;  %v3079_v3 = vpop.f32.mrf.mxu0 }
 0x2dc   : > { %v3110_v57 = vadd.f32 %v3079_v3, %v2988_v34 }
 0x2dd   : > { %v2962_v31 = vpop.f32.mrf.mxu1  ;;  %v4024_v18 = vpop.f32.mrf.mxu0 }
 0x2de   : > { %v2989_v21 = vadd.f32 %v2962_v31, %v5363_v12 }
 0x2df   : > { %v4005_v13 = vpop.f32.mrf.mxu1  ;;  %v3084_v52 = vpop.f32.mrf.mxu0 }
 0x2e0   : > { %v3111_v45 = vadd.f32 %v3084_v52, %v2989_v21 }
 0x2e1   : > { %v2965_v24 = vpop.f32.mrf.mxu1  ;;  %v4027_v59 = vpop.f32.mrf.mxu0 }
 0x2e2   : > { %v2990_v55 = vadd.f32 %v2965_v24, %v5365_v36 }
 0x2e3   : > { %v4006_v47 = vpop.f32.mrf.mxu1  ;;  %v3087_v2 = vpop.f32.mrf.mxu0 }
 0x2e4   : > { %v3112_v18 = vadd.f32 %v3087_v2, %v2990_v55 }
 0x2e5   : > { %v2970_v43 = vpop.f32.mrf.mxu1  ;;  %v4028_v19 = vpop.f32.mrf.mxu0 }
 0x2e6   : > { %v2991_v13 = vadd.f32 %v2970_v43, %v5367_v56 }
 0x2e7   : > { %v4009_v49 = vpop.f32.mrf.mxu1  ;;  %v3092_v27 = vpop.f32.mrf.mxu0 }
 0x2e8   : > { %v3113_v19 = vadd.f32 %v3092_v27, %v2991_v13 }
 0x2e9   : > { %v2973_v63 = vpop.f32.mrf.mxu1  ;;  %v4031_v14 = vpop.f32.mrf.mxu0 }
 0x2ea   : > { %v2992_v49 = vadd.f32 %v2973_v63, %v5369_v0 }
 0x2eb   : > { %v4010_v1 = vpop.f32.mrf.mxu1  ;;  %v5375_v32 = vpop.f32.mrf.mxu0 }
 0x2ed   : > { %v5377_v9 = vpop.f32.mrf.mxu1  ;;  %v4032_v41 = vpop.f32.mrf.mxu0 }
 0x2ee   : > { %v3114_v41 = vadd.f32 %v5375_v32, %v2992_v49 }
 0x2ef   : > { %v4013_v42 = vpop.f32.mrf.mxu1  ;;  %v5380_v16 = vpop.f32.mrf.mxu0 }
 0x2f0   : > { %v2993_v42 = vadd.f32 %v5377_v9, %v5371_v10 }
 0x2f1   : > { %v5382_v29 = vpop.f32.mrf.mxu1  ;;  %v4035_v50 = vpop.f32.mrf.mxu0 }
 0x2f3   : > { %v4014_v28 = vpop.f32.mrf.mxu1  ;;  %v5385_v62 = vpop.f32.mrf.mxu0 }
 0x2f4   : > { %v3115_v28 = vadd.f32 %v5380_v16, %v2993_v42 }
 0x2f5   : > { %v3212_v11 = vpop.f32.mrf.mxu1  ;;  %v4036_v58 = vpop.f32.mrf.mxu0 }
 0x2f6   : > { %v3251_v25 = vadd.f32 %v3212_v11, %v3107_v48  ;;  %v2994_v48 = vadd.f32 %v5382_v29, %v5373_v37 }
 0x2f7   : > { %v4041_v5 = vpop.f32.mrf.mxu1 }
 0x2f8   : > { %v3268_v30 = vadd.f32 %v5391_v23, %v3251_v25  ;;  %v3116_v58 = vadd.f32 %v5385_v62, %v2994_v48 }
 0x2f9   : > { %v3215_v7 = vpop.f32.mrf.mxu1 }
 0x2fa   : > { %v3278_v60 = vmax.f32 %v3268_v30, 0.0  ;;  %v3252_v51 = vadd.f32 %v3215_v7, %v3108_v53 }
 0x2fb   : > { %v4042_v35 = vpop.f32.mrf.mxu1 }
 0x2fc   : > { %3288 = vst.msk [vmem:[%s5398_s21] sm:$0xff] %vm1957_vm2, %v3278_v60  ;;  %v3269_v22 = vadd.f32 %v5391_v23, %v3252_v51 }
 0x2fd   : > { %v3220_v40 = vpop.f32.mrf.mxu1 }
 0x2fe   : > { %v3279_v46 = vmax.f32 %v3269_v22, 0.0  ;;  %v3253_v20 = vadd.f32 %v3220_v40, %v3109_v44 }
 0x2ff   : > { %v4045_v17 = vpop.f32.mrf.mxu1 }
 0x300   : > { %3289 = vst.msk [vmem:[%s5398_s21 + $0x8] sm:$0xff] %vm1957_vm2, %v3279_v46  ;;  %v3270_v8 = vadd.f32 %v5391_v23, %v3253_v20 }
 0x301   : > { %v3223_v26 = vpop.f32.mrf.mxu1 }
 0x302   : > { %v3280_v4 = vmax.f32 %v3270_v8, 0.0  ;;  %v3254_v33 = vadd.f32 %v3223_v26, %v3110_v57 }
 0x303   : > { %v4046_v61 = vpop.f32.mrf.mxu1 }
 0x304   : > { %3290 = vst.msk [vmem:[%s5398_s21 + $0x10] sm:$0xff] %vm1957_vm2, %v3280_v4  ;;  %v3271_v6 = vadd.f32 %v5391_v23, %v3254_v33 }
 0x305   : > { %v3228_v54 = vpop.f32.mrf.mxu1 }
 0x306   : > { %v3281_v3 = vmax.f32 %v3271_v6, 0.0  ;;  %v3255_v12 = vadd.f32 %v3228_v54, %v3111_v45 }
 0x307   : > { %v4049_v31 = vpop.f32.mrf.mxu1 }
 0x308   : > { %3291 = vst.msk [vmem:[%s5398_s21 + $0x18] sm:$0xff] %vm1957_vm2, %v3281_v3  ;;  %v3272_v59 = vadd.f32 %v5391_v23, %v3255_v12 }
 0x309   : > { %v3231_v52 = vpop.f32.mrf.mxu1 }
 0x30a   : > { %v3282_v47 = vmax.f32 %v3272_v59, 0.0  ;;  %v3256_v36 = vadd.f32 %v3231_v52, %v3112_v18 }
 0x30b   : > { %v4050_v24 = vpop.f32.mrf.mxu1 }
 0x30c   : > { %3292 = vst.msk [vmem:[%s5398_s21 + $0x20] sm:$0xff] %vm1957_vm2, %v3282_v47  ;;  %v3273_v14 = vadd.f32 %v5391_v23, %v3256_v36 }
 0x30d   : > { %v3236_v2 = vpop.f32.mrf.mxu1 }
 0x30e   : > { %v3283_v1 = vmax.f32 %v3273_v14, 0.0  ;;  %v3257_v56 = vadd.f32 %v3236_v2, %v3113_v19 }
 0x30f   : > { %v4053_v43 = vpop.f32.mrf.mxu1 }
 0x310   : > { %3293 = vst.msk [vmem:[%s5398_s21 + $0x28] sm:$0xff] %vm1957_vm2, %v3283_v1  ;;  %v3274_v27 = vadd.f32 %v5391_v23, %v3257_v56 }
 0x311   : > { %v3239_v0 = vpop.f32.mrf.mxu1 }
 0x312   : > { %v3284_v63 = vmax.f32 %v3274_v27, 0.0  ;;  %v3258_v39 = vadd.f32 %v3239_v0, %v3114_v41 }
 0x313   : > { %v4054_v50 = vpop.f32.mrf.mxu1 }
 0x314   : > { %3294 = vst.msk [vmem:[%s5398_s21 + $0x30] sm:$0xff] %vm1957_vm2, %v3284_v63  ;;  %v3275_v10 = vadd.f32 %v5391_v23, %v3258_v39 }
 0x315   : > { %v3244_v32 = vpop.f32.mrf.mxu1 }
 0x316   : > { %v3285_v9 = vmax.f32 %v3275_v10, 0.0  ;;  %v3259_v15 = vadd.f32 %v3244_v32, %v3115_v28 }
 0x317   : > { %v4057_v11 = vpop.f32.mrf.mxu1 }
 0x318   : > { %3295 = vst.msk [vmem:[%s5398_s21 + $0x38] sm:$0xff] %vm1957_vm2, %v3285_v9  ;;  %v3276_v25 = vadd.f32 %v5391_v23, %v3259_v15 }
 0x319   : > { %v3247_v5 = vpop.f32.mrf.mxu1 }
 0x31a   : > { %v3286_v16 = vmax.f32 %v3276_v25, 0.0  ;;  %v3260_v53 = vadd.f32 %v3247_v5, %v3116_v58 }
 0x31b   : > { %v4058_v38 = vpop.f32.mrf.mxu1 }
 0x31c   : > { %3296 = vst.msk [vmem:[%s5398_s21 + $0x40] sm:$0xff] %vm1957_vm2, %v3286_v16  ;;  %v3277_v37 = vadd.f32 %v5391_v23, %v3260_v53 }
 0x31e   : > { %v3287_v29 = vmax.f32 %v3277_v37, 0.0 }
 0x320   : > { %3297 = vst.msk [vmem:[%s5398_s21 + $0x48] sm:$0xff] %vm1957_vm2, %v3287_v29 }
 0x321 PF: > { %s15_s18 = sadd.s32 1, %s4154_s18  }
 0x322   : > { %p12_p4 = scmp.ge.s32.totalorder %s15_s18, 10  }
 0x324   :  { %14 = sbr.rel (!%p12_p4) target bundleno = 1 (0x1), region = 86 }

</bundles_post_ra>
